<compile_context>
chip_gen: v7x
topology: tpu7x:2x2x1
jax: 0.10.0
libtpu: 0.0.40
codegen_flags: <defaults>
</compile_context>

<pallas_src>
import functools

import numpy as np
import jax
import jax.numpy as jnp
from jax.experimental import pallas as pl
from jax.experimental.pallas import tpu as pltpu


MATMUL_DTYPE = jnp.bfloat16      # MXU operand dtype; accumulation stays f32.
VMEM_BUDGET = 36 * 2 ** 20       # target per-step footprint (fits v7x 64 MiB)
VMEM_LIMIT = 48 * 2 ** 20        # explicit scoped limit (v5e default is 16 MiB)
MAX_BATCH_TILE = 8               # bounds trace-time unrolling of im2col copies


# ----------------------------------------------------------------------------
# The single fused kernel.
# ----------------------------------------------------------------------------
def _fused_actor_kernel(cols1_ref, w1_ref, b1_ref, w2_ref, b2_ref,
                        w3_ref, b3_ref, wf1_ref, bf1_ref, wf2_ref, bf2_ref,
                        out_ref,
                        h1_ref, cols2_ref, h2_ref, cols3_ref, a3_ref, feat_ref,
                        *, nb, oh1, ow1, oh2, ow2, oh3, ow3):
    """conv1+ReLU -> conv2+ReLU -> conv3+ReLU -> flatten -> fc1+ReLU -> fc2.

    Each grid step handles `nb` images.  Every scratch buffer is fully
    rewritten inside the step, so the "parallel" batch axis carries no state
    across iterations (safe for megacore sharding).
    """
    f32 = jnp.float32

    # ---- conv1: one fused matmul + bias + ReLU (rows ordered (n, i1, j1)) ----
    a1 = jnp.dot(cols1_ref[...], w1_ref[...], preferred_element_type=f32)
    h1_ref[...] = jnp.maximum(a1 + b1_ref[...], 0.0)

    # ---- conv2 im2col built in VMEM (k=4, s=2): strided-row copies of h1 ----
    # cols2 rows ordered (n, i2, j2); columns ordered (kh, kw, c), c = 32.
    for n in range(nb):
        for i2 in range(oh2):
            dst = (n * oh2 + i2) * ow2
            for kh in range(4):
                src_row = (n * oh1 + 2 * i2 + kh) * ow1
                for kw in range(4):
                    t = kh * 4 + kw
                    cols2_ref[dst:dst + ow2, t * 32:(t + 1) * 32] = (
                        h1_ref[pl.ds(src_row + kw, ow2, 2), :]
                        .astype(cols2_ref.dtype))

    # ---- conv2: one fused matmul + bias + ReLU ----
    a2 = jnp.dot(cols2_ref[...], w2_ref[...], preferred_element_type=f32)
    h2_ref[...] = jnp.maximum(a2 + b2_ref[...], 0.0)

    # ---- conv3 im2col built in VMEM (k=3, s=1): taps concatenated along K ----
    # cols3 rows ordered (p=(i3, j3), n) -> P*9 copies, independent of nb;
    # columns ordered (kh, kw, c), c = 64, K = 576.
    hw2 = oh2 * ow2
    for i3 in range(oh3):
        for j3 in range(ow3):
            p = i3 * ow3 + j3
            for kh in range(3):
                for kw in range(3):
                    t = kh * 3 + kw
                    src = (i3 + kh) * ow2 + (j3 + kw)
                    cols3_ref[p * nb:(p + 1) * nb, t * 64:(t + 1) * 64] = (
                        h2_ref[pl.ds(src, nb, hw2), :].astype(cols3_ref.dtype))

    # ---- conv3: ONE (P*nb, 576) @ (576, 64) matmul + bias + ReLU ----
    a3 = jnp.dot(cols3_ref[...], w3_ref[...], preferred_element_type=f32)
    a3_ref[...] = jnp.maximum(a3 + b3_ref[...], 0.0).astype(a3_ref.dtype)

    # ---- flatten to NHWC feature rows: P contiguous (nb, 64) block stores ----
    for p in range(oh3 * ow3):
        feat_ref[:, p * 64:(p + 1) * 64] = a3_ref[p * nb:(p + 1) * nb, :]

    # ---- fc1 (+ReLU) and fc2; logits written lane-dense (padded to 128) ----
    z1 = jnp.dot(feat_ref[...], wf1_ref[...], preferred_element_type=f32)
    z1 = jnp.maximum(z1 + bf1_ref[...], 0.0)
    z2 = jnp.dot(z1.astype(MATMUL_DTYPE), wf2_ref[...],
                 preferred_element_type=f32)
    out_ref[...] = z2 + bf2_ref[...]


# ----------------------------------------------------------------------------
# Batch-tile sizing against the VMEM budget (generation aware: stays well
# inside v7x's 64 MiB physical VMEM; the explicit vmem_limit covers v5e's
# small default scoped limit).
# ----------------------------------------------------------------------------
def _lane_pad(x):
    return ((x + 127) // 128) * 128


def _pick_batch_tile(n, k1, oh1, ow1, oh2, ow2, oh3, ow3, feat, la):
    per_img = (2 * 2 * oh1 * ow1 * _lane_pad(k1)                  # cols1 (x2 bufs)
               + 4 * oh1 * ow1 * _lane_pad(32)                    # h1 (f32)
               + 2 * oh2 * ow2 * 512                              # cols2 (bf16)
               + 4 * oh2 * ow2 * _lane_pad(64)                    # h2 (f32)
               + 2 * oh3 * ow3 * (_lane_pad(576) + _lane_pad(64)) # cols3 + a3
               + 2 * _lane_pad(feat))                             # feat row
    weights = 2 * 2 * (k1 * 32 + 512 * 64 + 576 * 64 + feat * 512 + 512 * la)
    nb = (VMEM_BUDGET - weights) // max(per_img, 1)
    return int(max(1, min(n, MAX_BATCH_TILE, nb)))


# ----------------------------------------------------------------------------
# pallas_call wrapper.
# ----------------------------------------------------------------------------
def _full2d(shape):
    return pl.BlockSpec(shape, lambda i: (0, 0))


def actor_head_fused(cols1, params, *, n, oh1, ow1, oh2, ow2, oh3, ow3,
                     feat, la):
    k1 = cols1.shape[1]
    rows_img = oh1 * ow1
    nb = _pick_batch_tile(n, k1, oh1, ow1, oh2, ow2, oh3, ow3, feat, la)
    n_pad = pl.cdiv(n, nb) * nb
    num_blocks = n_pad // nb
    if n_pad > n:                                   # pad batch to a tile multiple
        cols1 = jnp.pad(cols1, ((0, (n_pad - n) * rows_img), (0, 0)))
    cols1 = cols1.reshape(num_blocks, nb * rows_img, k1)

    r1 = nb * rows_img
    r2 = nb * oh2 * ow2
    r3 = nb * oh3 * ow3

    kernel = functools.partial(
        _fused_actor_kernel, nb=nb, oh1=oh1, ow1=ow1,
        oh2=oh2, ow2=ow2, oh3=oh3, ow3=ow3)

    flops = 2 * n_pad * (rows_img * k1 * 32 + oh2 * ow2 * 512 * 64
                         + oh3 * ow3 * 576 * 64 + feat * 512 + 512 * la)
    bytes_accessed = (cols1.size * 2 + n_pad * la * 4
                      + 2 * (k1 * 32 + 512 * 64 + 576 * 64
                             + feat * 512 + 512 * la))

    out = pl.pallas_call(
        kernel,
        out_shape=jax.ShapeDtypeStruct((num_blocks, nb, la), jnp.float32),
        grid=(num_blocks,),
        in_specs=[
            pl.BlockSpec((None, r1, k1), lambda i: (i, 0, 0)),
            _full2d(params["w1"].shape), _full2d(params["b1"].shape),
            _full2d(params["w2"].shape), _full2d(params["b2"].shape),
            _full2d(params["w3"].shape), _full2d(params["b3"].shape),
            _full2d(params["wf1"].shape), _full2d(params["bf1"].shape),
            _full2d(params["wf2"].shape), _full2d(params["bf2"].shape),
        ],
        out_specs=pl.BlockSpec((None, nb, la), lambda i: (i, 0, 0)),
        scratch_shapes=[
            pltpu.VMEM((r1, 32), jnp.float32),        # h1  (conv1 activations)
            pltpu.VMEM((r2, 512), MATMUL_DTYPE),      # cols2 (conv2 im2col)
            pltpu.VMEM((r2, 64), jnp.float32),        # h2  (conv2 activations)
            pltpu.VMEM((r3, 576), MATMUL_DTYPE),      # cols3 (conv3 im2col, K=576)
            pltpu.VMEM((r3, 64), MATMUL_DTYPE),       # a3  (conv3 activations)
            pltpu.VMEM((nb, feat), MATMUL_DTYPE),     # flattened features
        ],
        compiler_params=pltpu.CompilerParams(
            dimension_semantics=("parallel",),
            vmem_limit_bytes=VMEM_LIMIT),
        cost_estimate=pl.CostEstimate(
            flops=int(flops), transcendentals=0,
            bytes_accessed=int(bytes_accessed)),
    )(cols1, params["w1"], params["b1"], params["w2"], params["b2"],
      params["w3"], params["b3"], params["wf1"], params["bf1"],
      params["wf2"], params["bf2"])
    return out.reshape(n_pad, la)[:n]


# ----------------------------------------------------------------------------
# Glue: NHWC im2col for conv1 only — slice + stack + reshape, no heavy
# transposes.  Rows ordered (n, oh, ow); columns ordered (kh, kw, c).
# ----------------------------------------------------------------------------
def im2col_nhwc(x, kh, kw, stride):
    n, h, w, c = x.shape
    oh = (h - kh) // stride + 1
    ow = (w - kw) // stride + 1
    patches = [
        x[:, i:i + stride * oh:stride, j:j + stride * ow:stride, :]
        for i in range(kh) for j in range(kw)
    ]
    p = jnp.stack(patches, axis=3)                 # (n, oh, ow, kh*kw, c)
    return p.reshape(n * oh * ow, kh * kw * c), oh, ow


# ----------------------------------------------------------------------------
# Parameter init: orthogonal (like the PyTorch module), pre-flattened /
# pre-transposed ONCE into kernel-ready (K, N) bf16 layout.
# ----------------------------------------------------------------------------
def _orthogonal(key, shape, gain):
    flat = (shape[0], int(np.prod(shape[1:])))
    w = jax.nn.initializers.orthogonal(scale=gain)(key, flat, jnp.float32)
    return w.reshape(shape)


def _conv_w_flat(w):
    """(OC, C, KH, KW) -> (KH*KW*C, OC): rows match NHWC im2col column order."""
    oc, c, kh, kw = w.shape
    return jnp.transpose(w, (2, 3, 1, 0)).reshape(kh * kw * c, oc)


def make_params(img_size, num_actions, key):
    c, h, w = img_size
    relu_gain = float(np.sqrt(2.0))               # nn.init.calculate_gain('relu')
    ks = jax.random.split(key, 5)

    oh1, ow1 = (h - 8) // 4 + 1, (w - 8) // 4 + 1
    oh2, ow2 = (oh1 - 4) // 2 + 1, (ow1 - 4) // 2 + 1
    oh3, ow3 = oh2 - 2, ow2 - 2
    assert oh3 >= 1 and ow3 >= 1, "image too small for this conv stack"
    feat = 64 * oh3 * ow3
    la = ((num_actions + 127) // 128) * 128       # lane-dense padded logits width

    conv1_w = _orthogonal(ks[0], (32, c, 8, 8), relu_gain)
    conv2_w = _orthogonal(ks[1], (64, 32, 4, 4), relu_gain)
    conv3_w = _orthogonal(ks[2], (64, 64, 3, 3), relu_gain)
    fc1_w = _orthogonal(ks[3], (512, feat), relu_gain)
    fc2_w = _orthogonal(ks[4], (num_actions, 512), 1.0)

    # fc1 columns permuted from NCHW flatten (c, h, w) to NHWC flatten (h, w, c).
    fc1_nhwc = (fc1_w.reshape(512, 64, oh3, ow3)
                .transpose(0, 2, 3, 1).reshape(512, feat))

    params = {
        "w1": _conv_w_flat(conv1_w).astype(MATMUL_DTYPE),        # (KH*KW*C, 32)
        "b1": jnp.zeros((1, 32), jnp.float32),
        "w2": _conv_w_flat(conv2_w).astype(MATMUL_DTYPE),        # (512, 64)
        "b2": jnp.zeros((1, 64), jnp.float32),
        "w3": _conv_w_flat(conv3_w).astype(MATMUL_DTYPE),        # (576, 64)
        "b3": jnp.zeros((1, 64), jnp.float32),
        "wf1": jnp.transpose(fc1_nhwc).astype(MATMUL_DTYPE),     # (feat, 512)
        "bf1": jnp.zeros((1, 512), jnp.float32),
        "wf2": jnp.pad(jnp.transpose(fc2_w),                     # (512, la) padded
                       ((0, 0), (0, la - num_actions))).astype(MATMUL_DTYPE),
        "bf2": jnp.zeros((1, la), jnp.float32),
    }
    return params, feat


# ----------------------------------------------------------------------------
# Forward pass (ActorNet.forward): featnet -> pnet1 -> pnet2 (logits).
# ----------------------------------------------------------------------------
@functools.partial(jax.jit, static_argnames=("num_actions",))
def actor_net_forward(params, x, *, num_actions):
    """x: (N, C, H, W) float32 (PyTorch layout). Returns (N, num_actions) f32."""
    n = x.shape[0]
    x = jnp.transpose(x, (0, 2, 3, 1)).astype(MATMUL_DTYPE)   # NCHW -> NHWC once
    cols1, oh1, ow1 = im2col_nhwc(x, 8, 8, 4)                 # conv1 im2col (XLA)
    oh2, ow2 = (oh1 - 4) // 2 + 1, (ow1 - 4) // 2 + 1
    oh3, ow3 = oh2 - 2, ow2 - 2
    feat = 64 * oh3 * ow3
    la = params["wf2"].shape[1]
    logits_pad = actor_head_fused(
        cols1, params, n=n, oh1=oh1, ow1=ow1, oh2=oh2, ow2=ow2,
        oh3=oh3, ow3=ow3, feat=feat, la=la)
    return logits_pad[:, :num_actions]


if __name__ == "__main__":
    # img_size=(C,H,W)=(4,36,36): 36 -> conv1(k8,s4) -> 8 -> conv2(k4,s2) -> 3
    #                             -> conv3(k3,s1) -> 1 ;  feat = 64*1*1 = 64
    img_size = (4, 36, 36)
    num_actions = 6
    batch = 2

    key = jax.random.PRNGKey(0)
    k_param, k_x = jax.random.split(key)
    params, feat_size = make_params(img_size, num_actions, k_param)

    x = jax.random.normal(k_x, (batch, *img_size), dtype=jnp.float32)  # NCHW

    logits = actor_net_forward(params, x, num_actions=num_actions)
    logits = jax.block_until_ready(logits)

    assert logits.shape == (batch, num_actions)
    assert logits.dtype == jnp.float32
    assert bool(jnp.isfinite(logits).all())
    # TODO(synk): ActorNet.act (Categorical sampling + .item()) is host-side
    # control flow and intentionally not implemented as a kernel.
    print("KERNEL_OK")
</pallas_src>

<mosaic_0001>
module attributes {stable_mosaic.version = 11 : i64} {
  func.func @_fused_actor_kernel(%arg0: i32, %arg1: memref<1x128x256xbf16, #tpu.memory_space<vmem>>, %arg2: memref<256x32xbf16, #tpu.memory_space<vmem>>, %arg3: memref<1x32xf32, #tpu.memory_space<vmem>>, %arg4: memref<512x64xbf16, #tpu.memory_space<vmem>>, %arg5: memref<1x64xf32, #tpu.memory_space<vmem>>, %arg6: memref<576x64xbf16, #tpu.memory_space<vmem>>, %arg7: memref<1x64xf32, #tpu.memory_space<vmem>>, %arg8: memref<64x512xbf16, #tpu.memory_space<vmem>>, %arg9: memref<1x512xf32, #tpu.memory_space<vmem>>, %arg10: memref<512x128xbf16, #tpu.memory_space<vmem>>, %arg11: memref<1x128xf32, #tpu.memory_space<vmem>>, %arg12: memref<1x2x128xf32, #tpu.memory_space<vmem>>, %arg13: memref<128x32xf32, #tpu.memory_space<vmem>>, %arg14: memref<18x512xbf16, #tpu.memory_space<vmem>>, %arg15: memref<18x64xf32, #tpu.memory_space<vmem>>, %arg16: memref<2x576xbf16, #tpu.memory_space<vmem>>, %arg17: memref<2x64xbf16, #tpu.memory_space<vmem>>, %arg18: memref<2x64xbf16, #tpu.memory_space<vmem>>) attributes {dimension_semantics = [#tpu.dimension_semantics<parallel>], iteration_bounds = array<i64: 1>, scalar_prefetch = 0 : i64, scratch_operands = 6 : i64, tpu.core_type = #tpu.core_type<tc>, window_params = [{transform_indices = @transform_0, window_bounds = array<i64: 1, 128, 256>}, {pipeline_mode = #tpu.pipeline_mode<synchronous>, transform_indices = @transform_1, window_bounds = array<i64: 256, 32>}, {pipeline_mode = #tpu.pipeline_mode<synchronous>, transform_indices = @transform_2, window_bounds = array<i64: 1, 32>}, {pipeline_mode = #tpu.pipeline_mode<synchronous>, transform_indices = @transform_3, window_bounds = array<i64: 512, 64>}, {pipeline_mode = #tpu.pipeline_mode<synchronous>, transform_indices = @transform_4, window_bounds = array<i64: 1, 64>}, {pipeline_mode = #tpu.pipeline_mode<synchronous>, transform_indices = @transform_5, window_bounds = array<i64: 576, 64>}, {pipeline_mode = #tpu.pipeline_mode<synchronous>, transform_indices = @transform_6, window_bounds = array<i64: 1, 64>}, {pipeline_mode = #tpu.pipeline_mode<synchronous>, transform_indices = @transform_7, window_bounds = array<i64: 64, 512>}, {pipeline_mode = #tpu.pipeline_mode<synchronous>, transform_indices = @transform_8, window_bounds = array<i64: 1, 512>}, {pipeline_mode = #tpu.pipeline_mode<synchronous>, transform_indices = @transform_9, window_bounds = array<i64: 512, 128>}, {pipeline_mode = #tpu.pipeline_mode<synchronous>, transform_indices = @transform_10, window_bounds = array<i64: 1, 128>}, {transform_indices = @transform_11, window_bounds = array<i64: 1, 2, 128>}]} {
    %c0 = arith.constant 0 : index
    %c0_0 = arith.constant 0 : index
    %c0_1 = arith.constant 0 : index
    %0 = vector.load %arg1[%c0, %c0_0, %c0_1] : memref<1x128x256xbf16, #tpu.memory_space<vmem>>, vector<1x128x256xbf16>
    %1 = vector.shape_cast %0 : vector<1x128x256xbf16> to vector<128x256xbf16>
    %c0_2 = arith.constant 0 : index
    %c0_3 = arith.constant 0 : index
    %2 = vector.load %arg2[%c0_2, %c0_3] : memref<256x32xbf16, #tpu.memory_space<vmem>>, vector<256x32xbf16>
    %cst = arith.constant dense<0.000000e+00> : vector<128x32xf32>
    %3 = tpu.matmul %1, %2, %cst {dimension_numbers = #tpu.dot_dimension_numbers<[1], [0], [0], [1], [0, 0, 1, 1], [], []>} : vector<128x256xbf16>, vector<256x32xbf16>, vector<128x32xf32> -> vector<128x32xf32>
    %c0_4 = arith.constant 0 : index
    %c0_5 = arith.constant 0 : index
    %4 = vector.load %arg3[%c0_4, %c0_5] : memref<1x32xf32, #tpu.memory_space<vmem>>, vector<1x32xf32>
    %5 = vector.broadcast %4 : vector<1x32xf32> to vector<128x32xf32>
    %6 = arith.addf %3, %5 : vector<128x32xf32>
    %cst_6 = arith.constant 0.000000e+00 : f32
    %7 = vector.broadcast %cst_6 : f32 to vector<128x32xf32>
    %8 = arith.maximumf %6, %7 : vector<128x32xf32>
    %c0_7 = arith.constant 0 : index
    %c0_8 = arith.constant 0 : index
    %9 = vector.load %arg13[%c0_7, %c0_8] : memref<128x32xf32, #tpu.memory_space<vmem>>, vector<128x32xf32>
    tpu.vector_store %arg13[%c0_7, %c0_8], %8 {strides = array<i32>} : memref<128x32xf32, #tpu.memory_space<vmem>>, vector<128x32xf32>,
    %c0_9 = arith.constant 0 : index
    %c0_10 = arith.constant 0 : index
    %10 = tpu.strided_load %arg13[%c0_9, %c0_10] {strides = array<i32: 2, 1>} : memref<128x32xf32, #tpu.memory_space<vmem>>, vector<3x32xf32>
    %11 = arith.truncf %10 : vector<3x32xf32> to vector<3x32xbf16>
    %c0_11 = arith.constant 0 : index
    %c0_12 = arith.constant 0 : index
    %12 = vector.load %arg14[%c0_11, %c0_12] : memref<18x512xbf16, #tpu.memory_space<vmem>>, vector<3x32xbf16>
    tpu.vector_store %arg14[%c0_11, %c0_12], %11 {strides = array<i32>} : memref<18x512xbf16, #tpu.memory_space<vmem>>, vector<3x32xbf16>,
    %c1 = arith.constant 1 : index
    %c0_13 = arith.constant 0 : index
    %13 = tpu.strided_load %arg13[%c1, %c0_13] {strides = array<i32: 2, 1>} : memref<128x32xf32, #tpu.memory_space<vmem>>, vector<3x32xf32>
    %14 = arith.truncf %13 : vector<3x32xf32> to vector<3x32xbf16>
    %c0_14 = arith.constant 0 : index
    %c32 = arith.constant 32 : index
    %15 = vector.load %arg14[%c0_14, %c32] : memref<18x512xbf16, #tpu.memory_space<vmem>>, vector<3x32xbf16>
    tpu.vector_store %arg14[%c0_14, %c32], %14 {strides = array<i32>} : memref<18x512xbf16, #tpu.memory_space<vmem>>, vector<3x32xbf16>,
    %c2 = arith.constant 2 : index
    %c0_15 = arith.constant 0 : index
    %16 = tpu.strided_load %arg13[%c2, %c0_15] {strides = array<i32: 2, 1>} : memref<128x32xf32, #tpu.memory_space<vmem>>, vector<3x32xf32>
    %17 = arith.truncf %16 : vector<3x32xf32> to vector<3x32xbf16>
    %c0_16 = arith.constant 0 : index
    %c64 = arith.constant 64 : index
    %18 = vector.load %arg14[%c0_16, %c64] : memref<18x512xbf16, #tpu.memory_space<vmem>>, vector<3x32xbf16>
    tpu.vector_store %arg14[%c0_16, %c64], %17 {strides = array<i32>} : memref<18x512xbf16, #tpu.memory_space<vmem>>, vector<3x32xbf16>,
    %c3 = arith.constant 3 : index
    %c0_17 = arith.constant 0 : index
    %19 = tpu.strided_load %arg13[%c3, %c0_17] {strides = array<i32: 2, 1>} : memref<128x32xf32, #tpu.memory_space<vmem>>, vector<3x32xf32>
    %20 = arith.truncf %19 : vector<3x32xf32> to vector<3x32xbf16>
    %c0_18 = arith.constant 0 : index
    %c96 = arith.constant 96 : index
    %21 = vector.load %arg14[%c0_18, %c96] : memref<18x512xbf16, #tpu.memory_space<vmem>>, vector<3x32xbf16>
    tpu.vector_store %arg14[%c0_18, %c96], %20 {strides = array<i32>} : memref<18x512xbf16, #tpu.memory_space<vmem>>, vector<3x32xbf16>,
    %c8 = arith.constant 8 : index
    %c0_19 = arith.constant 0 : index
    %22 = tpu.strided_load %arg13[%c8, %c0_19] {strides = array<i32: 2, 1>} : memref<128x32xf32, #tpu.memory_space<vmem>>, vector<3x32xf32>
    %23 = arith.truncf %22 : vector<3x32xf32> to vector<3x32xbf16>
    %c0_20 = arith.constant 0 : index
    %c128 = arith.constant 128 : index
    %24 = vector.load %arg14[%c0_20, %c128] : memref<18x512xbf16, #tpu.memory_space<vmem>>, vector<3x32xbf16>
    tpu.vector_store %arg14[%c0_20, %c128], %23 {strides = array<i32>} : memref<18x512xbf16, #tpu.memory_space<vmem>>, vector<3x32xbf16>,
    %c9 = arith.constant 9 : index
    %c0_21 = arith.constant 0 : index
    %25 = tpu.strided_load %arg13[%c9, %c0_21] {strides = array<i32: 2, 1>} : memref<128x32xf32, #tpu.memory_space<vmem>>, vector<3x32xf32>
    %26 = arith.truncf %25 : vector<3x32xf32> to vector<3x32xbf16>
    %c0_22 = arith.constant 0 : index
    %c160 = arith.constant 160 : index
    %27 = vector.load %arg14[%c0_22, %c160] : memref<18x512xbf16, #tpu.memory_space<vmem>>, vector<3x32xbf16>
    tpu.vector_store %arg14[%c0_22, %c160], %26 {strides = array<i32>} : memref<18x512xbf16, #tpu.memory_space<vmem>>, vector<3x32xbf16>,
    %c10 = arith.constant 10 : index
    %c0_23 = arith.constant 0 : index
    %28 = tpu.strided_load %arg13[%c10, %c0_23] {strides = array<i32: 2, 1>} : memref<128x32xf32, #tpu.memory_space<vmem>>, vector<3x32xf32>
    %29 = arith.truncf %28 : vector<3x32xf32> to vector<3x32xbf16>
    %c0_24 = arith.constant 0 : index
    %c192 = arith.constant 192 : index
    %30 = vector.load %arg14[%c0_24, %c192] : memref<18x512xbf16, #tpu.memory_space<vmem>>, vector<3x32xbf16>
    tpu.vector_store %arg14[%c0_24, %c192], %29 {strides = array<i32>} : memref<18x512xbf16, #tpu.memory_space<vmem>>, vector<3x32xbf16>,
    %c11 = arith.constant 11 : index
    %c0_25 = arith.constant 0 : index
    %31 = tpu.strided_load %arg13[%c11, %c0_25] {strides = array<i32: 2, 1>} : memref<128x32xf32, #tpu.memory_space<vmem>>, vector<3x32xf32>
    %32 = arith.truncf %31 : vector<3x32xf32> to vector<3x32xbf16>
    %c0_26 = arith.constant 0 : index
    %c224 = arith.constant 224 : index
    %33 = vector.load %arg14[%c0_26, %c224] : memref<18x512xbf16, #tpu.memory_space<vmem>>, vector<3x32xbf16>
    tpu.vector_store %arg14[%c0_26, %c224], %32 {strides = array<i32>} : memref<18x512xbf16, #tpu.memory_space<vmem>>, vector<3x32xbf16>,
    %c16 = arith.constant 16 : index
    %c0_27 = arith.constant 0 : index
    %34 = tpu.strided_load %arg13[%c16, %c0_27] {strides = array<i32: 2, 1>} : memref<128x32xf32, #tpu.memory_space<vmem>>, vector<3x32xf32>
    %35 = arith.truncf %34 : vector<3x32xf32> to vector<3x32xbf16>
    %c0_28 = arith.constant 0 : index
    %c256 = arith.constant 256 : index
    %36 = vector.load %arg14[%c0_28, %c256] : memref<18x512xbf16, #tpu.memory_space<vmem>>, vector<3x32xbf16>
    tpu.vector_store %arg14[%c0_28, %c256], %35 {strides = array<i32>} : memref<18x512xbf16, #tpu.memory_space<vmem>>, vector<3x32xbf16>,
    %c17 = arith.constant 17 : index
    %c0_29 = arith.constant 0 : index
    %37 = tpu.strided_load %arg13[%c17, %c0_29] {strides = array<i32: 2, 1>} : memref<128x32xf32, #tpu.memory_space<vmem>>, vector<3x32xf32>
    %38 = arith.truncf %37 : vector<3x32xf32> to vector<3x32xbf16>
    %c0_30 = arith.constant 0 : index
    %c288 = arith.constant 288 : index
    %39 = vector.load %arg14[%c0_30, %c288] : memref<18x512xbf16, #tpu.memory_space<vmem>>, vector<3x32xbf16>
    tpu.vector_store %arg14[%c0_30, %c288], %38 {strides = array<i32>} : memref<18x512xbf16, #tpu.memory_space<vmem>>, vector<3x32xbf16>,
    %c18 = arith.constant 18 : index
    %c0_31 = arith.constant 0 : index
    %40 = tpu.strided_load %arg13[%c18, %c0_31] {strides = array<i32: 2, 1>} : memref<128x32xf32, #tpu.memory_space<vmem>>, vector<3x32xf32>
    %41 = arith.truncf %40 : vector<3x32xf32> to vector<3x32xbf16>
    %c0_32 = arith.constant 0 : index
    %c320 = arith.constant 320 : index
    %42 = vector.load %arg14[%c0_32, %c320] : memref<18x512xbf16, #tpu.memory_space<vmem>>, vector<3x32xbf16>
    tpu.vector_store %arg14[%c0_32, %c320], %41 {strides = array<i32>} : memref<18x512xbf16, #tpu.memory_space<vmem>>, vector<3x32xbf16>,
    %c19 = arith.constant 19 : index
    %c0_33 = arith.constant 0 : index
    %43 = tpu.strided_load %arg13[%c19, %c0_33] {strides = array<i32: 2, 1>} : memref<128x32xf32, #tpu.memory_space<vmem>>, vector<3x32xf32>
    %44 = arith.truncf %43 : vector<3x32xf32> to vector<3x32xbf16>
    %c0_34 = arith.constant 0 : index
    %c352 = arith.constant 352 : index
    %45 = vector.load %arg14[%c0_34, %c352] : memref<18x512xbf16, #tpu.memory_space<vmem>>, vector<3x32xbf16>
    tpu.vector_store %arg14[%c0_34, %c352], %44 {strides = array<i32>} : memref<18x512xbf16, #tpu.memory_space<vmem>>, vector<3x32xbf16>,
    %c24 = arith.constant 24 : index
    %c0_35 = arith.constant 0 : index
    %46 = tpu.strided_load %arg13[%c24, %c0_35] {strides = array<i32: 2, 1>} : memref<128x32xf32, #tpu.memory_space<vmem>>, vector<3x32xf32>
    %47 = arith.truncf %46 : vector<3x32xf32> to vector<3x32xbf16>
    %c0_36 = arith.constant 0 : index
    %c384 = arith.constant 384 : index
    %48 = vector.load %arg14[%c0_36, %c384] : memref<18x512xbf16, #tpu.memory_space<vmem>>, vector<3x32xbf16>
    tpu.vector_store %arg14[%c0_36, %c384], %47 {strides = array<i32>} : memref<18x512xbf16, #tpu.memory_space<vmem>>, vector<3x32xbf16>,
    %c25 = arith.constant 25 : index
    %c0_37 = arith.constant 0 : index
    %49 = tpu.strided_load %arg13[%c25, %c0_37] {strides = array<i32: 2, 1>} : memref<128x32xf32, #tpu.memory_space<vmem>>, vector<3x32xf32>
    %50 = arith.truncf %49 : vector<3x32xf32> to vector<3x32xbf16>
    %c0_38 = arith.constant 0 : index
    %c416 = arith.constant 416 : index
    %51 = vector.load %arg14[%c0_38, %c416] : memref<18x512xbf16, #tpu.memory_space<vmem>>, vector<3x32xbf16>
    tpu.vector_store %arg14[%c0_38, %c416], %50 {strides = array<i32>} : memref<18x512xbf16, #tpu.memory_space<vmem>>, vector<3x32xbf16>,
    %c26 = arith.constant 26 : index
    %c0_39 = arith.constant 0 : index
    %52 = tpu.strided_load %arg13[%c26, %c0_39] {strides = array<i32: 2, 1>} : memref<128x32xf32, #tpu.memory_space<vmem>>, vector<3x32xf32>
    %53 = arith.truncf %52 : vector<3x32xf32> to vector<3x32xbf16>
    %c0_40 = arith.constant 0 : index
    %c448 = arith.constant 448 : index
    %54 = vector.load %arg14[%c0_40, %c448] : memref<18x512xbf16, #tpu.memory_space<vmem>>, vector<3x32xbf16>
    tpu.vector_store %arg14[%c0_40, %c448], %53 {strides = array<i32>} : memref<18x512xbf16, #tpu.memory_space<vmem>>, vector<3x32xbf16>,
    %c27 = arith.constant 27 : index
    %c0_41 = arith.constant 0 : index
    %55 = tpu.strided_load %arg13[%c27, %c0_41] {strides = array<i32: 2, 1>} : memref<128x32xf32, #tpu.memory_space<vmem>>, vector<3x32xf32>
    %56 = arith.truncf %55 : vector<3x32xf32> to vector<3x32xbf16>
    %c0_42 = arith.constant 0 : index
    %c480 = arith.constant 480 : index
    %57 = vector.load %arg14[%c0_42, %c480] : memref<18x512xbf16, #tpu.memory_space<vmem>>, vector<3x32xbf16>
    tpu.vector_store %arg14[%c0_42, %c480], %56 {strides = array<i32>} : memref<18x512xbf16, #tpu.memory_space<vmem>>, vector<3x32xbf16>,
    %c16_43 = arith.constant 16 : index
    %c0_44 = arith.constant 0 : index
    %58 = tpu.strided_load %arg13[%c16_43, %c0_44] {strides = array<i32: 2, 1>} : memref<128x32xf32, #tpu.memory_space<vmem>>, vector<3x32xf32>
    %59 = arith.truncf %58 : vector<3x32xf32> to vector<3x32xbf16>
    %c3_45 = arith.constant 3 : index
    %c0_46 = arith.constant 0 : index
    %60 = vector.load %arg14[%c3_45, %c0_46] : memref<18x512xbf16, #tpu.memory_space<vmem>>, vector<3x32xbf16>
    tpu.vector_store %arg14[%c3_45, %c0_46], %59 {strides = array<i32>} : memref<18x512xbf16, #tpu.memory_space<vmem>>, vector<3x32xbf16>,
    %c17_47 = arith.constant 17 : index
    %c0_48 = arith.constant 0 : index
    %61 = tpu.strided_load %arg13[%c17_47, %c0_48] {strides = array<i32: 2, 1>} : memref<128x32xf32, #tpu.memory_space<vmem>>, vector<3x32xf32>
    %62 = arith.truncf %61 : vector<3x32xf32> to vector<3x32xbf16>
    %c3_49 = arith.constant 3 : index
    %c32_50 = arith.constant 32 : index
    %63 = vector.load %arg14[%c3_49, %c32_50] : memref<18x512xbf16, #tpu.memory_space<vmem>>, vector<3x32xbf16>
    tpu.vector_store %arg14[%c3_49, %c32_50], %62 {strides = array<i32>} : memref<18x512xbf16, #tpu.memory_space<vmem>>, vector<3x32xbf16>,
    %c18_51 = arith.constant 18 : index
    %c0_52 = arith.constant 0 : index
    %64 = tpu.strided_load %arg13[%c18_51, %c0_52] {strides = array<i32: 2, 1>} : memref<128x32xf32, #tpu.memory_space<vmem>>, vector<3x32xf32>
    %65 = arith.truncf %64 : vector<3x32xf32> to vector<3x32xbf16>
    %c3_53 = arith.constant 3 : index
    %c64_54 = arith.constant 64 : index
    %66 = vector.load %arg14[%c3_53, %c64_54] : memref<18x512xbf16, #tpu.memory_space<vmem>>, vector<3x32xbf16>
    tpu.vector_store %arg14[%c3_53, %c64_54], %65 {strides = array<i32>} : memref<18x512xbf16, #tpu.memory_space<vmem>>, vector<3x32xbf16>,
    %c19_55 = arith.constant 19 : index
    %c0_56 = arith.constant 0 : index
    %67 = tpu.strided_load %arg13[%c19_55, %c0_56] {strides = array<i32: 2, 1>} : memref<128x32xf32, #tpu.memory_space<vmem>>, vector<3x32xf32>
    %68 = arith.truncf %67 : vector<3x32xf32> to vector<3x32xbf16>
    %c3_57 = arith.constant 3 : index
    %c96_58 = arith.constant 96 : index
    %69 = vector.load %arg14[%c3_57, %c96_58] : memref<18x512xbf16, #tpu.memory_space<vmem>>, vector<3x32xbf16>
    tpu.vector_store %arg14[%c3_57, %c96_58], %68 {strides = array<i32>} : memref<18x512xbf16, #tpu.memory_space<vmem>>, vector<3x32xbf16>,
    %c24_59 = arith.constant 24 : index
    %c0_60 = arith.constant 0 : index
    %70 = tpu.strided_load %arg13[%c24_59, %c0_60] {strides = array<i32: 2, 1>} : memref<128x32xf32, #tpu.memory_space<vmem>>, vector<3x32xf32>
    %71 = arith.truncf %70 : vector<3x32xf32> to vector<3x32xbf16>
    %c3_61 = arith.constant 3 : index
    %c128_62 = arith.constant 128 : index
    %72 = vector.load %arg14[%c3_61, %c128_62] : memref<18x512xbf16, #tpu.memory_space<vmem>>, vector<3x32xbf16>
    tpu.vector_store %arg14[%c3_61, %c128_62], %71 {strides = array<i32>} : memref<18x512xbf16, #tpu.memory_space<vmem>>, vector<3x32xbf16>,
    %c25_63 = arith.constant 25 : index
    %c0_64 = arith.constant 0 : index
    %73 = tpu.strided_load %arg13[%c25_63, %c0_64] {strides = array<i32: 2, 1>} : memref<128x32xf32, #tpu.memory_space<vmem>>, vector<3x32xf32>
    %74 = arith.truncf %73 : vector<3x32xf32> to vector<3x32xbf16>
    %c3_65 = arith.constant 3 : index
    %c160_66 = arith.constant 160 : index
    %75 = vector.load %arg14[%c3_65, %c160_66] : memref<18x512xbf16, #tpu.memory_space<vmem>>, vector<3x32xbf16>
    tpu.vector_store %arg14[%c3_65, %c160_66], %74 {strides = array<i32>} : memref<18x512xbf16, #tpu.memory_space<vmem>>, vector<3x32xbf16>,
    %c26_67 = arith.constant 26 : index
    %c0_68 = arith.constant 0 : index
    %76 = tpu.strided_load %arg13[%c26_67, %c0_68] {strides = array<i32: 2, 1>} : memref<128x32xf32, #tpu.memory_space<vmem>>, vector<3x32xf32>
    %77 = arith.truncf %76 : vector<3x32xf32> to vector<3x32xbf16>
    %c3_69 = arith.constant 3 : index
    %c192_70 = arith.constant 192 : index
    %78 = vector.load %arg14[%c3_69, %c192_70] : memref<18x512xbf16, #tpu.memory_space<vmem>>, vector<3x32xbf16>
    tpu.vector_store %arg14[%c3_69, %c192_70], %77 {strides = array<i32>} : memref<18x512xbf16, #tpu.memory_space<vmem>>, vector<3x32xbf16>,
    %c27_71 = arith.constant 27 : index
    %c0_72 = arith.constant 0 : index
    %79 = tpu.strided_load %arg13[%c27_71, %c0_72] {strides = array<i32: 2, 1>} : memref<128x32xf32, #tpu.memory_space<vmem>>, vector<3x32xf32>
    %80 = arith.truncf %79 : vector<3x32xf32> to vector<3x32xbf16>
    %c3_73 = arith.constant 3 : index
    %c224_74 = arith.constant 224 : index
    %81 = vector.load %arg14[%c3_73, %c224_74] : memref<18x512xbf16, #tpu.memory_space<vmem>>, vector<3x32xbf16>
    tpu.vector_store %arg14[%c3_73, %c224_74], %80 {strides = array<i32>} : memref<18x512xbf16, #tpu.memory_space<vmem>>, vector<3x32xbf16>,
    %c32_75 = arith.constant 32 : index
    %c0_76 = arith.constant 0 : index
    %82 = tpu.strided_load %arg13[%c32_75, %c0_76] {strides = array<i32: 2, 1>} : memref<128x32xf32, #tpu.memory_space<vmem>>, vector<3x32xf32>
    %83 = arith.truncf %82 : vector<3x32xf32> to vector<3x32xbf16>
    %c3_77 = arith.constant 3 : index
    %c256_78 = arith.constant 256 : index
    %84 = vector.load %arg14[%c3_77, %c256_78] : memref<18x512xbf16, #tpu.memory_space<vmem>>, vector<3x32xbf16>
    tpu.vector_store %arg14[%c3_77, %c256_78], %83 {strides = array<i32>} : memref<18x512xbf16, #tpu.memory_space<vmem>>, vector<3x32xbf16>,
    %c33 = arith.constant 33 : index
    %c0_79 = arith.constant 0 : index
    %85 = tpu.strided_load %arg13[%c33, %c0_79] {strides = array<i32: 2, 1>} : memref<128x32xf32, #tpu.memory_space<vmem>>, vector<3x32xf32>
    %86 = arith.truncf %85 : vector<3x32xf32> to vector<3x32xbf16>
    %c3_80 = arith.constant 3 : index
    %c288_81 = arith.constant 288 : index
    %87 = vector.load %arg14[%c3_80, %c288_81] : memref<18x512xbf16, #tpu.memory_space<vmem>>, vector<3x32xbf16>
    tpu.vector_store %arg14[%c3_80, %c288_81], %86 {strides = array<i32>} : memref<18x512xbf16, #tpu.memory_space<vmem>>, vector<3x32xbf16>,
    %c34 = arith.constant 34 : index
    %c0_82 = arith.constant 0 : index
    %88 = tpu.strided_load %arg13[%c34, %c0_82] {strides = array<i32: 2, 1>} : memref<128x32xf32, #tpu.memory_space<vmem>>, vector<3x32xf32>
    %89 = arith.truncf %88 : vector<3x32xf32> to vector<3x32xbf16>
    %c3_83 = arith.constant 3 : index
    %c320_84 = arith.constant 320 : index
    %90 = vector.load %arg14[%c3_83, %c320_84] : memref<18x512xbf16, #tpu.memory_space<vmem>>, vector<3x32xbf16>
    tpu.vector_store %arg14[%c3_83, %c320_84], %89 {strides = array<i32>} : memref<18x512xbf16, #tpu.memory_space<vmem>>, vector<3x32xbf16>,
    %c35 = arith.constant 35 : index
    %c0_85 = arith.constant 0 : index
    %91 = tpu.strided_load %arg13[%c35, %c0_85] {strides = array<i32: 2, 1>} : memref<128x32xf32, #tpu.memory_space<vmem>>, vector<3x32xf32>
    %92 = arith.truncf %91 : vector<3x32xf32> to vector<3x32xbf16>
    %c3_86 = arith.constant 3 : index
    %c352_87 = arith.constant 352 : index
    %93 = vector.load %arg14[%c3_86, %c352_87] : memref<18x512xbf16, #tpu.memory_space<vmem>>, vector<3x32xbf16>
    tpu.vector_store %arg14[%c3_86, %c352_87], %92 {strides = array<i32>} : memref<18x512xbf16, #tpu.memory_space<vmem>>, vector<3x32xbf16>,
    %c40 = arith.constant 40 : index
    %c0_88 = arith.constant 0 : index
    %94 = tpu.strided_load %arg13[%c40, %c0_88] {strides = array<i32: 2, 1>} : memref<128x32xf32, #tpu.memory_space<vmem>>, vector<3x32xf32>
    %95 = arith.truncf %94 : vector<3x32xf32> to vector<3x32xbf16>
    %c3_89 = arith.constant 3 : index
    %c384_90 = arith.constant 384 : index
    %96 = vector.load %arg14[%c3_89, %c384_90] : memref<18x512xbf16, #tpu.memory_space<vmem>>, vector<3x32xbf16>
    tpu.vector_store %arg14[%c3_89, %c384_90], %95 {strides = array<i32>} : memref<18x512xbf16, #tpu.memory_space<vmem>>, vector<3x32xbf16>,
    %c41 = arith.constant 41 : index
    %c0_91 = arith.constant 0 : index
    %97 = tpu.strided_load %arg13[%c41, %c0_91] {strides = array<i32: 2, 1>} : memref<128x32xf32, #tpu.memory_space<vmem>>, vector<3x32xf32>
    %98 = arith.truncf %97 : vector<3x32xf32> to vector<3x32xbf16>
    %c3_92 = arith.constant 3 : index
    %c416_93 = arith.constant 416 : index
    %99 = vector.load %arg14[%c3_92, %c416_93] : memref<18x512xbf16, #tpu.memory_space<vmem>>, vector<3x32xbf16>
    tpu.vector_store %arg14[%c3_92, %c416_93], %98 {strides = array<i32>} : memref<18x512xbf16, #tpu.memory_space<vmem>>, vector<3x32xbf16>,
    %c42 = arith.constant 42 : index
    %c0_94 = arith.constant 0 : index
    %100 = tpu.strided_load %arg13[%c42, %c0_94] {strides = array<i32: 2, 1>} : memref<128x32xf32, #tpu.memory_space<vmem>>, vector<3x32xf32>
    %101 = arith.truncf %100 : vector<3x32xf32> to vector<3x32xbf16>
    %c3_95 = arith.constant 3 : index
    %c448_96 = arith.constant 448 : index
    %102 = vector.load %arg14[%c3_95, %c448_96] : memref<18x512xbf16, #tpu.memory_space<vmem>>, vector<3x32xbf16>
    tpu.vector_store %arg14[%c3_95, %c448_96], %101 {strides = array<i32>} : memref<18x512xbf16, #tpu.memory_space<vmem>>, vector<3x32xbf16>,
    %c43 = arith.constant 43 : index
    %c0_97 = arith.constant 0 : index
    %103 = tpu.strided_load %arg13[%c43, %c0_97] {strides = array<i32: 2, 1>} : memref<128x32xf32, #tpu.memory_space<vmem>>, vector<3x32xf32>
    %104 = arith.truncf %103 : vector<3x32xf32> to vector<3x32xbf16>
    %c3_98 = arith.constant 3 : index
    %c480_99 = arith.constant 480 : index
    %105 = vector.load %arg14[%c3_98, %c480_99] : memref<18x512xbf16, #tpu.memory_space<vmem>>, vector<3x32xbf16>
    tpu.vector_store %arg14[%c3_98, %c480_99], %104 {strides = array<i32>} : memref<18x512xbf16, #tpu.memory_space<vmem>>, vector<3x32xbf16>,
    %c32_100 = arith.constant 32 : index
    %c0_101 = arith.constant 0 : index
    %106 = tpu.strided_load %arg13[%c32_100, %c0_101] {strides = array<i32: 2, 1>} : memref<128x32xf32, #tpu.memory_space<vmem>>, vector<3x32xf32>
    %107 = arith.truncf %106 : vector<3x32xf32> to vector<3x32xbf16>
    %c6 = arith.constant 6 : index
    %c0_102 = arith.constant 0 : index
    %108 = vector.load %arg14[%c6, %c0_102] : memref<18x512xbf16, #tpu.memory_space<vmem>>, vector<3x32xbf16>
    tpu.vector_store %arg14[%c6, %c0_102], %107 {strides = array<i32>} : memref<18x512xbf16, #tpu.memory_space<vmem>>, vector<3x32xbf16>,
    %c33_103 = arith.constant 33 : index
    %c0_104 = arith.constant 0 : index
    %109 = tpu.strided_load %arg13[%c33_103, %c0_104] {strides = array<i32: 2, 1>} : memref<128x32xf32, #tpu.memory_space<vmem>>, vector<3x32xf32>
    %110 = arith.truncf %109 : vector<3x32xf32> to vector<3x32xbf16>
    %c6_105 = arith.constant 6 : index
    %c32_106 = arith.constant 32 : index
    %111 = vector.load %arg14[%c6_105, %c32_106] : memref<18x512xbf16, #tpu.memory_space<vmem>>, vector<3x32xbf16>
    tpu.vector_store %arg14[%c6_105, %c32_106], %110 {strides = array<i32>} : memref<18x512xbf16, #tpu.memory_space<vmem>>, vector<3x32xbf16>,
    %c34_107 = arith.constant 34 : index
    %c0_108 = arith.constant 0 : index
    %112 = tpu.strided_load %arg13[%c34_107, %c0_108] {strides = array<i32: 2, 1>} : memref<128x32xf32, #tpu.memory_space<vmem>>, vector<3x32xf32>
    %113 = arith.truncf %112 : vector<3x32xf32> to vector<3x32xbf16>
    %c6_109 = arith.constant 6 : index
    %c64_110 = arith.constant 64 : index
    %114 = vector.load %arg14[%c6_109, %c64_110] : memref<18x512xbf16, #tpu.memory_space<vmem>>, vector<3x32xbf16>
    tpu.vector_store %arg14[%c6_109, %c64_110], %113 {strides = array<i32>} : memref<18x512xbf16, #tpu.memory_space<vmem>>, vector<3x32xbf16>,
    %c35_111 = arith.constant 35 : index
    %c0_112 = arith.constant 0 : index
    %115 = tpu.strided_load %arg13[%c35_111, %c0_112] {strides = array<i32: 2, 1>} : memref<128x32xf32, #tpu.memory_space<vmem>>, vector<3x32xf32>
    %116 = arith.truncf %115 : vector<3x32xf32> to vector<3x32xbf16>
    %c6_113 = arith.constant 6 : index
    %c96_114 = arith.constant 96 : index
    %117 = vector.load %arg14[%c6_113, %c96_114] : memref<18x512xbf16, #tpu.memory_space<vmem>>, vector<3x32xbf16>
    tpu.vector_store %arg14[%c6_113, %c96_114], %116 {strides = array<i32>} : memref<18x512xbf16, #tpu.memory_space<vmem>>, vector<3x32xbf16>,
    %c40_115 = arith.constant 40 : index
    %c0_116 = arith.constant 0 : index
    %118 = tpu.strided_load %arg13[%c40_115, %c0_116] {strides = array<i32: 2, 1>} : memref<128x32xf32, #tpu.memory_space<vmem>>, vector<3x32xf32>
    %119 = arith.truncf %118 : vector<3x32xf32> to vector<3x32xbf16>
    %c6_117 = arith.constant 6 : index
    %c128_118 = arith.constant 128 : index
    %120 = vector.load %arg14[%c6_117, %c128_118] : memref<18x512xbf16, #tpu.memory_space<vmem>>, vector<3x32xbf16>
    tpu.vector_store %arg14[%c6_117, %c128_118], %119 {strides = array<i32>} : memref<18x512xbf16, #tpu.memory_space<vmem>>, vector<3x32xbf16>,
    %c41_119 = arith.constant 41 : index
    %c0_120 = arith.constant 0 : index
    %121 = tpu.strided_load %arg13[%c41_119, %c0_120] {strides = array<i32: 2, 1>} : memref<128x32xf32, #tpu.memory_space<vmem>>, vector<3x32xf32>
    %122 = arith.truncf %121 : vector<3x32xf32> to vector<3x32xbf16>
    %c6_121 = arith.constant 6 : index
    %c160_122 = arith.constant 160 : index
    %123 = vector.load %arg14[%c6_121, %c160_122] : memref<18x512xbf16, #tpu.memory_space<vmem>>, vector<3x32xbf16>
    tpu.vector_store %arg14[%c6_121, %c160_122], %122 {strides = array<i32>} : memref<18x512xbf16, #tpu.memory_space<vmem>>, vector<3x32xbf16>,
    %c42_123 = arith.constant 42 : index
    %c0_124 = arith.constant 0 : index
    %124 = tpu.strided_load %arg13[%c42_123, %c0_124] {strides = array<i32: 2, 1>} : memref<128x32xf32, #tpu.memory_space<vmem>>, vector<3x32xf32>
    %125 = arith.truncf %124 : vector<3x32xf32> to vector<3x32xbf16>
    %c6_125 = arith.constant 6 : index
    %c192_126 = arith.constant 192 : index
    %126 = vector.load %arg14[%c6_125, %c192_126] : memref<18x512xbf16, #tpu.memory_space<vmem>>, vector<3x32xbf16>
    tpu.vector_store %arg14[%c6_125, %c192_126], %125 {strides = array<i32>} : memref<18x512xbf16, #tpu.memory_space<vmem>>, vector<3x32xbf16>,
    %c43_127 = arith.constant 43 : index
    %c0_128 = arith.constant 0 : index
    %127 = tpu.strided_load %arg13[%c43_127, %c0_128] {strides = array<i32: 2, 1>} : memref<128x32xf32, #tpu.memory_space<vmem>>, vector<3x32xf32>
    %128 = arith.truncf %127 : vector<3x32xf32> to vector<3x32xbf16>
    %c6_129 = arith.constant 6 : index
    %c224_130 = arith.constant 224 : index
    %129 = vector.load %arg14[%c6_129, %c224_130] : memref<18x512xbf16, #tpu.memory_space<vmem>>, vector<3x32xbf16>
    tpu.vector_store %arg14[%c6_129, %c224_130], %128 {strides = array<i32>} : memref<18x512xbf16, #tpu.memory_space<vmem>>, vector<3x32xbf16>,
    %c48 = arith.constant 48 : index
    %c0_131 = arith.constant 0 : index
    %130 = tpu.strided_load %arg13[%c48, %c0_131] {strides = array<i32: 2, 1>} : memref<128x32xf32, #tpu.memory_space<vmem>>, vector<3x32xf32>
    %131 = arith.truncf %130 : vector<3x32xf32> to vector<3x32xbf16>
    %c6_132 = arith.constant 6 : index
    %c256_133 = arith.constant 256 : index
    %132 = vector.load %arg14[%c6_132, %c256_133] : memref<18x512xbf16, #tpu.memory_space<vmem>>, vector<3x32xbf16>
    tpu.vector_store %arg14[%c6_132, %c256_133], %131 {strides = array<i32>} : memref<18x512xbf16, #tpu.memory_space<vmem>>, vector<3x32xbf16>,
    %c49 = arith.constant 49 : index
    %c0_134 = arith.constant 0 : index
    %133 = tpu.strided_load %arg13[%c49, %c0_134] {strides = array<i32: 2, 1>} : memref<128x32xf32, #tpu.memory_space<vmem>>, vector<3x32xf32>
    %134 = arith.truncf %133 : vector<3x32xf32> to vector<3x32xbf16>
    %c6_135 = arith.constant 6 : index
    %c288_136 = arith.constant 288 : index
    %135 = vector.load %arg14[%c6_135, %c288_136] : memref<18x512xbf16, #tpu.memory_space<vmem>>, vector<3x32xbf16>
    tpu.vector_store %arg14[%c6_135, %c288_136], %134 {strides = array<i32>} : memref<18x512xbf16, #tpu.memory_space<vmem>>, vector<3x32xbf16>,
    %c50 = arith.constant 50 : index
    %c0_137 = arith.constant 0 : index
    %136 = tpu.strided_load %arg13[%c50, %c0_137] {strides = array<i32: 2, 1>} : memref<128x32xf32, #tpu.memory_space<vmem>>, vector<3x32xf32>
    %137 = arith.truncf %136 : vector<3x32xf32> to vector<3x32xbf16>
    %c6_138 = arith.constant 6 : index
    %c320_139 = arith.constant 320 : index
    %138 = vector.load %arg14[%c6_138, %c320_139] : memref<18x512xbf16, #tpu.memory_space<vmem>>, vector<3x32xbf16>
    tpu.vector_store %arg14[%c6_138, %c320_139], %137 {strides = array<i32>} : memref<18x512xbf16, #tpu.memory_space<vmem>>, vector<3x32xbf16>,
    %c51 = arith.constant 51 : index
    %c0_140 = arith.constant 0 : index
    %139 = tpu.strided_load %arg13[%c51, %c0_140] {strides = array<i32: 2, 1>} : memref<128x32xf32, #tpu.memory_space<vmem>>, vector<3x32xf32>
    %140 = arith.truncf %139 : vector<3x32xf32> to vector<3x32xbf16>
    %c6_141 = arith.constant 6 : index
    %c352_142 = arith.constant 352 : index
    %141 = vector.load %arg14[%c6_141, %c352_142] : memref<18x512xbf16, #tpu.memory_space<vmem>>, vector<3x32xbf16>
    tpu.vector_store %arg14[%c6_141, %c352_142], %140 {strides = array<i32>} : memref<18x512xbf16, #tpu.memory_space<vmem>>, vector<3x32xbf16>,
    %c56 = arith.constant 56 : index
    %c0_143 = arith.constant 0 : index
    %142 = tpu.strided_load %arg13[%c56, %c0_143] {strides = array<i32: 2, 1>} : memref<128x32xf32, #tpu.memory_space<vmem>>, vector<3x32xf32>
    %143 = arith.truncf %142 : vector<3x32xf32> to vector<3x32xbf16>
    %c6_144 = arith.constant 6 : index
    %c384_145 = arith.constant 384 : index
    %144 = vector.load %arg14[%c6_144, %c384_145] : memref<18x512xbf16, #tpu.memory_space<vmem>>, vector<3x32xbf16>
    tpu.vector_store %arg14[%c6_144, %c384_145], %143 {strides = array<i32>} : memref<18x512xbf16, #tpu.memory_space<vmem>>, vector<3x32xbf16>,
    %c57 = arith.constant 57 : index
    %c0_146 = arith.constant 0 : index
    %145 = tpu.strided_load %arg13[%c57, %c0_146] {strides = array<i32: 2, 1>} : memref<128x32xf32, #tpu.memory_space<vmem>>, vector<3x32xf32>
    %146 = arith.truncf %145 : vector<3x32xf32> to vector<3x32xbf16>
    %c6_147 = arith.constant 6 : index
    %c416_148 = arith.constant 416 : index
    %147 = vector.load %arg14[%c6_147, %c416_148] : memref<18x512xbf16, #tpu.memory_space<vmem>>, vector<3x32xbf16>
    tpu.vector_store %arg14[%c6_147, %c416_148], %146 {strides = array<i32>} : memref<18x512xbf16, #tpu.memory_space<vmem>>, vector<3x32xbf16>,
    %c58 = arith.constant 58 : index
    %c0_149 = arith.constant 0 : index
    %148 = tpu.strided_load %arg13[%c58, %c0_149] {strides = array<i32: 2, 1>} : memref<128x32xf32, #tpu.memory_space<vmem>>, vector<3x32xf32>
    %149 = arith.truncf %148 : vector<3x32xf32> to vector<3x32xbf16>
    %c6_150 = arith.constant 6 : index
    %c448_151 = arith.constant 448 : index
    %150 = vector.load %arg14[%c6_150, %c448_151] : memref<18x512xbf16, #tpu.memory_space<vmem>>, vector<3x32xbf16>
    tpu.vector_store %arg14[%c6_150, %c448_151], %149 {strides = array<i32>} : memref<18x512xbf16, #tpu.memory_space<vmem>>, vector<3x32xbf16>,
    %c59 = arith.constant 59 : index
    %c0_152 = arith.constant 0 : index
    %151 = tpu.strided_load %arg13[%c59, %c0_152] {strides = array<i32: 2, 1>} : memref<128x32xf32, #tpu.memory_space<vmem>>, vector<3x32xf32>
    %152 = arith.truncf %151 : vector<3x32xf32> to vector<3x32xbf16>
    %c6_153 = arith.constant 6 : index
    %c480_154 = arith.constant 480 : index
    %153 = vector.load %arg14[%c6_153, %c480_154] : memref<18x512xbf16, #tpu.memory_space<vmem>>, vector<3x32xbf16>
    tpu.vector_store %arg14[%c6_153, %c480_154], %152 {strides = array<i32>} : memref<18x512xbf16, #tpu.memory_space<vmem>>, vector<3x32xbf16>,
    %c64_155 = arith.constant 64 : index
    %c0_156 = arith.constant 0 : index
    %154 = tpu.strided_load %arg13[%c64_155, %c0_156] {strides = array<i32: 2, 1>} : memref<128x32xf32, #tpu.memory_space<vmem>>, vector<3x32xf32>
    %155 = arith.truncf %154 : vector<3x32xf32> to vector<3x32xbf16>
    %c9_157 = arith.constant 9 : index
    %c0_158 = arith.constant 0 : index
    %156 = vector.load %arg14[%c9_157, %c0_158] : memref<18x512xbf16, #tpu.memory_space<vmem>>, vector<3x32xbf16>
    tpu.vector_store %arg14[%c9_157, %c0_158], %155 {strides = array<i32>} : memref<18x512xbf16, #tpu.memory_space<vmem>>, vector<3x32xbf16>,
    %c65 = arith.constant 65 : index
    %c0_159 = arith.constant 0 : index
    %157 = tpu.strided_load %arg13[%c65, %c0_159] {strides = array<i32: 2, 1>} : memref<128x32xf32, #tpu.memory_space<vmem>>, vector<3x32xf32>
    %158 = arith.truncf %157 : vector<3x32xf32> to vector<3x32xbf16>
    %c9_160 = arith.constant 9 : index
    %c32_161 = arith.constant 32 : index
    %159 = vector.load %arg14[%c9_160, %c32_161] : memref<18x512xbf16, #tpu.memory_space<vmem>>, vector<3x32xbf16>
    tpu.vector_store %arg14[%c9_160, %c32_161], %158 {strides = array<i32>} : memref<18x512xbf16, #tpu.memory_space<vmem>>, vector<3x32xbf16>,
    %c66 = arith.constant 66 : index
    %c0_162 = arith.constant 0 : index
    %160 = tpu.strided_load %arg13[%c66, %c0_162] {strides = array<i32: 2, 1>} : memref<128x32xf32, #tpu.memory_space<vmem>>, vector<3x32xf32>
    %161 = arith.truncf %160 : vector<3x32xf32> to vector<3x32xbf16>
    %c9_163 = arith.constant 9 : index
    %c64_164 = arith.constant 64 : index
    %162 = vector.load %arg14[%c9_163, %c64_164] : memref<18x512xbf16, #tpu.memory_space<vmem>>, vector<3x32xbf16>
    tpu.vector_store %arg14[%c9_163, %c64_164], %161 {strides = array<i32>} : memref<18x512xbf16, #tpu.memory_space<vmem>>, vector<3x32xbf16>,
    %c67 = arith.constant 67 : index
    %c0_165 = arith.constant 0 : index
    %163 = tpu.strided_load %arg13[%c67, %c0_165] {strides = array<i32: 2, 1>} : memref<128x32xf32, #tpu.memory_space<vmem>>, vector<3x32xf32>
    %164 = arith.truncf %163 : vector<3x32xf32> to vector<3x32xbf16>
    %c9_166 = arith.constant 9 : index
    %c96_167 = arith.constant 96 : index
    %165 = vector.load %arg14[%c9_166, %c96_167] : memref<18x512xbf16, #tpu.memory_space<vmem>>, vector<3x32xbf16>
    tpu.vector_store %arg14[%c9_166, %c96_167], %164 {strides = array<i32>} : memref<18x512xbf16, #tpu.memory_space<vmem>>, vector<3x32xbf16>,
    %c72 = arith.constant 72 : index
    %c0_168 = arith.constant 0 : index
    %166 = tpu.strided_load %arg13[%c72, %c0_168] {strides = array<i32: 2, 1>} : memref<128x32xf32, #tpu.memory_space<vmem>>, vector<3x32xf32>
    %167 = arith.truncf %166 : vector<3x32xf32> to vector<3x32xbf16>
    %c9_169 = arith.constant 9 : index
    %c128_170 = arith.constant 128 : index
    %168 = vector.load %arg14[%c9_169, %c128_170] : memref<18x512xbf16, #tpu.memory_space<vmem>>, vector<3x32xbf16>
    tpu.vector_store %arg14[%c9_169, %c128_170], %167 {strides = array<i32>} : memref<18x512xbf16, #tpu.memory_space<vmem>>, vector<3x32xbf16>,
    %c73 = arith.constant 73 : index
    %c0_171 = arith.constant 0 : index
    %169 = tpu.strided_load %arg13[%c73, %c0_171] {strides = array<i32: 2, 1>} : memref<128x32xf32, #tpu.memory_space<vmem>>, vector<3x32xf32>
    %170 = arith.truncf %169 : vector<3x32xf32> to vector<3x32xbf16>
    %c9_172 = arith.constant 9 : index
    %c160_173 = arith.constant 160 : index
    %171 = vector.load %arg14[%c9_172, %c160_173] : memref<18x512xbf16, #tpu.memory_space<vmem>>, vector<3x32xbf16>
    tpu.vector_store %arg14[%c9_172, %c160_173], %170 {strides = array<i32>} : memref<18x512xbf16, #tpu.memory_space<vmem>>, vector<3x32xbf16>,
    %c74 = arith.constant 74 : index
    %c0_174 = arith.constant 0 : index
    %172 = tpu.strided_load %arg13[%c74, %c0_174] {strides = array<i32: 2, 1>} : memref<128x32xf32, #tpu.memory_space<vmem>>, vector<3x32xf32>
    %173 = arith.truncf %172 : vector<3x32xf32> to vector<3x32xbf16>
    %c9_175 = arith.constant 9 : index
    %c192_176 = arith.constant 192 : index
    %174 = vector.load %arg14[%c9_175, %c192_176] : memref<18x512xbf16, #tpu.memory_space<vmem>>, vector<3x32xbf16>
    tpu.vector_store %arg14[%c9_175, %c192_176], %173 {strides = array<i32>} : memref<18x512xbf16, #tpu.memory_space<vmem>>, vector<3x32xbf16>,
    %c75 = arith.constant 75 : index
    %c0_177 = arith.constant 0 : index
    %175 = tpu.strided_load %arg13[%c75, %c0_177] {strides = array<i32: 2, 1>} : memref<128x32xf32, #tpu.memory_space<vmem>>, vector<3x32xf32>
    %176 = arith.truncf %175 : vector<3x32xf32> to vector<3x32xbf16>
    %c9_178 = arith.constant 9 : index
    %c224_179 = arith.constant 224 : index
    %177 = vector.load %arg14[%c9_178, %c224_179] : memref<18x512xbf16, #tpu.memory_space<vmem>>, vector<3x32xbf16>
    tpu.vector_store %arg14[%c9_178, %c224_179], %176 {strides = array<i32>} : memref<18x512xbf16, #tpu.memory_space<vmem>>, vector<3x32xbf16>,
    %c80 = arith.constant 80 : index
    %c0_180 = arith.constant 0 : index
    %178 = tpu.strided_load %arg13[%c80, %c0_180] {strides = array<i32: 2, 1>} : memref<128x32xf32, #tpu.memory_space<vmem>>, vector<3x32xf32>
    %179 = arith.truncf %178 : vector<3x32xf32> to vector<3x32xbf16>
    %c9_181 = arith.constant 9 : index
    %c256_182 = arith.constant 256 : index
    %180 = vector.load %arg14[%c9_181, %c256_182] : memref<18x512xbf16, #tpu.memory_space<vmem>>, vector<3x32xbf16>
    tpu.vector_store %arg14[%c9_181, %c256_182], %179 {strides = array<i32>} : memref<18x512xbf16, #tpu.memory_space<vmem>>, vector<3x32xbf16>,
    %c81 = arith.constant 81 : index
    %c0_183 = arith.constant 0 : index
    %181 = tpu.strided_load %arg13[%c81, %c0_183] {strides = array<i32: 2, 1>} : memref<128x32xf32, #tpu.memory_space<vmem>>, vector<3x32xf32>
    %182 = arith.truncf %181 : vector<3x32xf32> to vector<3x32xbf16>
    %c9_184 = arith.constant 9 : index
    %c288_185 = arith.constant 288 : index
    %183 = vector.load %arg14[%c9_184, %c288_185] : memref<18x512xbf16, #tpu.memory_space<vmem>>, vector<3x32xbf16>
    tpu.vector_store %arg14[%c9_184, %c288_185], %182 {strides = array<i32>} : memref<18x512xbf16, #tpu.memory_space<vmem>>, vector<3x32xbf16>,
    %c82 = arith.constant 82 : index
    %c0_186 = arith.constant 0 : index
    %184 = tpu.strided_load %arg13[%c82, %c0_186] {strides = array<i32: 2, 1>} : memref<128x32xf32, #tpu.memory_space<vmem>>, vector<3x32xf32>
    %185 = arith.truncf %184 : vector<3x32xf32> to vector<3x32xbf16>
    %c9_187 = arith.constant 9 : index
    %c320_188 = arith.constant 320 : index
    %186 = vector.load %arg14[%c9_187, %c320_188] : memref<18x512xbf16, #tpu.memory_space<vmem>>, vector<3x32xbf16>
    tpu.vector_store %arg14[%c9_187, %c320_188], %185 {strides = array<i32>} : memref<18x512xbf16, #tpu.memory_space<vmem>>, vector<3x32xbf16>,
    %c83 = arith.constant 83 : index
    %c0_189 = arith.constant 0 : index
    %187 = tpu.strided_load %arg13[%c83, %c0_189] {strides = array<i32: 2, 1>} : memref<128x32xf32, #tpu.memory_space<vmem>>, vector<3x32xf32>
    %188 = arith.truncf %187 : vector<3x32xf32> to vector<3x32xbf16>
    %c9_190 = arith.constant 9 : index
    %c352_191 = arith.constant 352 : index
    %189 = vector.load %arg14[%c9_190, %c352_191] : memref<18x512xbf16, #tpu.memory_space<vmem>>, vector<3x32xbf16>
    tpu.vector_store %arg14[%c9_190, %c352_191], %188 {strides = array<i32>} : memref<18x512xbf16, #tpu.memory_space<vmem>>, vector<3x32xbf16>,
    %c88 = arith.constant 88 : index
    %c0_192 = arith.constant 0 : index
    %190 = tpu.strided_load %arg13[%c88, %c0_192] {strides = array<i32: 2, 1>} : memref<128x32xf32, #tpu.memory_space<vmem>>, vector<3x32xf32>
    %191 = arith.truncf %190 : vector<3x32xf32> to vector<3x32xbf16>
    %c9_193 = arith.constant 9 : index
    %c384_194 = arith.constant 384 : index
    %192 = vector.load %arg14[%c9_193, %c384_194] : memref<18x512xbf16, #tpu.memory_space<vmem>>, vector<3x32xbf16>
    tpu.vector_store %arg14[%c9_193, %c384_194], %191 {strides = array<i32>} : memref<18x512xbf16, #tpu.memory_space<vmem>>, vector<3x32xbf16>,
    %c89 = arith.constant 89 : index
    %c0_195 = arith.constant 0 : index
    %193 = tpu.strided_load %arg13[%c89, %c0_195] {strides = array<i32: 2, 1>} : memref<128x32xf32, #tpu.memory_space<vmem>>, vector<3x32xf32>
    %194 = arith.truncf %193 : vector<3x32xf32> to vector<3x32xbf16>
    %c9_196 = arith.constant 9 : index
    %c416_197 = arith.constant 416 : index
    %195 = vector.load %arg14[%c9_196, %c416_197] : memref<18x512xbf16, #tpu.memory_space<vmem>>, vector<3x32xbf16>
    tpu.vector_store %arg14[%c9_196, %c416_197], %194 {strides = array<i32>} : memref<18x512xbf16, #tpu.memory_space<vmem>>, vector<3x32xbf16>,
    %c90 = arith.constant 90 : index
    %c0_198 = arith.constant 0 : index
    %196 = tpu.strided_load %arg13[%c90, %c0_198] {strides = array<i32: 2, 1>} : memref<128x32xf32, #tpu.memory_space<vmem>>, vector<3x32xf32>
    %197 = arith.truncf %196 : vector<3x32xf32> to vector<3x32xbf16>
    %c9_199 = arith.constant 9 : index
    %c448_200 = arith.constant 448 : index
    %198 = vector.load %arg14[%c9_199, %c448_200] : memref<18x512xbf16, #tpu.memory_space<vmem>>, vector<3x32xbf16>
    tpu.vector_store %arg14[%c9_199, %c448_200], %197 {strides = array<i32>} : memref<18x512xbf16, #tpu.memory_space<vmem>>, vector<3x32xbf16>,
    %c91 = arith.constant 91 : index
    %c0_201 = arith.constant 0 : index
    %199 = tpu.strided_load %arg13[%c91, %c0_201] {strides = array<i32: 2, 1>} : memref<128x32xf32, #tpu.memory_space<vmem>>, vector<3x32xf32>
    %200 = arith.truncf %199 : vector<3x32xf32> to vector<3x32xbf16>
    %c9_202 = arith.constant 9 : index
    %c480_203 = arith.constant 480 : index
    %201 = vector.load %arg14[%c9_202, %c480_203] : memref<18x512xbf16, #tpu.memory_space<vmem>>, vector<3x32xbf16>
    tpu.vector_store %arg14[%c9_202, %c480_203], %200 {strides = array<i32>} : memref<18x512xbf16, #tpu.memory_space<vmem>>, vector<3x32xbf16>,
    %c80_204 = arith.constant 80 : index
    %c0_205 = arith.constant 0 : index
    %202 = tpu.strided_load %arg13[%c80_204, %c0_205] {strides = array<i32: 2, 1>} : memref<128x32xf32, #tpu.memory_space<vmem>>, vector<3x32xf32>
    %203 = arith.truncf %202 : vector<3x32xf32> to vector<3x32xbf16>
    %c12 = arith.constant 12 : index
    %c0_206 = arith.constant 0 : index
    %204 = vector.load %arg14[%c12, %c0_206] : memref<18x512xbf16, #tpu.memory_space<vmem>>, vector<3x32xbf16>
    tpu.vector_store %arg14[%c12, %c0_206], %203 {strides = array<i32>} : memref<18x512xbf16, #tpu.memory_space<vmem>>, vector<3x32xbf16>,
    %c81_207 = arith.constant 81 : index
    %c0_208 = arith.constant 0 : index
    %205 = tpu.strided_load %arg13[%c81_207, %c0_208] {strides = array<i32: 2, 1>} : memref<128x32xf32, #tpu.memory_space<vmem>>, vector<3x32xf32>
    %206 = arith.truncf %205 : vector<3x32xf32> to vector<3x32xbf16>
    %c12_209 = arith.constant 12 : index
    %c32_210 = arith.constant 32 : index
    %207 = vector.load %arg14[%c12_209, %c32_210] : memref<18x512xbf16, #tpu.memory_space<vmem>>, vector<3x32xbf16>
    tpu.vector_store %arg14[%c12_209, %c32_210], %206 {strides = array<i32>} : memref<18x512xbf16, #tpu.memory_space<vmem>>, vector<3x32xbf16>,
    %c82_211 = arith.constant 82 : index
    %c0_212 = arith.constant 0 : index
    %208 = tpu.strided_load %arg13[%c82_211, %c0_212] {strides = array<i32: 2, 1>} : memref<128x32xf32, #tpu.memory_space<vmem>>, vector<3x32xf32>
    %209 = arith.truncf %208 : vector<3x32xf32> to vector<3x32xbf16>
    %c12_213 = arith.constant 12 : index
    %c64_214 = arith.constant 64 : index
    %210 = vector.load %arg14[%c12_213, %c64_214] : memref<18x512xbf16, #tpu.memory_space<vmem>>, vector<3x32xbf16>
    tpu.vector_store %arg14[%c12_213, %c64_214], %209 {strides = array<i32>} : memref<18x512xbf16, #tpu.memory_space<vmem>>, vector<3x32xbf16>,
    %c83_215 = arith.constant 83 : index
    %c0_216 = arith.constant 0 : index
    %211 = tpu.strided_load %arg13[%c83_215, %c0_216] {strides = array<i32: 2, 1>} : memref<128x32xf32, #tpu.memory_space<vmem>>, vector<3x32xf32>
    %212 = arith.truncf %211 : vector<3x32xf32> to vector<3x32xbf16>
    %c12_217 = arith.constant 12 : index
    %c96_218 = arith.constant 96 : index
    %213 = vector.load %arg14[%c12_217, %c96_218] : memref<18x512xbf16, #tpu.memory_space<vmem>>, vector<3x32xbf16>
    tpu.vector_store %arg14[%c12_217, %c96_218], %212 {strides = array<i32>} : memref<18x512xbf16, #tpu.memory_space<vmem>>, vector<3x32xbf16>,
    %c88_219 = arith.constant 88 : index
    %c0_220 = arith.constant 0 : index
    %214 = tpu.strided_load %arg13[%c88_219, %c0_220] {strides = array<i32: 2, 1>} : memref<128x32xf32, #tpu.memory_space<vmem>>, vector<3x32xf32>
    %215 = arith.truncf %214 : vector<3x32xf32> to vector<3x32xbf16>
    %c12_221 = arith.constant 12 : index
    %c128_222 = arith.constant 128 : index
    %216 = vector.load %arg14[%c12_221, %c128_222] : memref<18x512xbf16, #tpu.memory_space<vmem>>, vector<3x32xbf16>
    tpu.vector_store %arg14[%c12_221, %c128_222], %215 {strides = array<i32>} : memref<18x512xbf16, #tpu.memory_space<vmem>>, vector<3x32xbf16>,
    %c89_223 = arith.constant 89 : index
    %c0_224 = arith.constant 0 : index
    %217 = tpu.strided_load %arg13[%c89_223, %c0_224] {strides = array<i32: 2, 1>} : memref<128x32xf32, #tpu.memory_space<vmem>>, vector<3x32xf32>
    %218 = arith.truncf %217 : vector<3x32xf32> to vector<3x32xbf16>
    %c12_225 = arith.constant 12 : index
    %c160_226 = arith.constant 160 : index
    %219 = vector.load %arg14[%c12_225, %c160_226] : memref<18x512xbf16, #tpu.memory_space<vmem>>, vector<3x32xbf16>
    tpu.vector_store %arg14[%c12_225, %c160_226], %218 {strides = array<i32>} : memref<18x512xbf16, #tpu.memory_space<vmem>>, vector<3x32xbf16>,
    %c90_227 = arith.constant 90 : index
    %c0_228 = arith.constant 0 : index
    %220 = tpu.strided_load %arg13[%c90_227, %c0_228] {strides = array<i32: 2, 1>} : memref<128x32xf32, #tpu.memory_space<vmem>>, vector<3x32xf32>
    %221 = arith.truncf %220 : vector<3x32xf32> to vector<3x32xbf16>
    %c12_229 = arith.constant 12 : index
    %c192_230 = arith.constant 192 : index
    %222 = vector.load %arg14[%c12_229, %c192_230] : memref<18x512xbf16, #tpu.memory_space<vmem>>, vector<3x32xbf16>
    tpu.vector_store %arg14[%c12_229, %c192_230], %221 {strides = array<i32>} : memref<18x512xbf16, #tpu.memory_space<vmem>>, vector<3x32xbf16>,
    %c91_231 = arith.constant 91 : index
    %c0_232 = arith.constant 0 : index
    %223 = tpu.strided_load %arg13[%c91_231, %c0_232] {strides = array<i32: 2, 1>} : memref<128x32xf32, #tpu.memory_space<vmem>>, vector<3x32xf32>
    %224 = arith.truncf %223 : vector<3x32xf32> to vector<3x32xbf16>
    %c12_233 = arith.constant 12 : index
    %c224_234 = arith.constant 224 : index
    %225 = vector.load %arg14[%c12_233, %c224_234] : memref<18x512xbf16, #tpu.memory_space<vmem>>, vector<3x32xbf16>
    tpu.vector_store %arg14[%c12_233, %c224_234], %224 {strides = array<i32>} : memref<18x512xbf16, #tpu.memory_space<vmem>>, vector<3x32xbf16>,
    %c96_235 = arith.constant 96 : index
    %c0_236 = arith.constant 0 : index
    %226 = tpu.strided_load %arg13[%c96_235, %c0_236] {strides = array<i32: 2, 1>} : memref<128x32xf32, #tpu.memory_space<vmem>>, vector<3x32xf32>
    %227 = arith.truncf %226 : vector<3x32xf32> to vector<3x32xbf16>
    %c12_237 = arith.constant 12 : index
    %c256_238 = arith.constant 256 : index
    %228 = vector.load %arg14[%c12_237, %c256_238] : memref<18x512xbf16, #tpu.memory_space<vmem>>, vector<3x32xbf16>
    tpu.vector_store %arg14[%c12_237, %c256_238], %227 {strides = array<i32>} : memref<18x512xbf16, #tpu.memory_space<vmem>>, vector<3x32xbf16>,
    %c97 = arith.constant 97 : index
    %c0_239 = arith.constant 0 : index
    %229 = tpu.strided_load %arg13[%c97, %c0_239] {strides = array<i32: 2, 1>} : memref<128x32xf32, #tpu.memory_space<vmem>>, vector<3x32xf32>
    %230 = arith.truncf %229 : vector<3x32xf32> to vector<3x32xbf16>
    %c12_240 = arith.constant 12 : index
    %c288_241 = arith.constant 288 : index
    %231 = vector.load %arg14[%c12_240, %c288_241] : memref<18x512xbf16, #tpu.memory_space<vmem>>, vector<3x32xbf16>
    tpu.vector_store %arg14[%c12_240, %c288_241], %230 {strides = array<i32>} : memref<18x512xbf16, #tpu.memory_space<vmem>>, vector<3x32xbf16>,
    %c98 = arith.constant 98 : index
    %c0_242 = arith.constant 0 : index
    %232 = tpu.strided_load %arg13[%c98, %c0_242] {strides = array<i32: 2, 1>} : memref<128x32xf32, #tpu.memory_space<vmem>>, vector<3x32xf32>
    %233 = arith.truncf %232 : vector<3x32xf32> to vector<3x32xbf16>
    %c12_243 = arith.constant 12 : index
    %c320_244 = arith.constant 320 : index
    %234 = vector.load %arg14[%c12_243, %c320_244] : memref<18x512xbf16, #tpu.memory_space<vmem>>, vector<3x32xbf16>
    tpu.vector_store %arg14[%c12_243, %c320_244], %233 {strides = array<i32>} : memref<18x512xbf16, #tpu.memory_space<vmem>>, vector<3x32xbf16>,
    %c99 = arith.constant 99 : index
    %c0_245 = arith.constant 0 : index
    %235 = tpu.strided_load %arg13[%c99, %c0_245] {strides = array<i32: 2, 1>} : memref<128x32xf32, #tpu.memory_space<vmem>>, vector<3x32xf32>
    %236 = arith.truncf %235 : vector<3x32xf32> to vector<3x32xbf16>
    %c12_246 = arith.constant 12 : index
    %c352_247 = arith.constant 352 : index
    %237 = vector.load %arg14[%c12_246, %c352_247] : memref<18x512xbf16, #tpu.memory_space<vmem>>, vector<3x32xbf16>
    tpu.vector_store %arg14[%c12_246, %c352_247], %236 {strides = array<i32>} : memref<18x512xbf16, #tpu.memory_space<vmem>>, vector<3x32xbf16>,
    %c104 = arith.constant 104 : index
    %c0_248 = arith.constant 0 : index
    %238 = tpu.strided_load %arg13[%c104, %c0_248] {strides = array<i32: 2, 1>} : memref<128x32xf32, #tpu.memory_space<vmem>>, vector<3x32xf32>
    %239 = arith.truncf %238 : vector<3x32xf32> to vector<3x32xbf16>
    %c12_249 = arith.constant 12 : index
    %c384_250 = arith.constant 384 : index
    %240 = vector.load %arg14[%c12_249, %c384_250] : memref<18x512xbf16, #tpu.memory_space<vmem>>, vector<3x32xbf16>
    tpu.vector_store %arg14[%c12_249, %c384_250], %239 {strides = array<i32>} : memref<18x512xbf16, #tpu.memory_space<vmem>>, vector<3x32xbf16>,
    %c105 = arith.constant 105 : index
    %c0_251 = arith.constant 0 : index
    %241 = tpu.strided_load %arg13[%c105, %c0_251] {strides = array<i32: 2, 1>} : memref<128x32xf32, #tpu.memory_space<vmem>>, vector<3x32xf32>
    %242 = arith.truncf %241 : vector<3x32xf32> to vector<3x32xbf16>
    %c12_252 = arith.constant 12 : index
    %c416_253 = arith.constant 416 : index
    %243 = vector.load %arg14[%c12_252, %c416_253] : memref<18x512xbf16, #tpu.memory_space<vmem>>, vector<3x32xbf16>
    tpu.vector_store %arg14[%c12_252, %c416_253], %242 {strides = array<i32>} : memref<18x512xbf16, #tpu.memory_space<vmem>>, vector<3x32xbf16>,
    %c106 = arith.constant 106 : index
    %c0_254 = arith.constant 0 : index
    %244 = tpu.strided_load %arg13[%c106, %c0_254] {strides = array<i32: 2, 1>} : memref<128x32xf32, #tpu.memory_space<vmem>>, vector<3x32xf32>
    %245 = arith.truncf %244 : vector<3x32xf32> to vector<3x32xbf16>
    %c12_255 = arith.constant 12 : index
    %c448_256 = arith.constant 448 : index
    %246 = vector.load %arg14[%c12_255, %c448_256] : memref<18x512xbf16, #tpu.memory_space<vmem>>, vector<3x32xbf16>
    tpu.vector_store %arg14[%c12_255, %c448_256], %245 {strides = array<i32>} : memref<18x512xbf16, #tpu.memory_space<vmem>>, vector<3x32xbf16>,
    %c107 = arith.constant 107 : index
    %c0_257 = arith.constant 0 : index
    %247 = tpu.strided_load %arg13[%c107, %c0_257] {strides = array<i32: 2, 1>} : memref<128x32xf32, #tpu.memory_space<vmem>>, vector<3x32xf32>
    %248 = arith.truncf %247 : vector<3x32xf32> to vector<3x32xbf16>
    %c12_258 = arith.constant 12 : index
    %c480_259 = arith.constant 480 : index
    %249 = vector.load %arg14[%c12_258, %c480_259] : memref<18x512xbf16, #tpu.memory_space<vmem>>, vector<3x32xbf16>
    tpu.vector_store %arg14[%c12_258, %c480_259], %248 {strides = array<i32>} : memref<18x512xbf16, #tpu.memory_space<vmem>>, vector<3x32xbf16>,
    %c96_260 = arith.constant 96 : index
    %c0_261 = arith.constant 0 : index
    %250 = tpu.strided_load %arg13[%c96_260, %c0_261] {strides = array<i32: 2, 1>} : memref<128x32xf32, #tpu.memory_space<vmem>>, vector<3x32xf32>
    %251 = arith.truncf %250 : vector<3x32xf32> to vector<3x32xbf16>
    %c15 = arith.constant 15 : index
    %c0_262 = arith.constant 0 : index
    %252 = vector.load %arg14[%c15, %c0_262] : memref<18x512xbf16, #tpu.memory_space<vmem>>, vector<3x32xbf16>
    tpu.vector_store %arg14[%c15, %c0_262], %251 {strides = array<i32>} : memref<18x512xbf16, #tpu.memory_space<vmem>>, vector<3x32xbf16>,
    %c97_263 = arith.constant 97 : index
    %c0_264 = arith.constant 0 : index
    %253 = tpu.strided_load %arg13[%c97_263, %c0_264] {strides = array<i32: 2, 1>} : memref<128x32xf32, #tpu.memory_space<vmem>>, vector<3x32xf32>
    %254 = arith.truncf %253 : vector<3x32xf32> to vector<3x32xbf16>
    %c15_265 = arith.constant 15 : index
    %c32_266 = arith.constant 32 : index
    %255 = vector.load %arg14[%c15_265, %c32_266] : memref<18x512xbf16, #tpu.memory_space<vmem>>, vector<3x32xbf16>
    tpu.vector_store %arg14[%c15_265, %c32_266], %254 {strides = array<i32>} : memref<18x512xbf16, #tpu.memory_space<vmem>>, vector<3x32xbf16>,
    %c98_267 = arith.constant 98 : index
    %c0_268 = arith.constant 0 : index
    %256 = tpu.strided_load %arg13[%c98_267, %c0_268] {strides = array<i32: 2, 1>} : memref<128x32xf32, #tpu.memory_space<vmem>>, vector<3x32xf32>
    %257 = arith.truncf %256 : vector<3x32xf32> to vector<3x32xbf16>
    %c15_269 = arith.constant 15 : index
    %c64_270 = arith.constant 64 : index
    %258 = vector.load %arg14[%c15_269, %c64_270] : memref<18x512xbf16, #tpu.memory_space<vmem>>, vector<3x32xbf16>
    tpu.vector_store %arg14[%c15_269, %c64_270], %257 {strides = array<i32>} : memref<18x512xbf16, #tpu.memory_space<vmem>>, vector<3x32xbf16>,
    %c99_271 = arith.constant 99 : index
    %c0_272 = arith.constant 0 : index
    %259 = tpu.strided_load %arg13[%c99_271, %c0_272] {strides = array<i32: 2, 1>} : memref<128x32xf32, #tpu.memory_space<vmem>>, vector<3x32xf32>
    %260 = arith.truncf %259 : vector<3x32xf32> to vector<3x32xbf16>
    %c15_273 = arith.constant 15 : index
    %c96_274 = arith.constant 96 : index
    %261 = vector.load %arg14[%c15_273, %c96_274] : memref<18x512xbf16, #tpu.memory_space<vmem>>, vector<3x32xbf16>
    tpu.vector_store %arg14[%c15_273, %c96_274], %260 {strides = array<i32>} : memref<18x512xbf16, #tpu.memory_space<vmem>>, vector<3x32xbf16>,
    %c104_275 = arith.constant 104 : index
    %c0_276 = arith.constant 0 : index
    %262 = tpu.strided_load %arg13[%c104_275, %c0_276] {strides = array<i32: 2, 1>} : memref<128x32xf32, #tpu.memory_space<vmem>>, vector<3x32xf32>
    %263 = arith.truncf %262 : vector<3x32xf32> to vector<3x32xbf16>
    %c15_277 = arith.constant 15 : index
    %c128_278 = arith.constant 128 : index
    %264 = vector.load %arg14[%c15_277, %c128_278] : memref<18x512xbf16, #tpu.memory_space<vmem>>, vector<3x32xbf16>
    tpu.vector_store %arg14[%c15_277, %c128_278], %263 {strides = array<i32>} : memref<18x512xbf16, #tpu.memory_space<vmem>>, vector<3x32xbf16>,
    %c105_279 = arith.constant 105 : index
    %c0_280 = arith.constant 0 : index
    %265 = tpu.strided_load %arg13[%c105_279, %c0_280] {strides = array<i32: 2, 1>} : memref<128x32xf32, #tpu.memory_space<vmem>>, vector<3x32xf32>
    %266 = arith.truncf %265 : vector<3x32xf32> to vector<3x32xbf16>
    %c15_281 = arith.constant 15 : index
    %c160_282 = arith.constant 160 : index
    %267 = vector.load %arg14[%c15_281, %c160_282] : memref<18x512xbf16, #tpu.memory_space<vmem>>, vector<3x32xbf16>
    tpu.vector_store %arg14[%c15_281, %c160_282], %266 {strides = array<i32>} : memref<18x512xbf16, #tpu.memory_space<vmem>>, vector<3x32xbf16>,
    %c106_283 = arith.constant 106 : index
    %c0_284 = arith.constant 0 : index
    %268 = tpu.strided_load %arg13[%c106_283, %c0_284] {strides = array<i32: 2, 1>} : memref<128x32xf32, #tpu.memory_space<vmem>>, vector<3x32xf32>
    %269 = arith.truncf %268 : vector<3x32xf32> to vector<3x32xbf16>
    %c15_285 = arith.constant 15 : index
    %c192_286 = arith.constant 192 : index
    %270 = vector.load %arg14[%c15_285, %c192_286] : memref<18x512xbf16, #tpu.memory_space<vmem>>, vector<3x32xbf16>
    tpu.vector_store %arg14[%c15_285, %c192_286], %269 {strides = array<i32>} : memref<18x512xbf16, #tpu.memory_space<vmem>>, vector<3x32xbf16>,
    %c107_287 = arith.constant 107 : index
    %c0_288 = arith.constant 0 : index
    %271 = tpu.strided_load %arg13[%c107_287, %c0_288] {strides = array<i32: 2, 1>} : memref<128x32xf32, #tpu.memory_space<vmem>>, vector<3x32xf32>
    %272 = arith.truncf %271 : vector<3x32xf32> to vector<3x32xbf16>
    %c15_289 = arith.constant 15 : index
    %c224_290 = arith.constant 224 : index
    %273 = vector.load %arg14[%c15_289, %c224_290] : memref<18x512xbf16, #tpu.memory_space<vmem>>, vector<3x32xbf16>
    tpu.vector_store %arg14[%c15_289, %c224_290], %272 {strides = array<i32>} : memref<18x512xbf16, #tpu.memory_space<vmem>>, vector<3x32xbf16>,
    %c112 = arith.constant 112 : index
    %c0_291 = arith.constant 0 : index
    %274 = tpu.strided_load %arg13[%c112, %c0_291] {strides = array<i32: 2, 1>} : memref<128x32xf32, #tpu.memory_space<vmem>>, vector<3x32xf32>
    %275 = arith.truncf %274 : vector<3x32xf32> to vector<3x32xbf16>
    %c15_292 = arith.constant 15 : index
    %c256_293 = arith.constant 256 : index
    %276 = vector.load %arg14[%c15_292, %c256_293] : memref<18x512xbf16, #tpu.memory_space<vmem>>, vector<3x32xbf16>
    tpu.vector_store %arg14[%c15_292, %c256_293], %275 {strides = array<i32>} : memref<18x512xbf16, #tpu.memory_space<vmem>>, vector<3x32xbf16>,
    %c113 = arith.constant 113 : index
    %c0_294 = arith.constant 0 : index
    %277 = tpu.strided_load %arg13[%c113, %c0_294] {strides = array<i32: 2, 1>} : memref<128x32xf32, #tpu.memory_space<vmem>>, vector<3x32xf32>
    %278 = arith.truncf %277 : vector<3x32xf32> to vector<3x32xbf16>
    %c15_295 = arith.constant 15 : index
    %c288_296 = arith.constant 288 : index
    %279 = vector.load %arg14[%c15_295, %c288_296] : memref<18x512xbf16, #tpu.memory_space<vmem>>, vector<3x32xbf16>
    tpu.vector_store %arg14[%c15_295, %c288_296], %278 {strides = array<i32>} : memref<18x512xbf16, #tpu.memory_space<vmem>>, vector<3x32xbf16>,
    %c114 = arith.constant 114 : index
    %c0_297 = arith.constant 0 : index
    %280 = tpu.strided_load %arg13[%c114, %c0_297] {strides = array<i32: 2, 1>} : memref<128x32xf32, #tpu.memory_space<vmem>>, vector<3x32xf32>
    %281 = arith.truncf %280 : vector<3x32xf32> to vector<3x32xbf16>
    %c15_298 = arith.constant 15 : index
    %c320_299 = arith.constant 320 : index
    %282 = vector.load %arg14[%c15_298, %c320_299] : memref<18x512xbf16, #tpu.memory_space<vmem>>, vector<3x32xbf16>
    tpu.vector_store %arg14[%c15_298, %c320_299], %281 {strides = array<i32>} : memref<18x512xbf16, #tpu.memory_space<vmem>>, vector<3x32xbf16>,
    %c115 = arith.constant 115 : index
    %c0_300 = arith.constant 0 : index
    %283 = tpu.strided_load %arg13[%c115, %c0_300] {strides = array<i32: 2, 1>} : memref<128x32xf32, #tpu.memory_space<vmem>>, vector<3x32xf32>
    %284 = arith.truncf %283 : vector<3x32xf32> to vector<3x32xbf16>
    %c15_301 = arith.constant 15 : index
    %c352_302 = arith.constant 352 : index
    %285 = vector.load %arg14[%c15_301, %c352_302] : memref<18x512xbf16, #tpu.memory_space<vmem>>, vector<3x32xbf16>
    tpu.vector_store %arg14[%c15_301, %c352_302], %284 {strides = array<i32>} : memref<18x512xbf16, #tpu.memory_space<vmem>>, vector<3x32xbf16>,
    %c120 = arith.constant 120 : index
    %c0_303 = arith.constant 0 : index
    %286 = tpu.strided_load %arg13[%c120, %c0_303] {strides = array<i32: 2, 1>} : memref<128x32xf32, #tpu.memory_space<vmem>>, vector<3x32xf32>
    %287 = arith.truncf %286 : vector<3x32xf32> to vector<3x32xbf16>
    %c15_304 = arith.constant 15 : index
    %c384_305 = arith.constant 384 : index
    %288 = vector.load %arg14[%c15_304, %c384_305] : memref<18x512xbf16, #tpu.memory_space<vmem>>, vector<3x32xbf16>
    tpu.vector_store %arg14[%c15_304, %c384_305], %287 {strides = array<i32>} : memref<18x512xbf16, #tpu.memory_space<vmem>>, vector<3x32xbf16>,
    %c121 = arith.constant 121 : index
    %c0_306 = arith.constant 0 : index
    %289 = tpu.strided_load %arg13[%c121, %c0_306] {strides = array<i32: 2, 1>} : memref<128x32xf32, #tpu.memory_space<vmem>>, vector<3x32xf32>
    %290 = arith.truncf %289 : vector<3x32xf32> to vector<3x32xbf16>
    %c15_307 = arith.constant 15 : index
    %c416_308 = arith.constant 416 : index
    %291 = vector.load %arg14[%c15_307, %c416_308] : memref<18x512xbf16, #tpu.memory_space<vmem>>, vector<3x32xbf16>
    tpu.vector_store %arg14[%c15_307, %c416_308], %290 {strides = array<i32>} : memref<18x512xbf16, #tpu.memory_space<vmem>>, vector<3x32xbf16>,
    %c122 = arith.constant 122 : index
    %c0_309 = arith.constant 0 : index
    %292 = tpu.strided_load %arg13[%c122, %c0_309] {strides = array<i32: 2, 1>} : memref<128x32xf32, #tpu.memory_space<vmem>>, vector<3x32xf32>
    %293 = arith.truncf %292 : vector<3x32xf32> to vector<3x32xbf16>
    %c15_310 = arith.constant 15 : index
    %c448_311 = arith.constant 448 : index
    %294 = vector.load %arg14[%c15_310, %c448_311] : memref<18x512xbf16, #tpu.memory_space<vmem>>, vector<3x32xbf16>
    tpu.vector_store %arg14[%c15_310, %c448_311], %293 {strides = array<i32>} : memref<18x512xbf16, #tpu.memory_space<vmem>>, vector<3x32xbf16>,
    %c123 = arith.constant 123 : index
    %c0_312 = arith.constant 0 : index
    %295 = tpu.strided_load %arg13[%c123, %c0_312] {strides = array<i32: 2, 1>} : memref<128x32xf32, #tpu.memory_space<vmem>>, vector<3x32xf32>
    %296 = arith.truncf %295 : vector<3x32xf32> to vector<3x32xbf16>
    %c15_313 = arith.constant 15 : index
    %c480_314 = arith.constant 480 : index
    %297 = vector.load %arg14[%c15_313, %c480_314] : memref<18x512xbf16, #tpu.memory_space<vmem>>, vector<3x32xbf16>
    tpu.vector_store %arg14[%c15_313, %c480_314], %296 {strides = array<i32>} : memref<18x512xbf16, #tpu.memory_space<vmem>>, vector<3x32xbf16>,
    %c0_315 = arith.constant 0 : index
    %c0_316 = arith.constant 0 : index
    %298 = vector.load %arg14[%c0_315, %c0_316] : memref<18x512xbf16, #tpu.memory_space<vmem>>, vector<18x512xbf16>
    %c0_317 = arith.constant 0 : index
    %c0_318 = arith.constant 0 : index
    %299 = vector.load %arg4[%c0_317, %c0_318] : memref<512x64xbf16, #tpu.memory_space<vmem>>, vector<512x64xbf16>
    %cst_319 = arith.constant dense<0.000000e+00> : vector<18x64xf32>
    %300 = tpu.matmul %298, %299, %cst_319 {dimension_numbers = #tpu.dot_dimension_numbers<[1], [0], [0], [1], [0, 0, 1, 1], [], []>} : vector<18x512xbf16>, vector<512x64xbf16>, vector<18x64xf32> -> vector<18x64xf32>
    %c0_320 = arith.constant 0 : index
    %c0_321 = arith.constant 0 : index
    %301 = vector.load %arg5[%c0_320, %c0_321] : memref<1x64xf32, #tpu.memory_space<vmem>>, vector<1x64xf32>
    %302 = vector.broadcast %301 : vector<1x64xf32> to vector<18x64xf32>
    %303 = arith.addf %300, %302 : vector<18x64xf32>
    %cst_322 = arith.constant 0.000000e+00 : f32
    %304 = vector.broadcast %cst_322 : f32 to vector<18x64xf32>
    %305 = arith.maximumf %303, %304 : vector<18x64xf32>
    %c0_323 = arith.constant 0 : index
    %c0_324 = arith.constant 0 : index
    %306 = vector.load %arg15[%c0_323, %c0_324] : memref<18x64xf32, #tpu.memory_space<vmem>>, vector<18x64xf32>
    tpu.vector_store %arg15[%c0_323, %c0_324], %305 {strides = array<i32>} : memref<18x64xf32, #tpu.memory_space<vmem>>, vector<18x64xf32>,
    %c0_325 = arith.constant 0 : index
    %c0_326 = arith.constant 0 : index
    %307 = tpu.strided_load %arg15[%c0_325, %c0_326] {strides = array<i32: 9, 1>} : memref<18x64xf32, #tpu.memory_space<vmem>>, vector<2x64xf32>
    %308 = arith.truncf %307 : vector<2x64xf32> to vector<2x64xbf16>
    %c0_327 = arith.constant 0 : index
    %c0_328 = arith.constant 0 : index
    %309 = vector.load %arg16[%c0_327, %c0_328] : memref<2x576xbf16, #tpu.memory_space<vmem>>, vector<2x64xbf16>
    tpu.vector_store %arg16[%c0_327, %c0_328], %308 {strides = array<i32>} : memref<2x576xbf16, #tpu.memory_space<vmem>>, vector<2x64xbf16>,
    %c1_329 = arith.constant 1 : index
    %c0_330 = arith.constant 0 : index
    %310 = tpu.strided_load %arg15[%c1_329, %c0_330] {strides = array<i32: 9, 1>} : memref<18x64xf32, #tpu.memory_space<vmem>>, vector<2x64xf32>
    %311 = arith.truncf %310 : vector<2x64xf32> to vector<2x64xbf16>
    %c0_331 = arith.constant 0 : index
    %c64_332 = arith.constant 64 : index
    %312 = vector.load %arg16[%c0_331, %c64_332] : memref<2x576xbf16, #tpu.memory_space<vmem>>, vector<2x64xbf16>
    tpu.vector_store %arg16[%c0_331, %c64_332], %311 {strides = array<i32>} : memref<2x576xbf16, #tpu.memory_space<vmem>>, vector<2x64xbf16>,
    %c2_333 = arith.constant 2 : index
    %c0_334 = arith.constant 0 : index
    %313 = tpu.strided_load %arg15[%c2_333, %c0_334] {strides = array<i32: 9, 1>} : memref<18x64xf32, #tpu.memory_space<vmem>>, vector<2x64xf32>
    %314 = arith.truncf %313 : vector<2x64xf32> to vector<2x64xbf16>
    %c0_335 = arith.constant 0 : index
    %c128_336 = arith.constant 128 : index
    %315 = vector.load %arg16[%c0_335, %c128_336] : memref<2x576xbf16, #tpu.memory_space<vmem>>, vector<2x64xbf16>
    tpu.vector_store %arg16[%c0_335, %c128_336], %314 {strides = array<i32>} : memref<2x576xbf16, #tpu.memory_space<vmem>>, vector<2x64xbf16>,
    %c3_337 = arith.constant 3 : index
    %c0_338 = arith.constant 0 : index
    %316 = tpu.strided_load %arg15[%c3_337, %c0_338] {strides = array<i32: 9, 1>} : memref<18x64xf32, #tpu.memory_space<vmem>>, vector<2x64xf32>
    %317 = arith.truncf %316 : vector<2x64xf32> to vector<2x64xbf16>
    %c0_339 = arith.constant 0 : index
    %c192_340 = arith.constant 192 : index
    %318 = vector.load %arg16[%c0_339, %c192_340] : memref<2x576xbf16, #tpu.memory_space<vmem>>, vector<2x64xbf16>
    tpu.vector_store %arg16[%c0_339, %c192_340], %317 {strides = array<i32>} : memref<2x576xbf16, #tpu.memory_space<vmem>>, vector<2x64xbf16>,
    %c4 = arith.constant 4 : index
    %c0_341 = arith.constant 0 : index
    %319 = tpu.strided_load %arg15[%c4, %c0_341] {strides = array<i32: 9, 1>} : memref<18x64xf32, #tpu.memory_space<vmem>>, vector<2x64xf32>
    %320 = arith.truncf %319 : vector<2x64xf32> to vector<2x64xbf16>
    %c0_342 = arith.constant 0 : index
    %c256_343 = arith.constant 256 : index
    %321 = vector.load %arg16[%c0_342, %c256_343] : memref<2x576xbf16, #tpu.memory_space<vmem>>, vector<2x64xbf16>
    tpu.vector_store %arg16[%c0_342, %c256_343], %320 {strides = array<i32>} : memref<2x576xbf16, #tpu.memory_space<vmem>>, vector<2x64xbf16>,
    %c5 = arith.constant 5 : index
    %c0_344 = arith.constant 0 : index
    %322 = tpu.strided_load %arg15[%c5, %c0_344] {strides = array<i32: 9, 1>} : memref<18x64xf32, #tpu.memory_space<vmem>>, vector<2x64xf32>
    %323 = arith.truncf %322 : vector<2x64xf32> to vector<2x64xbf16>
    %c0_345 = arith.constant 0 : index
    %c320_346 = arith.constant 320 : index
    %324 = vector.load %arg16[%c0_345, %c320_346] : memref<2x576xbf16, #tpu.memory_space<vmem>>, vector<2x64xbf16>
    tpu.vector_store %arg16[%c0_345, %c320_346], %323 {strides = array<i32>} : memref<2x576xbf16, #tpu.memory_space<vmem>>, vector<2x64xbf16>,
    %c6_347 = arith.constant 6 : index
    %c0_348 = arith.constant 0 : index
    %325 = tpu.strided_load %arg15[%c6_347, %c0_348] {strides = array<i32: 9, 1>} : memref<18x64xf32, #tpu.memory_space<vmem>>, vector<2x64xf32>
    %326 = arith.truncf %325 : vector<2x64xf32> to vector<2x64xbf16>
    %c0_349 = arith.constant 0 : index
    %c384_350 = arith.constant 384 : index
    %327 = vector.load %arg16[%c0_349, %c384_350] : memref<2x576xbf16, #tpu.memory_space<vmem>>, vector<2x64xbf16>
    tpu.vector_store %arg16[%c0_349, %c384_350], %326 {strides = array<i32>} : memref<2x576xbf16, #tpu.memory_space<vmem>>, vector<2x64xbf16>,
    %c7 = arith.constant 7 : index
    %c0_351 = arith.constant 0 : index
    %328 = tpu.strided_load %arg15[%c7, %c0_351] {strides = array<i32: 9, 1>} : memref<18x64xf32, #tpu.memory_space<vmem>>, vector<2x64xf32>
    %329 = arith.truncf %328 : vector<2x64xf32> to vector<2x64xbf16>
    %c0_352 = arith.constant 0 : index
    %c448_353 = arith.constant 448 : index
    %330 = vector.load %arg16[%c0_352, %c448_353] : memref<2x576xbf16, #tpu.memory_space<vmem>>, vector<2x64xbf16>
    tpu.vector_store %arg16[%c0_352, %c448_353], %329 {strides = array<i32>} : memref<2x576xbf16, #tpu.memory_space<vmem>>, vector<2x64xbf16>,
    %c8_354 = arith.constant 8 : index
    %c0_355 = arith.constant 0 : index
    %331 = tpu.strided_load %arg15[%c8_354, %c0_355] {strides = array<i32: 9, 1>} : memref<18x64xf32, #tpu.memory_space<vmem>>, vector<2x64xf32>
    %332 = arith.truncf %331 : vector<2x64xf32> to vector<2x64xbf16>
    %c0_356 = arith.constant 0 : index
    %c512 = arith.constant 512 : index
    %333 = vector.load %arg16[%c0_356, %c512] : memref<2x576xbf16, #tpu.memory_space<vmem>>, vector<2x64xbf16>
    tpu.vector_store %arg16[%c0_356, %c512], %332 {strides = array<i32>} : memref<2x576xbf16, #tpu.memory_space<vmem>>, vector<2x64xbf16>,
    %c0_357 = arith.constant 0 : index
    %c0_358 = arith.constant 0 : index
    %334 = vector.load %arg16[%c0_357, %c0_358] : memref<2x576xbf16, #tpu.memory_space<vmem>>, vector<2x576xbf16>
    %c0_359 = arith.constant 0 : index
    %c0_360 = arith.constant 0 : index
    %335 = vector.load %arg6[%c0_359, %c0_360] : memref<576x64xbf16, #tpu.memory_space<vmem>>, vector<576x64xbf16>
    %cst_361 = arith.constant dense<0.000000e+00> : vector<2x64xf32>
    %336 = tpu.matmul %334, %335, %cst_361 {dimension_numbers = #tpu.dot_dimension_numbers<[1], [0], [0], [1], [0, 0, 1, 1], [], []>} : vector<2x576xbf16>, vector<576x64xbf16>, vector<2x64xf32> -> vector<2x64xf32>
    %c0_362 = arith.constant 0 : index
    %c0_363 = arith.constant 0 : index
    %337 = vector.load %arg7[%c0_362, %c0_363] : memref<1x64xf32, #tpu.memory_space<vmem>>, vector<1x64xf32>
    %338 = vector.broadcast %337 : vector<1x64xf32> to vector<2x64xf32>
    %339 = arith.addf %336, %338 : vector<2x64xf32>
    %cst_364 = arith.constant 0.000000e+00 : f32
    %340 = vector.broadcast %cst_364 : f32 to vector<2x64xf32>
    %341 = arith.maximumf %339, %340 : vector<2x64xf32>
    %342 = arith.truncf %341 : vector<2x64xf32> to vector<2x64xbf16>
    %c0_365 = arith.constant 0 : index
    %c0_366 = arith.constant 0 : index
    %343 = vector.load %arg17[%c0_365, %c0_366] : memref<2x64xbf16, #tpu.memory_space<vmem>>, vector<2x64xbf16>
    tpu.vector_store %arg17[%c0_365, %c0_366], %342 {strides = array<i32>} : memref<2x64xbf16, #tpu.memory_space<vmem>>, vector<2x64xbf16>,
    %c0_367 = arith.constant 0 : index
    %c0_368 = arith.constant 0 : index
    %344 = vector.load %arg17[%c0_367, %c0_368] : memref<2x64xbf16, #tpu.memory_space<vmem>>, vector<2x64xbf16>
    %c0_369 = arith.constant 0 : index
    %c0_370 = arith.constant 0 : index
    %345 = vector.load %arg18[%c0_369, %c0_370] : memref<2x64xbf16, #tpu.memory_space<vmem>>, vector<2x64xbf16>
    tpu.vector_store %arg18[%c0_369, %c0_370], %344 {strides = array<i32>} : memref<2x64xbf16, #tpu.memory_space<vmem>>, vector<2x64xbf16>,
    %c0_371 = arith.constant 0 : index
    %c0_372 = arith.constant 0 : index
    %346 = vector.load %arg18[%c0_371, %c0_372] : memref<2x64xbf16, #tpu.memory_space<vmem>>, vector<2x64xbf16>
    %c0_373 = arith.constant 0 : index
    %c0_374 = arith.constant 0 : index
    %347 = vector.load %arg8[%c0_373, %c0_374] : memref<64x512xbf16, #tpu.memory_space<vmem>>, vector<64x512xbf16>
    %cst_375 = arith.constant dense<0.000000e+00> : vector<2x512xf32>
    %348 = tpu.matmul %346, %347, %cst_375 {dimension_numbers = #tpu.dot_dimension_numbers<[1], [0], [0], [1], [0, 0, 1, 1], [], []>} : vector<2x64xbf16>, vector<64x512xbf16>, vector<2x512xf32> -> vector<2x512xf32>
    %c0_376 = arith.constant 0 : index
    %c0_377 = arith.constant 0 : index
    %349 = vector.load %arg9[%c0_376, %c0_377] : memref<1x512xf32, #tpu.memory_space<vmem>>, vector<1x512xf32>
    %350 = vector.broadcast %349 : vector<1x512xf32> to vector<2x512xf32>
    %351 = arith.addf %348, %350 : vector<2x512xf32>
    %cst_378 = arith.constant 0.000000e+00 : f32
    %352 = vector.broadcast %cst_378 : f32 to vector<2x512xf32>
    %353 = arith.maximumf %351, %352 : vector<2x512xf32>
    %354 = arith.truncf %353 : vector<2x512xf32> to vector<2x512xbf16>
    %c0_379 = arith.constant 0 : index
    %c0_380 = arith.constant 0 : index
    %355 = vector.load %arg10[%c0_379, %c0_380] : memref<512x128xbf16, #tpu.memory_space<vmem>>, vector<512x128xbf16>
    %cst_381 = arith.constant dense<0.000000e+00> : vector<2x128xf32>
    %356 = tpu.matmul %354, %355, %cst_381 {dimension_numbers = #tpu.dot_dimension_numbers<[1], [0], [0], [1], [0, 0, 1, 1], [], []>} : vector<2x512xbf16>, vector<512x128xbf16>, vector<2x128xf32> -> vector<2x128xf32>
    %c0_382 = arith.constant 0 : index
    %c0_383 = arith.constant 0 : index
    %357 = vector.load %arg11[%c0_382, %c0_383] : memref<1x128xf32, #tpu.memory_space<vmem>>, vector<1x128xf32>
    %358 = vector.broadcast %357 : vector<1x128xf32> to vector<2x128xf32>
    %359 = arith.addf %356, %358 : vector<2x128xf32>
    %c0_384 = arith.constant 0 : index
    %c0_385 = arith.constant 0 : index
    %c0_386 = arith.constant 0 : index
    %360 = vector.load %arg12[%c0_384, %c0_385, %c0_386] : memref<1x2x128xf32, #tpu.memory_space<vmem>>, vector<1x2x128xf32>
    %361 = vector.shape_cast %360 : vector<1x2x128xf32> to vector<2x128xf32>
    %362 = vector.shape_cast %359 : vector<2x128xf32> to vector<1x2x128xf32>
    tpu.vector_store %arg12[%c0_384, %c0_385, %c0_386], %362 {strides = array<i32>} : memref<1x2x128xf32, #tpu.memory_space<vmem>>, vector<1x2x128xf32>,
    return
  }
  func.func @transform_0(%arg0: i32) -> (i32, i32, i32) {
    %c0_i32 = arith.constant 0 : i32
    %c0_i32_0 = arith.constant 0 : i32
    %c0_i32_1 = arith.constant 0 : i32
    return %arg0, %c0_i32, %c0_i32_0 : i32, i32, i32
  }
  func.func @transform_1(%arg0: i32) -> (i32, i32) {
    %c0_i32 = arith.constant 0 : i32
    %c0_i32_0 = arith.constant 0 : i32
    %c0_i32_1 = arith.constant 0 : i32
    return %c0_i32, %c0_i32_0 : i32, i32
  }
  func.func @transform_2(%arg0: i32) -> (i32, i32) {
    %c0_i32 = arith.constant 0 : i32
    %c0_i32_0 = arith.constant 0 : i32
    %c0_i32_1 = arith.constant 0 : i32
    return %c0_i32, %c0_i32_0 : i32, i32
  }
  func.func @transform_3(%arg0: i32) -> (i32, i32) {
    %c0_i32 = arith.constant 0 : i32
    %c0_i32_0 = arith.constant 0 : i32
    %c0_i32_1 = arith.constant 0 : i32
    return %c0_i32, %c0_i32_0 : i32, i32
  }
  func.func @transform_4(%arg0: i32) -> (i32, i32) {
    %c0_i32 = arith.constant 0 : i32
    %c0_i32_0 = arith.constant 0 : i32
    %c0_i32_1 = arith.constant 0 : i32
    return %c0_i32, %c0_i32_0 : i32, i32
  }
  func.func @transform_5(%arg0: i32) -> (i32, i32) {
    %c0_i32 = arith.constant 0 : i32
    %c0_i32_0 = arith.constant 0 : i32
    %c0_i32_1 = arith.constant 0 : i32
    return %c0_i32, %c0_i32_0 : i32, i32
  }
  func.func @transform_6(%arg0: i32) -> (i32, i32) {
    %c0_i32 = arith.constant 0 : i32
    %c0_i32_0 = arith.constant 0 : i32
    %c0_i32_1 = arith.constant 0 : i32
    return %c0_i32, %c0_i32_0 : i32, i32
  }
  func.func @transform_7(%arg0: i32) -> (i32, i32) {
    %c0_i32 = arith.constant 0 : i32
    %c0_i32_0 = arith.constant 0 : i32
    %c0_i32_1 = arith.constant 0 : i32
    return %c0_i32, %c0_i32_0 : i32, i32
  }
  func.func @transform_8(%arg0: i32) -> (i32, i32) {
    %c0_i32 = arith.constant 0 : i32
    %c0_i32_0 = arith.constant 0 : i32
    %c0_i32_1 = arith.constant 0 : i32
    return %c0_i32, %c0_i32_0 : i32, i32
  }
  func.func @transform_9(%arg0: i32) -> (i32, i32) {
    %c0_i32 = arith.constant 0 : i32
    %c0_i32_0 = arith.constant 0 : i32
    %c0_i32_1 = arith.constant 0 : i32
    return %c0_i32, %c0_i32_0 : i32, i32
  }
  func.func @transform_10(%arg0: i32) -> (i32, i32) {
    %c0_i32 = arith.constant 0 : i32
    %c0_i32_0 = arith.constant 0 : i32
    %c0_i32_1 = arith.constant 0 : i32
    return %c0_i32, %c0_i32_0 : i32, i32
  }
  func.func @transform_11(%arg0: i32) -> (i32, i32, i32) {
    %c0_i32 = arith.constant 0 : i32
    %c0_i32_0 = arith.constant 0 : i32
    %c0_i32_1 = arith.constant 0 : i32
    return %arg0, %c0_i32, %c0_i32_0 : i32, i32, i32
  }
}

</mosaic_0001>

<bundles_post_ra>
// kernel: actor_net_forward.1
= control target key start
LH: loop header
LB: loop body
LE: loop exit
PB: predicated region body
PF: predicated region fallthrough
CT: control target
= control target key end

     0   :  { %s5744_s0 = inlined_call_operand.vmem [shape: bf16[1,128,256], index: 0, kind: input, shape index: {}]   ;;  %s5745_s1 = inlined_call_operand.vmem [shape: bf16[256,32], index: 1, kind: input, shape index: {}]   ;;  %s5746_s2 = inlined_call_operand.vmem [shape: f32[1,32], index: 2, kind: input, shape index: {}]   ;;  %s5747_s3 = inlined_call_operand.vmem [shape: bf16[512,64], index: 3, kind: input, shape index: {}]   ;;  %s5748_s4 = inlined_call_operand.vmem [shape: f32[1,64], index: 4, kind: input, shape index: {}]   ;;  %s5749_s5 = inlined_call_operand.vmem [shape: bf16[576,64], index: 5, kind: input, shape index: {}]   ;;  %s5750_s6 = inlined_call_operand.vmem [shape: f32[1,64], index: 6, kind: input, shape index: {}]   ;;  %s5751_s7 = inlined_call_operand.vmem [shape: bf16[64,512], index: 7, kind: input, shape index: {}]   ;;  %s5752_s8 = inlined_call_operand.vmem [shape: f32[1,512], index: 8, kind: input, shape index: {}]   ;;  %s5753_s9 = inlined_call_operand.vmem [shape: bf16[512,128], index: 9, kind: input, shape index: {}]   ;;  %s5754_s10 = inlined_call_operand.vmem [shape: f32[1,128], index: 10, kind: input, shape index: {}]   ;;  %s5755_s11 = inlined_call_operand.hbm [shape: f32[1,2,128], index: 11, kind: output, shape index: {}]  }
   0x1   :  { %v4222_v0 = vld [vmem:[%s5745_s1 + $0x40] sm:$0xff]   ;;  %v4224_v2 = vld [vmem:[%s5745_s1 + $0x48] sm:$0xff]   ;;  %v4226_v4 = vld [vmem:[%s5745_s1 + $0x50] sm:$0xff]  }
   0x2   :  { %v4223_v1 = vld [vmem:[%s5745_s1] sm:$0xff]   ;;  %3959 = vmatprep.subr.bf16.mxu0 %v4222_v0  ;;  %v4225_v3 = vld [vmem:[%s5745_s1 + $0x8] sm:$0xff]   ;;  %v4227_v5 = vld [vmem:[%s5745_s1 + $0x10] sm:$0xff]  }
   0x3   :  { %3960 = vmatpush3.bf16.msra.mxu0 %v4223_v1  ;;  %v4228_v6 = vld [vmem:[%s5745_s1 + $0x58] sm:$0xff]   ;;  %v4230_v8 = vld [vmem:[%s5745_s1 + $0x60] sm:$0xff]   ;;  %v4232_v10 = vld [vmem:[%s5745_s1 + $0x68] sm:$0xff]  }
   0x4   :  { %3961 = vmatprep.subr.bf16.mxu0 %v4224_v2  ;;  %v4229_v7 = vld [vmem:[%s5745_s1 + $0x18] sm:$0xff]   ;;  %v4231_v9 = vld [vmem:[%s5745_s1 + $0x20] sm:$0xff]   ;;  %v4233_v12 = vld [vmem:[%s5745_s1 + $0x28] sm:$0xff]  }
   0x5   :  { %v4240_v11 = vld [vmem:[%s5744_s0 + $0x4] ss:$8 sps:$4 sm:$0xff]   ;;  %v4234_v13 = vld [vmem:[%s5745_s1 + $0x70] sm:$0xff]   ;;  %v4236_v15 = vld [vmem:[%s5745_s1 + $0x78] sm:$0xff]  }
   0x6   :  { %303 = vmatprep.mubr.bf16.mxu0 %v4240_v11  ;;  %v4235_v14 = vld [vmem:[%s5745_s1 + $0x30] sm:$0xff]   ;;  %v4237_v16 = vld [vmem:[%s5745_s1 + $0x38] sm:$0xff]   ;;  %v4238_v17 = vld [vmem:[%s5744_s0] ss:$8 sps:$4 sm:$0xff]  }
   0x7   :  { %3962 = vmatpush3.bf16.msra.mxu0 %v4225_v3  ;;  %v4241_v18 = vld [vmem:[%s5744_s0 + $0x14] ss:$8 sps:$4 sm:$0xff]   ;;  %v4243_v19 = vld [vmem:[%s5744_s0 + $0x10] ss:$8 sps:$4 sm:$0xff]   ;;  %v4244_v20 = vld [vmem:[%s5744_s0 + $0x24] ss:$8 sps:$4 sm:$0xff]  }
   0x8   :  { %3963 = vmatprep.subr.bf16.mxu0 %v4226_v4  ;;  %v4246_v21 = vld [vmem:[%s5744_s0 + $0x20] ss:$8 sps:$4 sm:$0xff]   ;;  %v4247_v22 = vld [vmem:[%s5744_s0 + $0x34] ss:$8 sps:$4 sm:$0xff]   ;;  %v4249_v23 = vld [vmem:[%s5744_s0 + $0x30] ss:$8 sps:$4 sm:$0xff]  }
   0x9   :  { %v4250_v24 = vld [vmem:[%s5744_s0 + $0x44] ss:$8 sps:$4 sm:$0xff]   ;;  %v4252_v25 = vld [vmem:[%s5744_s0 + $0x40] ss:$8 sps:$4 sm:$0xff]   ;;  %v4253_v26 = vld [vmem:[%s5744_s0 + $0x54] ss:$8 sps:$4 sm:$0xff]  }
   0xa   :  { %v4255_v27 = vld [vmem:[%s5744_s0 + $0x50] ss:$8 sps:$4 sm:$0xff]   ;;  %v4256_v28 = vld [vmem:[%s5744_s0 + $0x64] ss:$8 sps:$4 sm:$0xff]   ;;  %v4258_v29 = vld [vmem:[%s5744_s0 + $0x60] ss:$8 sps:$4 sm:$0xff]  }
   0xb   :  { %3964 = vmatpush3.bf16.msra.mxu0 %v4227_v5  ;;  %v4259_v30 = vld [vmem:[%s5744_s0 + $0x74] ss:$8 sps:$4 sm:$0xff]   ;;  %v4261_v31 = vld [vmem:[%s5744_s0 + $0x70] ss:$8 sps:$4 sm:$0xff]  }
   0xc   :  { %3965 = vmatprep.subr.bf16.mxu0 %v4228_v6 }
   0xf   :  { %3966 = vmatpush3.bf16.msra.mxu0 %v4229_v7 }
  0x10   :  { %3967 = vmatprep.subr.bf16.mxu0 %v4230_v8 }
  0x13   :  { %3968 = vmatpush3.bf16.msra.mxu0 %v4231_v9 }
  0x14   :  { %3969 = vmatprep.subr.bf16.mxu0 %v4232_v10 }
  0x17   :  { %3970 = vmatpush3.bf16.msra.mxu0 %v4233_v12 }
  0x18   :  { %3971 = vmatprep.subr.bf16.mxu0 %v4234_v13 }
  0x1b   :  { %3972 = vmatpush3.bf16.msra.mxu0 %v4235_v14 }
  0x1c   :  { %3973 = vmatprep.subr.bf16.mxu0 %v4236_v15 }
  0x1f   :  { %3974 = vmatpush3.bf16.msra.mxu0 %v4237_v16 }
  0x22   :  { %304 = vmatmul.mubr.bf16.vlgmr.msra.gmra.mrb[0].mxu0 %v4238_v17 }
  0x23   :  { %311 = vmatprep.mubr.bf16.mxu0 %v4241_v18 }
  0x2a   :  { %312 = vmatmul.mubr.bf16.gmra.mrb[4].mxu0 %v4243_v19 }
  0x2b   :  { %319 = vmatprep.mubr.bf16.mxu0 %v4244_v20 }
  0x32   :  { %320 = vmatmul.mubr.bf16.gmra.mrb[8].mxu0 %v4246_v21 }
  0x33   :  { %327 = vmatprep.mubr.bf16.mxu0 %v4247_v22 }
  0x3a   :  { %328 = vmatmul.mubr.bf16.gmra.mrb[12].mxu0 %v4249_v23 }
  0x3b   :  { %335 = vmatprep.mubr.bf16.mxu0 %v4250_v24 }
  0x42   :  { %336 = vmatmul.mubr.bf16.gmra.mrb[16].mxu0 %v4252_v25 }
  0x43   :  { %343 = vmatprep.mubr.bf16.mxu0 %v4253_v26 }
  0x4a   :  { %344 = vmatmul.mubr.bf16.gmra.mrb[20].mxu0 %v4255_v27 }
  0x4b   :  { %351 = vmatprep.mubr.bf16.mxu0 %v4256_v28 }
  0x52   :  { %352 = vmatmul.mubr.bf16.gmra.mrb[24].mxu0 %v4258_v29 }
  0x53   :  { %359 = vmatprep.mubr.bf16.mxu0 %v4259_v30 }
  0x5a   :  { %360 = vmatmul.mubr.bf16.gmra.mrb[28].mxu0 %v4261_v31 }
  0x5b   :  { %16 = vsyncpa [#allocation9], 0  ;;  %v4588_v33 = vld [vmem:[%s5746_s2] ss:$0 sm:$0xff]  ;;  %vm384_vm0 = vcmask 261120   ;;  %vm403_vm1 = vcmask 254976  }
  0x5c   :  { %vm404_vm2 = vsmask.f32 1280  ;;  %s4421_s0 = smov 32   ;;  %v406_v0 = vld [vmem:[#allocation3] sm:$0x3]  ;;  %s4422_s2 = smov 64  }
  0x5d   :  { %vm4601_vm3 = vmand %vm403_vm1, %vm404_vm2  ;;  %v454_v6 = vld [vmem:[#allocation3 + $0x4] sm:$0x3]  ;;  %s4423_s24 = smov 96   ;;  %vm899_vm4 = vcmask 257027   ;;  %vm901_vm5 = vcmask 253952   ;;  %vm418_vm8 = vcmask 517376  }
  0x5e   :  { %vm902_vm6 = vsmask.f32 256  ;;  %vm1475_vm9 = vcmask 257026   ;;  %vm432_vm10 = vcmask 779776   ;;  %vm1476_vm11 = vsmask.f32 3328  ;;  %vm4804_vm13 = vmand %vm418_vm8, %vm404_vm2 }
  0x5f   :  { %vm4709_vm7 = vmand %vm901_vm5, %vm902_vm6  ;;  %vm446_vm15 = vcmask 1042176   ;;  %s4428_s27 = smov [#allocation8]  }
  0x60   :  { %vm4797_vm12 = vmand %vm1475_vm9, %vm1476_vm11  ;;  %vm5756_vm9 = vcmask 516352   ;;  %s3604_s28 = sshll.u32 %s4428_s27, 4  ;;  %s3605_s28 = int_to_ptr.vmem [resolvable:$true] %s3604_s28 }
  0x61   :  { %vm4851_vm14 = vmand %vm432_vm10, %vm404_vm2  ;;  %s4397_s29 = scalar_lea.vmem %s3605_s28, 32  ;;  %p4402_p1 = scmp.lt.s32.totalorder %s3605_s28, %s3605_s28 }
  0x62   :  { %p4398_p0 = scmp.ne.s32.totalorder %s3605_s28, %s4397_s29  ;;  %p4403_p2 = scmp.lt.s32.totalorder %s4397_s29, %s4397_s29 }
  0x64   :  { %p4404_p3 = por %p4403_p2, %p4402_p1 }
  0x66   :  { %p4405_p4 = pnand %p4404_p3, %p4398_p0 }
  0xf5   :  { %v3975_v32 = vpop.f32.mrb[0].mxu0 }
  0xf6   :  { %v3976_v34 = vpop.f32.mrb[1].mxu0 }
  0xf7   :  { %v3977_v35 = vadd.f32 %v3976_v34, %v3975_v32  ;;  %v3978_v36 = vpop.f32.mrb[2].mxu0 }
  0xf8   :  { %v3979_v37 = vpop.f32.mrb[3].mxu0 }
  0xf9   :  { %v306_v38 = vadd.f32 %v3977_v35, %v4588_v33  ;;  %v3980_v39 = vadd.f32 %v3979_v37, %v3978_v36 }
  0xfb   :  { %v368_v40 = vmax.f32 %v306_v38, 0.0  ;;  %v309_v41 = vadd.f32 %v3980_v39, %v4588_v33 }
  0xfd   :  { %385 = vst.msk [vmem:[#allocation2] sm:$0xff] %vm384_vm0, %v368_v40  ;;  %v369_v42 = vmax.f32 %v309_v41, 0.0  ;;  %v3981_v43 = vpop.f32.mrb[4].mxu0 }
  0xfe   :  { %v3982_v44 = vpop.f32.mrb[5].mxu0 }
  0xff   :  { %386 = vst.msk [vmem:[#allocation2 + $0x8] sm:$0xff] %vm384_vm0, %v369_v42  ;;  %v3983_v45 = vadd.f32 %v3982_v44, %v3981_v43  ;;  %v3984_v46 = vpop.f32.mrb[6].mxu0 }
 0x100   :  { %v3985_v47 = vpop.f32.mrb[7].mxu0 }
 0x101   :  { %v314_v48 = vadd.f32 %v3983_v45, %v4588_v33  ;;  %v3986_v49 = vadd.f32 %v3985_v47, %v3984_v46 }
 0x103   :  { %v370_v50 = vmax.f32 %v314_v48, 0.0  ;;  %v317_v51 = vadd.f32 %v3986_v49, %v4588_v33 }
 0x104   :  { %v410_v52 = vld [vmem:[#allocation2 + $0x1] ss:$2 sm:$0x7]  ;;  %v424_v57 = vld [vmem:[#allocation2 + $0x2] ss:$2 sm:$0x7] }
 0x105   :  { %387 = vst.msk [vmem:[#allocation2 + $0x10] sm:$0xff] %vm384_vm0, %v370_v50  ;;  %v371_v53 = vmax.f32 %v317_v51, 0.0  ;;  %v3867_v54 = vpack.c.bf16 %v410_v52, %v410_v52  ;;  %v3987_v55 = vpop.f32.mrb[8].mxu0  ;;  %v401_v1 = vld [vmem:[#allocation2] ss:$2 sm:$0x7]  ;;  %v3868_v2 = vpack.c.bf16 %v424_v57, %v424_v57 }
 0x106   :  { %v470_v56 = vld [vmem:[#allocation2 + $0xa] ss:$2 sm:$0x7]  ;;  %v482_v59 = vld [vmem:[#allocation2 + $0xb] ss:$2 sm:$0x7]  ;;  %v402_v4 = vpack.c.bf16 %v401_v1, %v401_v1 }
 0x107   :  { %388 = vst.msk [vmem:[#allocation2 + $0x18] sm:$0xff] %vm384_vm0, %v371_v53  ;;  %415 = vrot.lane.b32.xlu0 %v3867_v54, %s4421_s0  ;;  %v3871_v58 = vpack.c.bf16 %v470_v56, %v470_v56  ;;  %v3988_v60 = vpop.f32.mrb[9].mxu0  ;;  %v452_v5 = vld [vmem:[#allocation2 + $0x8] ss:$2 sm:$0x7]  ;;  %v3872_v11 = vpack.c.bf16 %v482_v59, %v482_v59 }
 0x108   :  { %v3989_v61 = vadd.f32 %v3988_v60, %v3987_v55  ;;  %v3990_v62 = vpop.f32.mrb[10].mxu0  ;;  %v438_v7 = vld [vmem:[#allocation2 + $0x3] ss:$2 sm:$0x7]  ;;  %v453_v10 = vpack.c.bf16 %v452_v5, %v452_v5  ;;  %v407_v12 = vsel %vm4601_vm3, %v402_v4, %v406_v0 }
 0x109   :  { %475 = vrot.lane.b32.xlu1 %v3871_v58, %s4422_s2  ;;  %v3991_v3 = vpop.f32.mrb[11].mxu0  ;;  %408 = vst [vmem:[#allocation3] sm:$0x3] %v407_v12  ;;  %v3869_v17 = vpack.c.bf16 %v438_v7, %v438_v7  ;;  %v458_v20 = vld [vmem:[#allocation2 + $0x9] ss:$2 sm:$0x7] }
 0x10a   :  { %v322_v8 = vadd.f32 %v3989_v61, %v4588_v33  ;;  %v3992_v9 = vadd.f32 %v3991_v3, %v3990_v62  ;;  %v455_v16 = vsel %vm4601_vm3, %v453_v10, %v454_v6  ;;  %v3870_v26 = vpack.c.bf16 %v458_v20, %v458_v20 }
 0x10b   :  { %429 = vrot.lane.b32.xlu0 %v3868_v2, %s4422_s2  ;;  %456 = vst [vmem:[#allocation3 + $0x4] sm:$0x3] %v455_v16 }
 0x10c   :  { %v372_v13 = vmax.f32 %v322_v8, 0.0  ;;  %v512_v14 = vld [vmem:[#allocation2 + $0x12] ss:$2 sm:$0x7]  ;;  %v325_v15 = vadd.f32 %v3992_v9, %v4588_v33 }
 0x10d   :  { %487 = vrot.lane.b32.xlu1 %v3872_v11, %s4423_s24  ;;  %v3874_v18 = vpack.c.bf16 %v512_v14, %v512_v14  ;;  %v3993_v21 = vpop.f32.mrb[12].mxu0  ;;  %v618_v23 = vld [vmem:[#allocation2 + $0x12] ss:$2 sm:$0x7] }
 0x10e   :  { %389 = vst.msk [vmem:[#allocation2 + $0x20] sm:$0xff] %vm384_vm0, %v372_v13  ;;  %v373_v19 = vmax.f32 %v325_v15, 0.0  ;;  %v542_v22 = vld [vmem:[#allocation2 + $0x19] ss:$2 sm:$0x7]  ;;  %v3881_v24 = vpack.c.bf16 %v618_v23, %v618_v23  ;;  %v3994_v32 = vpop.f32.mrb[13].mxu0 }
 0x10f   :  { %443 = vrot.lane.b32.xlu0 %v3869_v17, %s4423_s24  ;;  %v677_v25 = vld [vmem:[#allocation2 + $0x19] ss:$2 sm:$0x7]  ;;  %v500_v27 = vld [vmem:[#allocation2 + $0x11] ss:$2 sm:$0x7]  ;;  %v3876_v30 = vpack.c.bf16 %v542_v22, %v542_v22  ;;  %v3995_v38 = vadd.f32 %v3994_v32, %v3993_v21 }
 0x110   :  { %390 = vst.msk [vmem:[#allocation2 + $0x28] sm:$0xff] %vm384_vm0, %v373_v19  ;;  %v3884_v28 = vpack.c.bf16 %v677_v25, %v677_v25  ;;  %v597_v29 = vld [vmem:[#allocation2 + $0x11] ss:$2 sm:$0x7]  ;;  %v624_v34 = vshrl.u32 %v3881_v24, 16  ;;  %v627_v35 = vshll.u32 %v3881_v24, 16  ;;  %v3873_v41 = vpack.c.bf16 %v500_v27, %v500_v27 }
 0x111   :  { %517 = vrot.lane.b32.xlu1 %v3874_v18, %s4422_s2  ;;  %v566_v31 = vld [vmem:[#allocation2 + $0x1b] ss:$2 sm:$0x7]  ;;  %v3880_v36 = vpack.c.bf16 %v597_v29, %v597_v29  ;;  %v3996_v39 = vpop.f32.mrb[14].mxu0  ;;  %v330_v55 = vadd.f32 %v3995_v38, %v4588_v33 }
 0x112   :  { %v715_v37 = vld [vmem:[#allocation2 + $0x1b] ss:$2 sm:$0x7]  ;;  %v3997_v40 = vpop.f32.mrb[15].mxu0  ;;  %v683_v42 = vshrl.u32 %v3884_v28, 16  ;;  %v686_v43 = vshll.u32 %v3884_v28, 16  ;;  %v3878_v46 = vpack.c.bf16 %v566_v31, %v566_v31 }
 0x113   :  { %463 = vrot.lane.b32.xlu0 %v3870_v26, %s4421_s0  ;;  %v639_v44 = vld [vmem:[#allocation2 + $0x13] ss:$2 sm:$0x7]  ;;  %v3886_v48 = vpack.c.bf16 %v715_v37, %v715_v37  ;;  %v626_v49 = vrot.slane %v624_v34, 6  ;;  %v629_v50 = vrot.slane %v627_v35, 7  ;;  %v603_v51 = vshrl.u32 %v3880_v36, 16 }
 0x114   :  { %v524_v47 = vld [vmem:[#allocation2 + $0x13] ss:$2 sm:$0x7]  ;;  %v606_v52 = vshll.u32 %v3880_v36, 16  ;;  %v3882_v54 = vpack.c.bf16 %v639_v44, %v639_v44  ;;  %v685_v59 = vrot.slane %v683_v42, 6  ;;  %v688_v60 = vrot.slane %v686_v43, 7 }
 0x115   :  { %547 = vrot.lane.b32.xlu1 %v3876_v30, %s4421_s0  ;;  %v3999_v45 = vpop.f32.mrb[16].mxu0  ;;  %v554_v53 = vld [vmem:[#allocation2 + $0x1a] ss:$2 sm:$0x7]  ;;  %v3875_v58 = vpack.c.bf16 %v524_v47, %v524_v47  ;;  %v3998_v62 = vadd.f32 %v3997_v40, %v3996_v39  ;;  %v721_v1 = vshrl.u32 %v3886_v48, 16  ;;  %v724_v2 = vshll.u32 %v3886_v48, 16 }
 0x116   :  { %v696_v56 = vld [vmem:[#allocation2 + $0x1a] ss:$2 sm:$0x7]  ;;  %v4000_v57 = vpop.f32.mrb[17].mxu0  ;;  %v374_v3 = vmax.f32 %v330_v55, 0.0  ;;  %v630_v6 = vor.u32 %v629_v50, %v626_v49  ;;  %v605_v7 = vrot.slane %v603_v51, 6  ;;  %v3877_v14 = vpack.c.bf16 %v554_v53, %v554_v53 }
 0x117   :  { %505 = vrot.lane.b32.xlu0 %v3873_v41, %s4421_s0  ;;  %v907_v61 = vld [vmem:[#allocation2 + $0x21] ss:$2 sm:$0x7]  ;;  %v4002_v0 = vpop.f32.mrb[18].mxu0  ;;  %v4001_v4 = vadd.f32 %v4000_v57, %v3999_v45  ;;  %v608_v8 = vrot.slane %v606_v52, 7  ;;  %v333_v9 = vadd.f32 %v3998_v62, %v4588_v33  ;;  %v645_v10 = vshrl.u32 %v3882_v54, 16 }
 0x118   :  { %v4003_v5 = vpop.f32.mrb[19].mxu0  ;;  %v648_v11 = vshll.u32 %v3882_v54, 16  ;;  %391 = vst.msk [vmem:[#allocation2 + $0x30] sm:$0xff] %vm384_vm0, %v374_v3  ;;  %v3896_v12 = vpack.c.bf16 %v907_v61, %v907_v61  ;;  %v3885_v16 = vpack.c.bf16 %v696_v56, %v696_v56  ;;  %v689_v19 = vor.u32 %v688_v60, %v685_v59  ;;  %v980_v41 = vld [vmem:[#allocation2 + $0x29] ss:$2 sm:$0x7] }
 0x119   :  { %571 = vrot.lane.b32.xlu1 %v3878_v46, %s4423_s24  ;;  %v338_v13 = vadd.f32 %v4001_v4, %v4588_v33  ;;  %v375_v15 = vmax.f32 %v333_v9, 0.0  ;;  %v4004_v17 = vadd.f32 %v4003_v5, %v4002_v0  ;;  %v609_v22 = vor.u32 %v608_v8, %v605_v7  ;;  %v997_v52 = vld [vmem:[#allocation2 + $0x2a] ss:$2 sm:$0x7] }
 0x11a   :  { %v723_v23 = vrot.slane %v721_v1, 6  ;;  %v726_v24 = vrot.slane %v724_v2, 7  ;;  %v647_v27 = vrot.slane %v645_v10, 6  ;;  %v650_v28 = vrot.slane %v648_v11, 7 }
 0x11b   :  { %529 = vrot.lane.b32.xlu0 %v3875_v58, %s4423_s24  ;;  %v376_v20 = vmax.f32 %v338_v13, 0.0  ;;  %392 = vst.msk [vmem:[#allocation2 + $0x38] sm:$0xff] %vm384_vm0, %v375_v15  ;;  %v341_v25 = vadd.f32 %v4004_v17, %v4588_v33  ;;  %v912_v29 = vrot.slane %v3896_v12, 5  ;;  %v702_v32 = vshrl.u32 %v3885_v16, 16 }
 0x11c   :  { %v705_v34 = vshll.u32 %v3885_v16, 16  ;;  %v727_v38 = vor.u32 %v726_v24, %v723_v23  ;;  %v651_v40 = vor.u32 %v650_v28, %v647_v27  ;;  %v3900_v49 = vpack.c.bf16 %v980_v41, %v980_v41  ;;  %v927_v56 = vld [vmem:[#allocation2 + $0x22] ss:$2 sm:$0x7] }
 0x11d   :  { %631 = vrot.lane.b32.xlu1 %v630_v6, %s4422_s2  ;;  %v4005_v18 = vpop.f32.mrb[20].mxu0  ;;  %393 = vst.msk [vmem:[#allocation2 + $0x40] sm:$0xff] %vm384_vm0, %v376_v20  ;;  %v377_v35 = vmax.f32 %v341_v25, 0.0  ;;  %v913_v43 = vrot.slane %v912_v29, 4  ;;  %v704_v44 = vrot.slane %v702_v32, 6  ;;  %v3901_v59 = vpack.c.bf16 %v997_v52, %v997_v52 }
 0x11e   :  { %v4006_v21 = vpop.f32.mrb[21].mxu0  ;;  %v707_v45 = vrot.slane %v705_v34, 7  ;;  %v985_v58 = vrot.slane %v3900_v49, 5  ;;  %v3897_v61 = vpack.c.bf16 %v927_v56, %v927_v56  ;;  %v947_v62 = vld [vmem:[#allocation2 + $0x23] ss:$2 sm:$0x7] }
 0x11f   :  { %559 = vrot.lane.b32.xlu0 %v3877_v14, %s4422_s2  ;;  %v4008_v26 = vpop.f32.mrb[22].mxu0  ;;  %v4007_v30 = vadd.f32 %v4006_v21, %v4005_v18  ;;  %394 = vst.msk [vmem:[#allocation2 + $0x48] sm:$0xff] %vm384_vm0, %v377_v35  ;;  %v1002_v0 = vrot.slane %v3901_v59, 5  ;;  %v1014_v1 = vld [vmem:[#allocation2 + $0x2b] ss:$2 sm:$0x7]  ;;  %v3898_v4 = vpack.c.bf16 %v947_v62, %v947_v62 }
 0x120   :  { %v4009_v31 = vpop.f32.mrb[23].mxu0  ;;  %v708_v54 = vor.u32 %v707_v45, %v704_v44  ;;  %v1046_v2 = vld [vmem:[#allocation2 + $0x31] ss:$2 sm:$0x7]  ;;  %v932_v3 = vrot.slane %v3897_v61, 5  ;;  %v986_v6 = vrot.slane %v985_v58, 4  ;;  %v3902_v7 = vpack.c.bf16 %v1014_v1, %v1014_v1 }
 0x121   :  { %690 = vrot.lane.b32.xlu1 %v689_v19, %s4421_s0  ;;  %v4010_v36 = vadd.f32 %v4009_v31, %v4008_v26  ;;  %v346_v37 = vadd.f32 %v4007_v30, %v4588_v33  ;;  %v3904_v8 = vpack.c.bf16 %v1046_v2, %v1046_v2  ;;  %v1064_v11 = vld [vmem:[#allocation2 + $0x32] ss:$2 sm:$0x7]  ;;  %v4651_v14 = vrot.slane %v3898_v4, 5 }
 0x122   :  { %v933_v13 = vrot.slane %v932_v3, 4  ;;  %v1082_v17 = vld [vmem:[#allocation2 + $0x33] ss:$2 sm:$0x7]  ;;  %v1003_v18 = vrot.slane %v1002_v0, 4  ;;  %v4654_v19 = vrot.slane %v3902_v7, 5  ;;  %v3905_v21 = vpack.c.bf16 %v1064_v11, %v1064_v11 }
 0x123   :  { %610 = vrot.lane.b32.xlu0 %v609_v22, %s4421_s0  ;;  %v349_v39 = vadd.f32 %v4010_v36, %v4588_v33  ;;  %v378_v42 = vmax.f32 %v346_v37, 0.0  ;;  %v4656_v20 = vrot.slane %v3904_v8, 5  ;;  %v1114_v22 = vld [vmem:[#allocation2 + $0x39] ss:$2 sm:$0x7]  ;;  %v953_v23 = vrot.slane %v4651_v14, 4 }
 0x124   :  { %v3906_v24 = vpack.c.bf16 %v1082_v17, %v1082_v17  ;;  %v1132_v25 = vld [vmem:[#allocation2 + $0x3a] ss:$2 sm:$0x7]  ;;  %v1187_v26 = vld [vmem:[#allocation2 + $0x41] ss:$2 sm:$0x7]  ;;  %v3908_v30 = vpack.c.bf16 %v1114_v22, %v1114_v22 }
 0x125   :  { %728 = vrot.lane.b32.xlu1 %v727_v38, %s4423_s24  ;;  %v379_v46 = vmax.f32 %v349_v39, 0.0  ;;  %v4011_v47 = vpop.f32.mrb[24].mxu0  ;;  %395 = vst.msk [vmem:[#allocation2 + $0x50] sm:$0xff] %vm384_vm0, %v378_v42  ;;  %v1020_v27 = vrot.slane %v4654_v19, 4  ;;  %v1052_v28 = vrot.slane %v4656_v20, 4  ;;  %v3909_v32 = vpack.c.bf16 %v1132_v25, %v1132_v25 }
 0x126   :  { %v4012_v48 = vpop.f32.mrb[25].mxu0  ;;  %v1150_v31 = vld [vmem:[#allocation2 + $0x3b] ss:$2 sm:$0x7]  ;;  %v4667_v35 = vrot.slane %v3906_v24, 5  ;;  %v3912_v36 = vpack.c.bf16 %v1187_v26, %v1187_v26  ;;  %v4671_v42 = vrot.slane %v3908_v30, 5 }
 0x127   :  { %652 = vrot.lane.b32.xlu0 %v651_v40, %s4423_s24  ;;  %396 = vst.msk [vmem:[#allocation2 + $0x58] sm:$0xff] %vm384_vm0, %v379_v46  ;;  %v4013_v50 = vadd.f32 %v4012_v48, %v4011_v47  ;;  %v4014_v51 = vpop.f32.mrb[26].mxu0  ;;  %v1207_v34 = vld [vmem:[#allocation2 + $0x42] ss:$2 sm:$0x7]  ;;  %v3910_v37 = vpack.c.bf16 %v1150_v31, %v1150_v31  ;;  %v4673_v45 = vrot.slane %v3909_v32, 5 }
 0x128   :  { %v4015_v53 = vpop.f32.mrb[27].mxu0  ;;  %v1227_v38 = vld [vmem:[#allocation2 + $0x43] ss:$2 sm:$0x7]  ;;  %v1088_v47 = vrot.slane %v4667_v35, 4  ;;  %v1193_v48 = vshrl.u32 %v3912_v36, 16 }
 0x129   :  { %916 = vrot.lane.b32.xlu1 %v913_v43, %s4421_s0  ;;  %v354_v55 = vadd.f32 %v4013_v50, %v4588_v33  ;;  %v4016_v57 = vadd.f32 %v4015_v53, %v4014_v51  ;;  %v3913_v43 = vpack.c.bf16 %v1207_v34, %v1207_v34  ;;  %v536_v44 = vld [vmem:[#allocation2 + $0x18] ss:$2 sm:$0x7]  ;;  %v1264_v46 = vld [vmem:[#allocation2 + $0x49] ss:$2 sm:$0x7]  ;;  %v3914_v49 = vpack.c.bf16 %v1227_v38, %v1227_v38 }
 0x12a   :  { %v4677_v50 = vrot.slane %v3910_v37, 5  ;;  %v1283_v51 = vld [vmem:[#allocation2 + $0x4a] ss:$2 sm:$0x7]  ;;  %v537_v53 = vpack.c.bf16 %v536_v44, %v536_v44  ;;  %v1138_v59 = vrot.slane %v4673_v45, 4  ;;  %v1196_v1 = vshll.u32 %v3912_v36, 16 }
 0x12b   :  { %709 = vrot.lane.b32.xlu0 %v708_v54, %s4422_s2  ;;  %v380_v60 = vmax.f32 %v354_v55, 0.0  ;;  %v357_v9 = vadd.f32 %v4016_v57, %v4588_v33  ;;  %v538_v54 = vld [vmem:[#allocation3 + $0xc] sm:$0x3]  ;;  %v1120_v55 = vrot.slane %v4671_v42, 4  ;;  %v1213_v56 = vshrl.u32 %v3913_v43, 16 }
 0x12c   :  { %v3916_v57 = vpack.c.bf16 %v1264_v46, %v1264_v46  ;;  %v494_v62 = vld [vmem:[#allocation2 + $0x10] ss:$2 sm:$0x7]  ;;  %v1233_v2 = vshrl.u32 %v3914_v49, 16  ;;  %v1156_v4 = vrot.slane %v4677_v50, 4  ;;  %v539_v7 = vsel %vm4601_vm3, %v537_v53, %v538_v54 }
 0x12d   :  { %987 = vrot.lane.b32.xlu1 %v985_v58, %s4421_s0  ;;  %397 = vst.msk [vmem:[#allocation2 + $0x60] sm:$0xff] %vm384_vm0, %v380_v60  ;;  %v4017_v5 = vpop.f32.mrb[28].mxu0  ;;  %v381_v15 = vmax.f32 %v357_v9, 0.0  ;;  %v1302_v58 = vld [vmem:[#allocation2 + $0x4b] ss:$2 sm:$0x7]  ;;  %v495_v11 = vpack.c.bf16 %v494_v62, %v494_v62 }
 0x12e   :  { %v4018_v10 = vpop.f32.mrb[29].mxu0  ;;  %v496_v8 = vld [vmem:[#allocation3 + $0x8] sm:$0x3]  ;;  %v1270_v9 = vshrl.u32 %v3916_v57, 16  ;;  %540 = vst [vmem:[#allocation3 + $0xc] sm:$0x3] %v539_v7 }
 0x12f   :  { %914 = vrot.lane.b32.xlu0 %v912_v29, %s4421_s0  ;;  %v4020_v12 = vpop.f32.mrb[30].mxu0  ;;  %398 = vst.msk [vmem:[#allocation2 + $0x68] sm:$0xff] %vm384_vm0, %v381_v15  ;;  %v4664_v29 = vrot.slane %v3905_v21, 5  ;;  %v4019_v39 = vadd.f32 %v4018_v10, %v4017_v5  ;;  %v1216_v5 = vshll.u32 %v3913_v43, 16  ;;  %v3918_v10 = vpack.c.bf16 %v1302_v58, %v1302_v58 }
 0x130   :  { %v4021_v16 = vpop.f32.mrb[31].mxu0  ;;  %v1235_v15 = vrot.slane %v1233_v2, 7  ;;  %v497_v17 = vsel %vm4601_vm3, %v495_v11, %v496_v8  ;;  %v1272_v21 = vrot.slane %v1270_v9, 7  ;;  %v1273_v22 = vshll.u32 %v3916_v57, 16  ;;  %v904_v2 = vld [vmem:[#allocation3 + $0x10] sm:$0x1] }
 0x131   :  { %1004 = vrot.lane.b32.xlu1 %v1002_v0, %s4422_s2  ;;  %v4022_v40 = vadd.f32 %v4021_v16, %v4020_v12  ;;  %v1070_v41 = vrot.slane %v4664_v29, 4  ;;  %v362_v52 = vadd.f32 %v4019_v39, %v4588_v33  ;;  %v1195_v0 = vrot.slane %v1193_v48, 7  ;;  %498 = vst [vmem:[#allocation3 + $0x8] sm:$0x3] %v497_v17 }
 0x132   :  { %v1236_v12 = vshll.u32 %v3914_v49, 16  ;;  %v1481_v24 = vld [vmem:[#allocation2 + $0x51] ss:$2 sm:$0x7]  ;;  %v1311_v31 = vshll.u32 %v3918_v10, 16 }
 0x133   :  { %934 = vrot.lane.b32.xlu0 %v932_v3, %s4422_s2  ;;  %v382_v60 = vmax.f32 %v362_v52, 0.0  ;;  %v365_v61 = vadd.f32 %v4022_v40, %v4588_v33  ;;  %v3917_v3 = vpack.c.bf16 %v1283_v51, %v1283_v51  ;;  %v1215_v33 = vrot.slane %v1213_v56, 7  ;;  %v1533_v32 = vld [vmem:[#allocation2 + $0x59] ss:$2 sm:$0x7] }
 0x134   :  { %v1238_v25 = vor.u32 %v1236_v12, %v1235_v15  ;;  %v3928_v63 = vpack.c.bf16 %v1481_v24, %v1481_v24  ;;  %v1495_v36 = vld [vmem:[#allocation2 + $0x52] ss:$2 sm:$0x7]  ;;  %v753_v37 = vld [vmem:[#allocation2 + $0x21] ss:$2 sm:$0x7]  ;;  %v3932_v40 = vpack.c.bf16 %v1533_v32, %v1533_v32 }
 0x135   :  { %989 = vrot.lane.b32.xlu1 %v986_v6, %s4421_s0  ;;  %399 = vst.msk [vmem:[#allocation2 + $0x70] sm:$0xff] %vm384_vm0, %v382_v60  ;;  %v383_v6 = vmax.f32 %v365_v61, 0.0  ;;  %v1289_v16 = vshrl.u32 %v3917_v3, 16  ;;  %v3888_v43 = vpack.c.bf16 %v753_v37, %v753_v37  ;;  %v831_v44 = vld [vmem:[#allocation2 + $0x29] ss:$2 sm:$0x7] }
 0x136   :  { %v1486_v39 = vrot.slane %v3928_v63, 6  ;;  %v1509_v46 = vld [vmem:[#allocation2 + $0x53] ss:$2 sm:$0x7]  ;;  %v3892_v51 = vpack.c.bf16 %v831_v44, %v831_v44  ;;  %vm592_vm3 = vsmask.f32 7942 }
 0x137   :  { %936 = vrot.lane.b32.xlu0 %v933_v13, %s4422_s2  ;;  %400 = vst.msk [vmem:[#allocation2 + $0x78] sm:$0xff] %vm384_vm0, %v383_v6  ;;  %v1198_v13 = vor.u32 %v1196_v1, %v1195_v0  ;;  %v1291_v26 = vrot.slane %v1289_v16, 7  ;;  %v890_v48 = vld [vmem:[#allocation2 + $0x20] ss:$2 sm:$0x7]  ;;  %v3930_v53 = vpack.c.bf16 %v1509_v46, %v1509_v46  ;;  %v759_v54 = vshrl.u32 %v3888_v43, 16  ;;  %vm4907_vm0 = vmand %vm446_vm15, %vm404_vm2 }
 0x138   :  { %v1545_v49 = vld [vmem:[#allocation2 + $0x5a] ss:$2 sm:$0x7]  ;;  %v851_v56 = vld [vmem:[#allocation2 + $0x2a] ss:$2 sm:$0x7] }
 0x139   :  { %1006 = vrot.lane.b32.xlu1 %v1003_v18, %s4422_s2  ;;  %v1218_v18 = vor.u32 %v1216_v5, %v1215_v33  ;;  %v1669_v57 = vld [vmem:[#allocation2 + $0x60] ss:$2 sm:$0x7]  ;;  %v1412_v58 = vld [vmem:[#allocation2 + $0x59] ss:$2 sm:$0x7]  ;;  %v3933_v60 = vpack.c.bf16 %v1545_v49, %v1545_v49  ;;  %v3893_v9 = vpack.c.bf16 %v851_v56, %v851_v56 }
 0x13a   :  { %v1338_v61 = vld [vmem:[#allocation2 + $0x51] ss:$2 sm:$0x7]  ;;  %v967_v62 = vld [vmem:[#allocation2 + $0x28] ss:$2 sm:$0x7]  ;;  %v3924_v7 = vpack.c.bf16 %v1412_v58, %v1412_v58 }
 0x13b   :  { %956 = vrot.lane.b32.xlu0 %v953_v23, %s4423_s24  ;;  %v1308_v23 = vshrl.u32 %v3918_v10, 16  ;;  %v837_v0 = vshrl.u32 %v3892_v51, 16  ;;  %v840_v5 = vshll.u32 %v3892_v51, 16  ;;  %v1557_v6 = vld [vmem:[#allocation2 + $0x5b] ss:$2 sm:$0x7]  ;;  %v4713_v33 = vpack.c.bf16 %v1338_v61, %v1338_v61 }
 0x13c   :  { %v3899_v11 = vpack.c.bf16 %v967_v62, %v967_v62  ;;  %v761_v12 = vrot.slane %v759_v54, 6  ;;  %v773_v15 = vld [vmem:[#allocation2 + $0x22] ss:$2 sm:$0x7]  ;;  %v977_v16 = vld [vmem:[#allocation3 + $0x14] sm:$0x1] }
 0x13d   :  { %1023 = vrot.lane.b32.xlu1 %v1020_v27, %s4423_s24  ;;  %v1292_v27 = vshll.u32 %v3917_v3, 16  ;;  %v1310_v30 = vrot.slane %v1308_v23, 7  ;;  %v4703_v3 = vpack.c.bf16 %v1669_v57, %v1669_v57  ;;  %v839_v17 = vrot.slane %v837_v0, 6  ;;  %v1794_v54 = vld [vmem:[#allocation2 + $0x69] ss:$2 sm:$0x7] }
 0x13e   :  { %v972_v23 = vrot.slane %v3899_v11, 5  ;;  %v860_v32 = vshll.u32 %v3893_v9, 16  ;;  %v1421_v46 = vshll.u32 %v3924_v7, 16  ;;  %v1347_v49 = vshll.u32 %v4713_v33, 16 }
 0x13f   :  { %1055 = vrot.lane.b32.xlu0 %v1052_v28, %s4421_s0  ;;  %v1275_v28 = vor.u32 %v1273_v22, %v1272_v21  ;;  %v1294_v34 = vor.u32 %v1292_v27, %v1291_v26  ;;  %v1313_v38 = vor.u32 %v1311_v31, %v1310_v30  ;;  %v1581_v21 = vld [vmem:[#allocation2 + $0x61] ss:$2 sm:$0x7]  ;;  %v1675_v24 = vshll.u32 %v4703_v3, 16 }
 0x140   :  { %v1418_v26 = vshrl.u32 %v3924_v7, 16  ;;  %v1594_v27 = vld [vmem:[#allocation2 + $0x62] ss:$2 sm:$0x7]  ;;  %v857_v30 = vshrl.u32 %v3893_v9, 16  ;;  %v973_v31 = vrot.slane %v972_v23, 4  ;;  %v3936_v37 = vpack.c.bf16 %v1581_v21, %v1581_v21 }
 0x141   :  { %1073 = vrot.lane.b32.xlu1 %v1070_v41, %s4422_s2  ;;  %v3929_v41 = vpack.c.bf16 %v1495_v36, %v1495_v36  ;;  %976 = vst.msk [vmem:[#allocation3 + $0x4] sm:$0x8] %vm899_vm4, %v972_v23  ;;  %v4736_v58 = vrot.slane %v860_v32, 7  ;;  %v1631_v62 = vld [vmem:[#allocation2 + $0x69] ss:$2 sm:$0x7]  ;;  %v4744_v9 = vpack.c.bf16 %v1794_v54, %v1794_v54 }
 0x142   :  { %v1420_v44 = vrot.slane %v1418_v26, 7  ;;  %v4733_v51 = vrot.slane %v857_v30, 6  ;;  %v1586_v56 = vrot.slane %v3936_v37, 6  ;;  %v1657_v7 = vld [vmem:[#allocation2 + $0x6b] ss:$2 sm:$0x7] }
 0x143   :  { %1091 = vrot.lane.b32.xlu0 %v1088_v47, %s4423_s24  ;;  %v1538_v47 = vrot.slane %v3932_v40, 6  ;;  %v1500_v52 = vrot.slane %v3929_v41, 6  ;;  %v1032_v40 = vld [vmem:[#allocation2 + $0x30] ss:$2 sm:$0x7]  ;;  %v4729_v41 = vrot.slane %v1675_v24, 5 }
 0x144   :  { %v1423_v61 = vor.u32 %v1421_v46, %v1420_v44  ;;  %vm591_vm2 = vcmask 256001  }
 0x145   :  { %1123 = vrot.lane.b32.xlu1 %v1120_v55, %s4421_s0  ;;  %v762_v55 = vshll.u32 %v3888_v43, 16 }
 0x147   :  { %1141 = vrot.lane.b32.xlu0 %v1138_v59, %s4422_s2  ;;  %v3895_v59 = vpack.c.bf16 %v890_v48, %v890_v48 }
 0x149   :  { %1159 = vrot.lane.b32.xlu1 %v1156_v4, %s4423_s24  ;;  %v895_v1 = vrot.slane %v3895_v59, 5  ;;  %v1514_v4 = vrot.slane %v3930_v53, 6  ;;  %v1774_v53 = vld [vmem:[#allocation2 + $0x68] ss:$2 sm:$0x7] }
 0x14a   :  { %v1431_v59 = vld [vmem:[#allocation2 + $0x5a] ss:$2 sm:$0x7] }
 0x14b   :  { %1199 = vrot.lane.b32.xlu0 %v1198_v13, %s4421_s0  ;;  %v896_v10 = vrot.slane %v895_v1, 4  ;;  %900 = vst.msk [vmem:[#allocation3] sm:$0x8] %vm899_vm4, %v895_v1  ;;  %v764_v13 = vrot.slane %v762_v55, 7  ;;  %v3903_v55 = vpack.c.bf16 %v1032_v40, %v1032_v40 }
 0x14d   :  { %1219 = vrot.lane.b32.xlu1 %v1218_v18, %s4422_s2  ;;  %v3934_v18 = vpack.c.bf16 %v1557_v6, %v1557_v6  ;;  %v905_v22 = vsel %vm4709_vm7, %v896_v10, %v904_v2  ;;  %v765_v63 = vor.u32 %v764_v13, %v761_v12  ;;  %v1037_v1 = vrot.slane %v3903_v55, 5  ;;  %v1644_v6 = vld [vmem:[#allocation2 + $0x6a] ss:$2 sm:$0x7]  ;;  %v1110_v13 = vld [vmem:[#allocation3 + $0x1c] sm:$0x1] }
 0x14e   :  { %906 = vst [vmem:[#allocation3 + $0x10] sm:$0x1] %v905_v22  ;;  %v3941_v21 = vpack.c.bf16 %v1644_v6, %v1644_v6  ;;  %v3942_v22 = vpack.c.bf16 %v1657_v7, %v1657_v7 }
 0x14f   :  { %1239 = vrot.lane.b32.xlu0 %v1238_v25, %s4423_s24  ;;  %v842_v25 = vrot.slane %v840_v5, 7  ;;  %v1562_v36 = vrot.slane %v3934_v18, 6  ;;  %1041 = vst.msk [vmem:[#allocation3 + $0x8] sm:$0x8] %vm899_vm4, %v1037_v1 }
 0x150   :  { %v1357_v18 = vld [vmem:[#allocation2 + $0x52] ss:$2 sm:$0x7]  ;;  %v1649_v40 = vrot.slane %v3941_v21, 6 }
 0x151   :  { %1276 = vrot.lane.b32.xlu1 %v1275_v28, %s4421_s0  ;;  %v1344_v28 = vshrl.u32 %v4713_v33, 16  ;;  %v843_v43 = vor.u32 %v842_v25, %v839_v17  ;;  %v4749_v17 = vpack.c.bf16 %v1431_v59, %v1431_v59 }
 0x153   :  { %1295 = vrot.lane.b32.xlu0 %v1294_v34, %s4422_s2  ;;  %v4725_v34 = vpack.c.bf16 %v773_v15, %v773_v15  ;;  %v1346_v48 = vrot.slane %v1344_v28, 7  ;;  %v3940_v15 = vpack.c.bf16 %v1631_v62, %v1631_v62  ;;  %v1963_v28 = vld [vmem:[#allocation2 + $0x78] ss:$2 sm:$0x7]  ;;  %v1440_v54 = vshll.u32 %v4749_v17, 16 }
 0x154   :  { %v4771_v46 = vpack.c.bf16 %v1963_v28, %v1963_v28  ;;  %v863_v62 = vor.u32 %v4736_v58, %v4733_v51  ;;  %v420_v58 = vld [vmem:[#allocation3] sm:$0x3]  ;;  %v4267_v51 = vld [vmem:[%s5747_s3 + $0x10] sm:$0xff]  }
 0x155   :  { %1314 = vrot.lane.b32.xlu1 %v1313_v38, %s4423_s24  ;;  %v3937_v38 = vpack.c.bf16 %v1594_v27, %v1594_v27  ;;  %v779_v0 = vshrl.u32 %v4725_v34, 16  ;;  %v1349_v10 = vor.u32 %v1347_v49, %v1346_v48  ;;  %v782_v11 = vshll.u32 %v4725_v34, 16  ;;  %v1468_v34 = vld [vmem:[#allocation2 + $0x50] ss:$2 sm:$0x7] }
 0x156   :  { %v1800_v27 = vshll.u32 %v4744_v9, 16  ;;  %v1818_v48 = vld [vmem:[#allocation2 + $0x6a] ss:$2 sm:$0x7]  ;;  %v3927_v49 = vpack.c.bf16 %v1468_v34, %v1468_v34 }
 0x157   :  { %1487 = vrot.lane.b32.xlu0 %v1486_v39, %s4421_s0  ;;  %v978_v39 = vsel %vm4709_vm7, %v973_v31, %v977_v16  ;;  %v1599_v57 = vrot.slane %v3937_v38, 6  ;;  %v1867_v16 = vld [vmem:[#allocation2 + $0x70] ss:$2 sm:$0x7]  ;;  %v4765_v37 = vrot.slane %v779_v0, 6  ;;  %v1437_v38 = vshrl.u32 %v4749_v17, 16 }
 0x158   :  { %979 = vst [vmem:[#allocation3 + $0x14] sm:$0x1] %v978_v39  ;;  %v4759_v31 = vpack.c.bf16 %v1867_v16, %v1867_v16  ;;  %v1720_v39 = vld [vmem:[#allocation2 + $0x62] ss:$2 sm:$0x7]  ;;  %v4769_v44 = vrot.slane %v782_v11, 7  ;;  %v4794_v6 = vpack.c.bf16 %v1818_v48, %v1818_v48 }
 0x159   :  { %1539 = vrot.lane.b32.xlu1 %v1538_v47, %s4421_s0  ;;  %v1607_v47 = vld [vmem:[#allocation2 + $0x63] ss:$2 sm:$0x7]  ;;  %v4785_v59 = vrot.slane %v1437_v38, 7  ;;  %v1969_v0 = vshll.u32 %v4771_v46, 16 }
 0x15a   :  { %v3938_v5 = vpack.c.bf16 %v1607_v47, %v1607_v47  ;;  %v1876_v28 = vshrl.u32 %v4759_v31, 16  ;;  %v871_v34 = vld [vmem:[#allocation2 + $0x2b] ss:$2 sm:$0x7] }
 0x15b   :  { %1501 = vrot.lane.b32.xlu0 %v1500_v52, %s4422_s2  ;;  %v1100_v52 = vld [vmem:[#allocation2 + $0x38] ss:$2 sm:$0x7]  ;;  %v1442_v7 = vor.u32 %v1440_v54, %v4785_v59 }
 0x15c   :  { %v3907_v2 = vpack.c.bf16 %v1100_v52, %v1100_v52  ;;  %v1612_v30 = vrot.slane %v3938_v5, 6  ;;  %v1478_v52 = vld [vmem:[#allocation3 + $0x10] sm:$0xc] }
 0x15d   :  { %954 = vrot.lane.b32.xlu1 %v4651_v14, %s4423_s24  ;;  %v1550_v14 = vrot.slane %v3933_v60, 6  ;;  %v1042_v60 = vld [vmem:[#allocation3 + $0x18] sm:$0x1] }
 0x15e   :  { %v1105_v12 = vrot.slane %v3907_v2, 5 }
 0x15f   :  { %1515 = vrot.lane.b32.xlu0 %v1514_v4, %s4423_s24  ;;  %v4740_v4 = vpack.c.bf16 %v1774_v53, %v1774_v53  ;;  %v1873_v53 = vshll.u32 %v4759_v31, 16 }
 0x160   :  { %v1106_v24 = vrot.slane %v1105_v12, 4  ;;  %1109 = vst.msk [vmem:[#allocation3 + $0xc] sm:$0x8] %vm899_vm4, %v1105_v12 }
 0x161   :  { %1551 = vrot.lane.b32.xlu1 %v1550_v14, %s4422_s2  ;;  %v1038_v14 = vrot.slane %v1037_v1, 4  ;;  %v1780_v25 = vshll.u32 %v4740_v4, 16  ;;  %v1620_v1 = vld [vmem:[#allocation2 + $0x68] ss:$2 sm:$0x7]  ;;  %v4808_v11 = vrot.slane %v1873_v53, 5 }
 0x162   :  { %v1111_v32 = vsel %vm4709_vm7, %v1106_v24, %v1110_v13  ;;  %v1530_v13 = vld [vmem:[#allocation3 + $0x14] sm:$0xc]  ;;  %v3939_v21 = vpack.c.bf16 %v1620_v1, %v1620_v1  ;;  %v1842_v1 = vld [vmem:[#allocation2 + $0x6b] ss:$2 sm:$0x7] }
 0x163   :  { %1021 = vrot.lane.b32.xlu0 %v4654_v19, %s4423_s24  ;;  %v1693_v19 = vld [vmem:[#allocation2 + $0x61] ss:$2 sm:$0x7]  ;;  %v1043_v23 = vsel %vm4709_vm7, %v1038_v14, %v1042_v60  ;;  %1112 = vst [vmem:[#allocation3 + $0x1c] sm:$0x1] %v1111_v32  ;;  %v4773_v47 = vrot.slane %v1780_v25, 5  ;;  %v4857_v54 = vpack.c.bf16 %v1842_v1, %v1842_v1  ;;  %vm4961_vm7 = vmand %vm591_vm2, %vm592_vm3 }
 0x164   :  { %v4742_v33 = vpack.c.bf16 %v1693_v19, %v1693_v19  ;;  %1044 = vst [vmem:[#allocation3 + $0x18] sm:$0x1] %v1043_v23  ;;  %v4777_v19 = vrot.slane %v1800_v27, 5  ;;  %v1473_v60 = vrot.slane %v3927_v49, 6  ;;  %v1783_v23 = vshrl.u32 %v4740_v4, 16 }
 0x165   :  { %766 = vrot.lane.b32.xlu1 %v765_v63, %s4421_s0  ;;  %v4761_v63 = vpack.c.bf16 %v1357_v18, %v1357_v18  ;;  %v1577_v18 = vld [vmem:[#allocation3 + $0x18] sm:$0xc]  ;;  %v4816_v25 = vrot.slane %v1969_v0, 5  ;;  %v1627_v27 = vld [vmem:[#allocation3 + $0x1c] sm:$0xc]  ;;  %vm5758_vm2 = vcmask 781827  }
 0x166   :  { %v1699_v26 = vshll.u32 %v4742_v33, 16  ;;  %v1479_v12 = vsel %vm4797_vm12, %v1473_v60, %v1478_v52  ;;  %v785_v60 = vor.u32 %v4769_v44, %v4765_v37  ;;  %v1747_v0 = vld [vmem:[#allocation2 + $0x63] ss:$2 sm:$0x7] }
 0x167   :  { %844 = vrot.lane.b32.xlu0 %v843_v43, %s4421_s0  ;;  %v1662_v43 = vrot.slane %v3942_v22, 6  ;;  %v1363_v55 = vshrl.u32 %v4761_v63, 16  ;;  %v1366_v5 = vshll.u32 %v4761_v63, 16  ;;  %1480 = vst [vmem:[#allocation3 + $0x10] sm:$0xc] %v1479_v12  ;;  %v1678_v22 = vshrl.u32 %v4703_v3, 16 }
 0x168   :  { %v4775_v8 = vrot.slane %v1699_v26, 5  ;;  %v4855_v17 = vpack.c.bf16 %v1747_v0, %v1747_v0 }
 0x169   :  { %1563 = vrot.lane.b32.xlu1 %v1562_v36, %s4423_s24  ;;  %v1636_v36 = vrot.slane %v3940_v15, 6  ;;  %v1680_v4 = vrot.slane %v1678_v22, 4  ;;  %v1365_v48 = vrot.slane %v1363_v55, 7 }
 0x16a   :  { %v4192_v2 = vpack.i.bf16 %v4777_v19, %v4775_v8 }
 0x16b   :  { %1424 = vrot.lane.b32.xlu0 %v1423_v61, %s4421_s0  ;;  %v1570_v61 = vld [vmem:[#allocation2 + $0x60] ss:$2 sm:$0x7]  ;;  %v1681_v52 = vor.u32 %v1680_v4, %v4729_v41 }
 0x16c   :  { %v3935_v15 = vpack.c.bf16 %v1570_v61, %v1570_v61  ;;  %v3894_v61 = vpack.c.bf16 %v871_v34, %v871_v34  ;;  %v4262_v34 = vld [vmem:[%s5747_s3 + $0x40] sm:$0xff]  }
 0x16d   :  { %1350 = vrot.lane.b32.xlu1 %v1349_v10, %s4421_s0  ;;  %4023 = vmatprep.subr.bf16.mxu1 %v4262_v34 }
 0x16e   :  { %v1575_v26 = vrot.slane %v3935_v15, 6  ;;  %v880_v22 = vshll.u32 %v3894_v61, 16 }
 0x16f   :  { %1587 = vrot.lane.b32.xlu0 %v1586_v56, %s4421_s0  ;;  %v4783_v56 = vpack.c.bf16 %v1720_v39, %v1720_v39  ;;  %v1824_v39 = vshll.u32 %v4794_v6, 16 }
 0x170   :  { %v1578_v31 = vsel %vm4797_vm12, %v1575_v26, %v1577_v18  ;;  %v1368_v18 = vor.u32 %v1366_v5, %v1365_v48  ;;  %v577_v26 = vld [vmem:[#allocation2 + $0x10] ss:$2 sm:$0x7] }
 0x171   :  { %1600 = vrot.lane.b32.xlu1 %v1599_v57, %s4422_s2  ;;  %v1523_v57 = vld [vmem:[#allocation2 + $0x58] ss:$2 sm:$0x7]  ;;  %v1726_v14 = vshll.u32 %v4783_v56, 16  ;;  %1579 = vst [vmem:[#allocation3 + $0x18] sm:$0xc] %v1578_v31  ;;  %v3879_v31 = vpack.c.bf16 %v577_v26, %v577_v26 }
 0x172   :  { %v3931_v10 = vpack.c.bf16 %v1523_v57, %v1523_v57  ;;  %v4847_v44 = vrot.slane %v1824_v39, 5 }
 0x173   :  { %1613 = vrot.lane.b32.xlu0 %v1612_v30, %s4423_s24  ;;  %v1972_v30 = vshrl.u32 %v4771_v46, 16  ;;  %v1878_v46 = vrot.slane %v1876_v28, 4  ;;  %v4845_v37 = vrot.slane %v1726_v14, 5 }
 0x174   :  { %v1528_v16 = vrot.slane %v3931_v10, 6 }
 0x175   :  { %1637 = vrot.lane.b32.xlu1 %v1636_v36, %s4421_s0  ;;  %v1625_v36 = vrot.slane %v3939_v21, 6  ;;  %v1974_v53 = vrot.slane %v1972_v30, 4  ;;  %v1879_v55 = vor.u32 %v1878_v46, %v4808_v11  ;;  %v877_v21 = vshrl.u32 %v3894_v61, 16  ;;  %v4264_v46 = vld [vmem:[%s5747_s3 + $0x48] sm:$0xff]  }
 0x176   :  { %v1531_v3 = vsel %vm4797_vm12, %v1528_v16, %v1530_v13  ;;  %v4197_v63 = vpack.i.bf16 %v4847_v44, %v4845_v37  ;;  %v4265_v61 = vld [vmem:[%s5747_s3 + $0x8] sm:$0xff]  }
 0x177   :  { %1650 = vrot.lane.b32.xlu0 %v1649_v40, %s4422_s2  ;;  %v793_v40 = vld [vmem:[#allocation2 + $0x23] ss:$2 sm:$0x7]  ;;  %1532 = vst [vmem:[#allocation3 + $0x14] sm:$0xc] %v1531_v3  ;;  %v1628_v49 = vsel %vm4797_vm12, %v1625_v36, %v1627_v27  ;;  %v1880_v15 = vrot.slane %v1879_v55, 4  ;;  %vm5024_vm12 = vmand %vm5756_vm9, %vm902_vm6 }
 0x178   :  { %1629 = vst [vmem:[#allocation3 + $0x1c] sm:$0xc] %v1628_v49  ;;  %v3890_v10 = vpack.c.bf16 %v793_v40, %v793_v40  ;;  %v4263_v3 = vld [vmem:[%s5747_s3] sm:$0xff]   ;;  %v879_v39 = vrot.slane %v877_v21, 6  ;;  %v882_v40 = vrot.slane %v880_v22, 7  ;;  %v4266_v55 = vld [vmem:[%s5747_s3 + $0x50] sm:$0xff]  }
 0x179   :  { %1663 = vrot.lane.b32.xlu1 %v1662_v43, %s4423_s24  ;;  %v416_v24 = vpop.permute.xlu0 %415  ;;  %v1785_v43 = vrot.slane %v1783_v23, 4  ;;  %1886 = vst.msk [vmem:[#allocation3 + $0x28] sm:$0x1] %vm901_vm5, %v1880_v15  ;;  %v466_v36 = vld [vmem:[#allocation3 + $0x4] sm:$0x3]  ;;  %4024 = vmatpush3.bf16.msra.mxu1 %v4263_v3  ;;  %vm5757_vm9 = vcmask 778752  }
 0x17a   :  { %v421_v32 = vsel %vm4804_vm13, %v416_v24, %v420_v58  ;;  %v1682_v58 = vrot.slane %v1681_v52, 4  ;;  %v1729_v24 = vshrl.u32 %v4783_v56, 16  ;;  %v799_v5 = vshrl.u32 %v3890_v10, 16  ;;  %4025 = vmatprep.subr.bf16.mxu1 %v4264_v46  ;;  %v1888_v21 = vld [vmem:[#allocation2 + $0x71] ss:$2 sm:$0x7] }
 0x17b   :  { %422 = vst [vmem:[#allocation3] sm:$0x3] %v421_v32  ;;  %v4824_v38 = vpop.permute.xlu1 %475  ;;  %4193 = vrot.lane.b32.xlu0 %v4192_v2, %s4421_s0  ;;  %v1786_v2 = vor.u32 %v1785_v43, %v4773_v47  ;;  %v802_v30 = vshll.u32 %v3890_v10, 16  ;;  %v1753_v32 = vshll.u32 %v4855_v17, 16  ;;  %v1848_v56 = vshll.u32 %v4857_v54, 16 }
 0x17c   :  { %1692 = vst.msk [vmem:[#allocation3 + $0x20] sm:$0x1] %vm901_vm5, %v1682_v58  ;;  %v1702_v43 = vshrl.u32 %v4742_v33, 16  ;;  %v1731_v49 = vrot.slane %v1729_v24, 4  ;;  %v1756_v52 = vshrl.u32 %v4855_v17, 16  ;;  %v883_v58 = vor.u32 %v882_v40, %v879_v39 }
 0x17d   :  { %864 = vrot.lane.b32.xlu1 %v863_v62, %s4422_s2  ;;  %v430_v57 = vpop.permute.xlu0 %429  ;;  %v1975_v62 = vor.u32 %v1974_v53, %v4816_v25  ;;  %v1787_v13 = vrot.slane %v1786_v2, 4  ;;  %v550_v53 = vld [vmem:[#allocation3 + $0xc] sm:$0x3]  ;;  %v804_v33 = vrot.slane %v802_v30, 7  ;;  %v4899_v1 = vrot.slane %v1753_v32, 5  ;;  %4026 = vmatpush3.bf16.msra.mxu1 %v4265_v61 }
 0x17e   :  { %v1827_v2 = vshrl.u32 %v4794_v6, 16  ;;  %v583_v6 = vshrl.u32 %v3879_v31, 16  ;;  %v1732_v17 = vor.u32 %v1731_v49, %v4845_v37  ;;  %v1803_v24 = vshrl.u32 %v4744_v9, 16  ;;  %4027 = vmatprep.subr.bf16.mxu1 %v4266_v55  ;;  %v660_v30 = vld [vmem:[#allocation2 + $0x18] ss:$2 sm:$0x7] }
 0x17f   :  { %v4842_v12 = vpop.permute.xlu1 %487  ;;  %786 = vrot.lane.b32.xlu0 %v785_v60, %s4422_s2  ;;  %v1976_v59 = vrot.slane %v1975_v62, 4  ;;  %1793 = vst.msk [vmem:[#allocation3 + $0x24] sm:$0x1] %vm901_vm5, %v1787_v13  ;;  %v801_v60 = vrot.slane %v799_v5, 6  ;;  %v4913_v62 = vrot.slane %v1848_v56, 5  ;;  %v1704_v13 = vrot.slane %v1702_v43, 4 }
 0x180   :  { %v1829_v26 = vrot.slane %v1827_v2, 4  ;;  %v1851_v32 = vshrl.u32 %v4857_v54, 16  ;;  %v1733_v34 = vrot.slane %v1732_v17, 4  ;;  %v585_v3 = vrot.slane %v583_v6, 6  ;;  %v4269_v54 = vld [vmem:[%s5747_s3 + $0x18] sm:$0xff]  }
 0x181   :  { %1443 = vrot.lane.b32.xlu1 %v1442_v7, %s4422_s2  ;;  %v4861_v14 = vpop.permute.xlu0 %443  ;;  %1982 = vst.msk [vmem:[#allocation3 + $0x2c] sm:$0x1] %vm901_vm5, %v1976_v59  ;;  %v508_v7 = vld [vmem:[#allocation3 + $0x8] sm:$0x3]  ;;  %v586_v59 = vshll.u32 %v3879_v31, 16  ;;  %v4202_v5 = vpack.i.bf16 %v4913_v62, %v4899_v1  ;;  %v1805_v43 = vrot.slane %v1803_v24, 4  ;;  %v4945_v46 = vpack.c.bf16 %v1888_v21, %v1888_v21  ;;  %4028 = vmatpush3.bf16.msra.mxu1 %v4267_v51 }
 0x182   :  { %v434_v23 = vld [vmem:[#allocation3] sm:$0x3]  ;;  %v3883_v49 = vpack.c.bf16 %v660_v30, %v660_v30  ;;  %vm613_vm5 = vcmask 518401   ;;  %v1913_v61 = vld [vmem:[#allocation2 + $0x72] ss:$2 sm:$0x7] }
 0x183   :  { %v435_v27 = vsel %vm4851_vm14, %v430_v57, %v434_v23  ;;  %v4871_v28 = vpop.permute.xlu1 %517  ;;  %1369 = vrot.lane.b32.xlu0 %v1368_v18, %s4422_s2  ;;  %v1758_v18 = vrot.slane %v1756_v52, 4  ;;  %v735_v31 = vld [vmem:[#allocation2 + $0x20] ss:$2 sm:$0x7] }
 0x184   :  { %436 = vst [vmem:[#allocation3] sm:$0x3] %v435_v27  ;;  %v1984_v27 = vld [vmem:[#allocation2 + $0x79] ss:$2 sm:$0x7]  ;;  %v4965_v55 = vpack.c.bf16 %v735_v31, %v735_v31  ;;  %v666_v16 = vshrl.u32 %v3883_v49, 16 }
 0x185   :  { %4198 = vrot.lane.b32.xlu1 %v4197_v63, %s4422_s2  ;;  %v464_v4 = vpop.permute.xlu0 %463  ;;  %v4268_v63 = vld [vmem:[%s5747_s3 + $0x58] sm:$0xff]   ;;  %v813_v52 = vld [vmem:[#allocation2 + $0x28] ss:$2 sm:$0x7] }
 0x186   :  { %v467_v48 = vsel %vm4804_vm13, %v464_v4, %v466_v36  ;;  %v588_v36 = vrot.slane %v586_v59, 7  ;;  %v1759_v4 = vor.u32 %v1758_v18, %v4899_v1  ;;  %4029 = vmatprep.subr.bf16.mxu1 %v4268_v63  ;;  %v1376_v59 = vld [vmem:[#allocation2 + $0x53] ss:$2 sm:$0x7]  ;;  %v4271_v18 = vld [vmem:[%s5747_s3 + $0x20] sm:$0xff]   ;;  %v4979_v21 = vpack.c.bf16 %v813_v52, %v813_v52 }
 0x187   :  { %468 = vst [vmem:[#allocation3 + $0x4] sm:$0x3] %v467_v48  ;;  %v548_v57 = vpop.permute.xlu1 %547  ;;  %1121 = vrot.lane.b32.xlu0 %v4671_v42, %s4421_s0  ;;  %4030 = vmatpush3.bf16.msra.mxu1 %v4269_v54  ;;  %v741_v63 = vshrl.u32 %v4965_v55, 16  ;;  %v1450_v30 = vld [vmem:[#allocation2 + $0x5b] ss:$2 sm:$0x7] }
 0x188   :  { %v551_v0 = vsel %vm4804_vm13, %v548_v57, %v550_v53  ;;  %v4270_v53 = vld [vmem:[%s5747_s3 + $0x60] sm:$0xff]   ;;  %v589_v2 = vor.u32 %v588_v36, %v585_v3  ;;  %v5003_v3 = vpack.c.bf16 %v1376_v59, %v1376_v59  ;;  %v4273_v36 = vld [vmem:[%s5747_s3 + $0x28] sm:$0xff]   ;;  %v4274_v54 = vld [vmem:[%s5747_s3 + $0x70] sm:$0xff]  }
 0x189   :  { %552 = vst [vmem:[#allocation3 + $0xc] sm:$0x3] %v551_v0  ;;  %1053 = vrot.lane.b32.xlu1 %v4656_v20, %s4421_s0  ;;  %v506_v10 = vpop.permute.xlu0 %505  ;;  %v805_v20 = vor.u32 %v804_v33, %v801_v60  ;;  %v1853_v33 = vrot.slane %v1851_v32, 4  ;;  %4031 = vmatprep.subr.bf16.mxu1 %v4270_v53  ;;  %v5030_v53 = vpack.c.bf16 %v1450_v30, %v1450_v30  ;;  %v2034_v59 = vld [vmem:[#allocation2 + $0x7b] ss:$2 sm:$0x7] }
 0x18a   :  { %v509_v15 = vsel %vm4804_vm13, %v506_v10, %v508_v7  ;;  %v1760_v7 = vrot.slane %v1759_v4, 4  ;;  %v2009_v10 = vld [vmem:[#allocation2 + $0x7a] ss:$2 sm:$0x7]  ;;  %vm5034_vm13 = vmand %vm613_vm5, %vm592_vm3  ;;  %v1385_v30 = vshll.u32 %v5003_v3, 16 }
 0x18b   :  { %v448_v22 = vld [vmem:[#allocation3] sm:$0x3]  ;;  %510 = vst [vmem:[#allocation3 + $0x8] sm:$0x3] %v509_v15  ;;  %v4918_v23 = vpop.permute.xlu1 %571  ;;  %884 = vrot.lane.b32.xlu0 %v883_v58, %s4423_s24  ;;  %v1894_v15 = vshll.u32 %v4945_v46, 16  ;;  %4032 = vmatpush3.bf16.msra.mxu1 %v4271_v18  ;;  %v4276_v18 = vld [vmem:[%s5747_s3 + $0x78] sm:$0xff]  }
 0x18c   :  { %v449_v37 = vsel %vm4907_vm0, %v4861_v14, %v448_v22  ;;  %v1705_v14 = vor.u32 %v1704_v13, %v4775_v8  ;;  %v4947_v8 = vpack.c.bf16 %v1984_v27, %v1984_v27  ;;  %v1806_v13 = vor.u32 %v1805_v43, %v4777_v19  ;;  %v4272_v19 = vld [vmem:[%s5747_s3 + $0x68] sm:$0xff]  }
 0x18d   :  { %450 = vst [vmem:[#allocation3] sm:$0x3] %v449_v37  ;;  %806 = vrot.lane.b32.xlu1 %v805_v20, %s4423_s24  ;;  %v4932_v9 = vpop.permute.xlu0 %529  ;;  %v1854_v37 = vor.u32 %v1853_v33, %v4913_v62  ;;  %v4992_v27 = vpack.c.bf16 %v2009_v10, %v2009_v10  ;;  %v819_v43 = vshrl.u32 %v4979_v21, 16  ;;  %4033 = vmatprep.subr.bf16.mxu1 %v4272_v19  ;;  %v822_v33 = vshll.u32 %v4979_v21, 16 }
 0x18e   :  { %v478_v56 = vld [vmem:[#allocation3 + $0x4] sm:$0x3]  ;;  %v1706_v60 = vrot.slane %v1705_v14, 4  ;;  %v1990_v17 = vshll.u32 %v4947_v8, 16  ;;  %v1382_v10 = vshrl.u32 %v5003_v3, 16  ;;  %v1456_v21 = vshrl.u32 %v5030_v53, 16 }
 0x18f   :  { %v479_v39 = vsel %vm4851_vm14, %v4824_v38, %v478_v56  ;;  %v4942_v40 = vpop.permute.xlu1 %631  ;;  %4203 = vrot.lane.b32.xlu0 %v4202_v5, %s4423_s24  ;;  %v1830_v38 = vor.u32 %v1829_v26, %v4847_v44  ;;  %v4990_v26 = vpack.c.bf16 %v1913_v61, %v1913_v61  ;;  %v744_v5 = vshll.u32 %v4965_v55, 16  ;;  %v1938_v61 = vld [vmem:[#allocation2 + $0x73] ss:$2 sm:$0x7]  ;;  %4034 = vmatpush3.bf16.msra.mxu1 %v4273_v36  ;;  %v994_v44 = vld [vmem:[#allocation3 + $0x14] sm:$0x1] }
 0x190   :  { %480 = vst [vmem:[#allocation3 + $0x4] sm:$0x3] %v479_v39  ;;  %v562_v48 = vld [vmem:[#allocation3 + $0xc] sm:$0x3]  ;;  %v1807_v56 = vrot.slane %v1806_v13, 4  ;;  %v5001_v62 = vrot.slane %v1990_v17, 5  ;;  %4035 = vmatprep.subr.bf16.mxu1 %v4274_v54 }
 0x191   :  { %1736 = vrot.lane.b32.xlu1 %v1733_v34, %s4422_s2  ;;  %v560_v57 = vpop.permute.xlu0 %559  ;;  %v1831_v20 = vrot.slane %v1830_v38, 4  ;;  %v4999_v34 = vrot.slane %v1894_v15, 5  ;;  %v5011_v39 = vrot.slane %v666_v16, 6  ;;  %v1919_v52 = vshll.u32 %v4990_v26, 16 }
 0x192   :  { %v520_v0 = vld [vmem:[#allocation3 + $0x8] sm:$0x3]  ;;  %v563_v1 = vsel %vm4851_vm14, %v560_v57, %v562_v48  ;;  %v2015_v38 = vshll.u32 %v4992_v27, 16  ;;  %v746_v15 = vrot.slane %v744_v5, 7  ;;  %v1384_v5 = vrot.slane %v1382_v10, 7 }
 0x193   :  { %v521_v58 = vsel %vm4851_vm14, %v4871_v28, %v520_v0  ;;  %564 = vst [vmem:[#allocation3 + $0xc] sm:$0x3] %v563_v1  ;;  %v4970_v6 = vpop.permute.xlu1 %690  ;;  %1709 = vrot.lane.b32.xlu0 %v1706_v60, %s4421_s0  ;;  %v669_v28 = vshll.u32 %v3883_v49, 16  ;;  %v1855_v49 = vrot.slane %v1854_v37, 4  ;;  %vm920_vm14 = vcmask 519427  }
 0x194   :  { %522 = vst [vmem:[#allocation3 + $0x8] sm:$0x3] %v521_v58  ;;  %v594_v22 = vld [vmem:[#allocation3] sm:$0x6]  ;;  %v4275_v58 = vld [vmem:[%s5747_s3 + $0x30] sm:$0xff]   ;;  %v5060_v42 = vrot.slane %v1919_v52, 5 }
 0x195   :  { %v595_v24 = vsel %vm4961_vm7, %v589_v2, %v594_v22  ;;  %1763 = vrot.lane.b32.xlu1 %v1760_v7, %s4423_s24  ;;  %v4987_v51 = vpop.permute.xlu0 %610  ;;  %v5013_v31 = vrot.slane %v669_v28, 7  ;;  %v924_v2 = vld [vmem:[#allocation3 + $0x10] sm:$0x1]  ;;  %v4207_v7 = vpack.i.bf16 %v5001_v62, %v4999_v34  ;;  %v821_v22 = vrot.slane %v819_v43, 6  ;;  %4036 = vmatpush3.bf16.msra.mxu1 %v4275_v58 }
 0x196   :  { %596 = vst [vmem:[#allocation3] sm:$0x6] %v595_v24  ;;  %v5068_v24 = vpack.c.bf16 %v1938_v61, %v1938_v61  ;;  %v1459_v36 = vshll.u32 %v5030_v53, 16  ;;  %4037 = vmatprep.subr.bf16.mxu1 %v4276_v18  ;;  %v1897_v43 = vshrl.u32 %v4945_v46, 16 }
 0x197   :  { %v490_v14 = vld [vmem:[#allocation3 + $0x4] sm:$0x3]  ;;  %v4996_v32 = vpop.permute.xlu1 %728  ;;  %1834 = vrot.lane.b32.xlu0 %v1831_v20, %s4422_s2  ;;  %v824_v20 = vrot.slane %v822_v33, 7  ;;  %v672_v37 = vor.u32 %v5013_v31, %v5011_v39  ;;  %v1458_v31 = vrot.slane %v1456_v21, 7  ;;  %v1993_v33 = vshrl.u32 %v4947_v8, 16 }
 0x198   :  { %v491_v4 = vsel %vm4907_vm0, %v4842_v12, %v490_v14  ;;  %v5075_v14 = vpack.c.bf16 %v2034_v59, %v2034_v59  ;;  %v2018_v59 = vshrl.u32 %v4992_v27, 16 }
 0x199   :  { %492 = vst [vmem:[#allocation3 + $0x4] sm:$0x3] %v491_v4  ;;  %1810 = vrot.lane.b32.xlu1 %v1807_v56, %s4421_s0  ;;  %v5020_v48 = vpop.permute.xlu0 %652  ;;  %v825_v54 = vor.u32 %v824_v20, %v821_v22 }
 0x19a   :  { %v574_v57 = vld [vmem:[#allocation3 + $0xc] sm:$0x3] }
 0x19b   :  { %v532_v0 = vld [vmem:[#allocation3 + $0x8] sm:$0x3]  ;;  %v575_v1 = vsel %vm4907_vm0, %v4918_v23, %v574_v57  ;;  %v917_v55 = vpop.permute.xlu1 %916  ;;  %1858 = vrot.lane.b32.xlu0 %v1855_v49, %s4423_s24  ;;  %v743_v23 = vrot.slane %v741_v63, 6  ;;  %v1944_v49 = vshll.u32 %v5068_v24, 16  ;;  %v1387_v57 = vor.u32 %v1385_v30, %v1384_v5 }
 0x19c   :  { %v533_v13 = vsel %vm4907_vm0, %v4932_v9, %v532_v0  ;;  %576 = vst [vmem:[#allocation3 + $0xc] sm:$0x3] %v575_v1  ;;  %v925_v17 = vsel %vm5024_vm12, %v917_v55, %v924_v2  ;;  %v5062_v9 = vrot.slane %v2015_v38, 5  ;;  %vm634_vm0 = vcmask 780801  }
 0x19d   :  { %534 = vst [vmem:[#allocation3 + $0x8] sm:$0x3] %v533_v13  ;;  %v615_v16 = vld [vmem:[#allocation3] sm:$0x6]  ;;  %926 = vst [vmem:[#allocation3 + $0x10] sm:$0x1] %v925_v17  ;;  %4208 = vrot.lane.b32.xlu1 %v4207_v7, %s4421_s0  ;;  %v5058_v28 = vpop.permute.xlu0 %709  ;;  %v747_v52 = vor.u32 %v746_v15, %v743_v23  ;;  %v1461_v2 = vor.u32 %v1459_v36, %v1458_v31 }
 0x19e   :  { %v616_v19 = vsel %vm5034_vm13, %v4987_v51, %v615_v16  ;;  %v4277_v51 = vld [vmem:[%s5747_s3 + $0x38] sm:$0xff]   ;;  %v4212_v39 = vpack.i.bf16 %v5062_v9, %v5060_v42  ;;  %vm5101_vm5 = vmand %vm634_vm0, %vm592_vm3  ;;  %v1899_v55 = vrot.slane %v1897_v43, 4  ;;  %v1922_v7 = vshrl.u32 %v4990_v26, 16  ;;  %v1168_v30 = vld [vmem:[#allocation2 + $0x40] ss:$2 sm:$0x7] }
 0x19f   :  { %617 = vst [vmem:[#allocation3] sm:$0x6] %v616_v19  ;;  %v988_v63 = vpop.permute.xlu1 %987  ;;  %1139 = vrot.lane.b32.xlu0 %v4673_v45, %s4422_s2  ;;  %v4281_v45 = vld [vmem:[%s5747_s3 + $0xc0] sm:$0xff]   ;;  %4038 = vmatpush3.bf16.msra.mxu1 %v4277_v51  ;;  %v5111_v58 = vrot.slane %v1944_v49, 5  ;;  %v1995_v17 = vrot.slane %v1993_v33, 4  ;;  %v1947_v19 = vshrl.u32 %v5068_v24, 16 }
 0x1a0   :  { %v674_v56 = vld [vmem:[#allocation3 + $0x4] sm:$0x6]  ;;  %993 = vst.msk [vmem:[#allocation3 + $0x4] sm:$0x8] %vm920_vm14, %v988_v63  ;;  %4051 = vmatprep.subr.bf16.mxu1 %v4281_v45  ;;  %v1900_v22 = vor.u32 %v1899_v55, %v4999_v34  ;;  %v1924_v20 = vrot.slane %v1922_v7, 4  ;;  %vm655_vm0 = vcmask 1043201   ;;  %v3911_v45 = vpack.c.bf16 %v1168_v30, %v1168_v30 }
 0x1a1   :  { %v675_v3 = vsel %vm4961_vm7, %v672_v37, %v674_v56  ;;  %1071 = vrot.lane.b32.xlu1 %v4664_v29, %s4422_s2  ;;  %v915_v4 = vpop.permute.xlu0 %914  ;;  %v2040_v29 = vshll.u32 %v5075_v14, 16  ;;  %v1996_v34 = vor.u32 %v1995_v17, %v5001_v62  ;;  %v2020_v24 = vrot.slane %v2018_v59, 4  ;;  %v1060_v49 = vld [vmem:[#allocation3 + $0x18] sm:$0x1] }
 0x1a2   :  { %676 = vst [vmem:[#allocation3 + $0x4] sm:$0x6] %v675_v3  ;;  %921 = vst.msk [vmem:[#allocation3] sm:$0x8] %vm920_vm14, %v915_v4  ;;  %v2043_v5 = vshrl.u32 %v5075_v14, 16  ;;  %v1901_v56 = vrot.slane %v1900_v22, 4 }
 0x1a3   :  { %v827_v38 = vld [vmem:[#allocation3 + $0xc] sm:$0x6]  ;;  %v1005_v53 = vpop.permute.xlu1 %1004  ;;  %4213 = vrot.lane.b32.xlu0 %v4212_v39, %s4422_s2  ;;  %v5123_v26 = vrot.slane %v2040_v29, 5  ;;  %v1949_v36 = vrot.slane %v1947_v19, 4  ;;  %v1997_v14 = vrot.slane %v1996_v34, 4  ;;  %v2021_v4 = vor.u32 %v2020_v24, %v5062_v9 }
 0x1a4   :  { %v749_v61 = vld [vmem:[#allocation3 + $0x8] sm:$0x6]  ;;  %v828_v46 = vsel %vm4961_vm7, %v825_v54, %v827_v38  ;;  %1010 = vst.msk [vmem:[#allocation3 + $0x4] sm:$0x8] %vm5758_vm2, %v1005_v53  ;;  %v944_v16 = vld [vmem:[#allocation3 + $0x10] sm:$0x1] }
 0x1a5   :  { %v750_v1 = vsel %vm4961_vm7, %v747_v52, %v749_v61  ;;  %829 = vst [vmem:[#allocation3 + $0xc] sm:$0x6] %v828_v46  ;;  %1388 = vrot.lane.b32.xlu1 %v1387_v57, %s4423_s24  ;;  %v935_v8 = vpop.permute.xlu0 %934  ;;  %vm5119_vm7 = vmand %vm5757_vm9, %vm902_vm6  ;;  %v2045_v39 = vrot.slane %v2043_v5, 4  ;;  %v1950_v38 = vor.u32 %v1949_v36, %v5111_v58  ;;  %v1247_v53 = vld [vmem:[#allocation2 + $0x48] ss:$2 sm:$0x7] }
 0x1a6   :  { %751 = vst [vmem:[#allocation3 + $0x8] sm:$0x6] %v750_v1  ;;  %v636_v10 = vld [vmem:[#allocation3] sm:$0x6]  ;;  %941 = vst.msk [vmem:[#allocation3] sm:$0x8] %vm5758_vm2, %v935_v8 }
 0x1a7   :  { %v637_v13 = vsel %vm5101_vm5, %v4942_v40, %v636_v10  ;;  %v990_v23 = vpop.permute.xlu1 %989  ;;  %1462 = vrot.lane.b32.xlu0 %v1461_v2, %s4423_s24  ;;  %vm5144_vm9 = vmand %vm655_vm0, %vm592_vm3  ;;  %vm962_vm2 = vcmask 1041152   ;;  %v1174_v33 = vshrl.u32 %v3911_v45, 16  ;;  %v2022_v8 = vrot.slane %v2021_v4, 4 }
 0x1a8   :  { %638 = vst [vmem:[#allocation3] sm:$0x6] %v637_v13  ;;  %v995_v18 = vsel %vm5024_vm12, %v990_v23, %v994_v44  ;;  %vm5157_vm3 = vmand %vm962_vm2, %vm902_vm6  ;;  %v2046_v2 = vor.u32 %v2045_v39, %v5123_v26  ;;  %v1951_v7 = vrot.slane %v1950_v38, 4  ;;  %v3915_v10 = vpack.c.bf16 %v1247_v53, %v1247_v53 }
 0x1a9   :  { %v693_v40 = vld [vmem:[#allocation3 + $0x4] sm:$0x6]  ;;  %996 = vst [vmem:[#allocation3 + $0x14] sm:$0x1] %v995_v18  ;;  %1157 = vrot.lane.b32.xlu1 %v4677_v50, %s4423_s24  ;;  %v937_v21 = vpop.permute.xlu0 %936  ;;  %v4217_v50 = vpack.i.bf16 %v5123_v26, %v5111_v58  ;;  %v1176_v58 = vrot.slane %v1174_v33, 7  ;;  %v1177_v13 = vshll.u32 %v3911_v45, 16 }
 0x1aa   :  { %v694_v27 = vsel %vm5034_vm13, %v4970_v6, %v693_v40  ;;  %v945_v37 = vsel %vm5119_vm7, %v937_v21, %v944_v16  ;;  %vm1181_vm6 = vsmask.f32 7938  ;;  %v2047_v23 = vrot.slane %v2046_v2, 4  ;;  %v1492_v33 = vld [vmem:[#allocation3 + $0x10] sm:$0xc] }
 0x1ab   :  { %695 = vst [vmem:[#allocation3 + $0x4] sm:$0x6] %v694_v27  ;;  %946 = vst [vmem:[#allocation3 + $0x10] sm:$0x1] %v945_v37  ;;  %v1007_v63 = vpop.permute.xlu1 %1006  ;;  %1089 = vrot.lane.b32.xlu0 %v4667_v35, %s4423_s24  ;;  %v1925_v35 = vor.u32 %v1924_v20, %v5060_v42  ;;  %v1253_v40 = vshrl.u32 %v3915_v10, 16  ;;  %v1179_v22 = vor.u32 %v1177_v13, %v1176_v58  ;;  %v1256_v24 = vshll.u32 %v3915_v10, 16 }
 0x1ac   :  { %vm5181_vm0 = vmand %vm403_vm1, %vm1181_vm6 }
 0x1ad   :  { %4218 = vrot.lane.b32.xlu1 %v4217_v50, %s4423_s24  ;;  %v957_v51 = vpop.permute.xlu0 %956  ;;  %v1926_v52 = vrot.slane %v1925_v35, 4  ;;  %v1321_v50 = vld [vmem:[#allocation2 + $0x50] ss:$2 sm:$0x7]  ;;  %v1255_v34 = vrot.slane %v1253_v40, 7  ;;  %vm5200_vm1 = vmand %vm418_vm8, %vm1181_vm6 }
 0x1ae   :  { %v3919_v30 = vpack.c.bf16 %v1321_v50, %v1321_v50 }
 0x1af   :  { %v657_v3 = vld [vmem:[#allocation3] sm:$0x6]  ;;  %v1024_v62 = vpop.permute.xlu1 %1023  ;;  %1904 = vrot.lane.b32.xlu0 %v1901_v56, %s4421_s0  ;;  %v1258_v36 = vor.u32 %v1256_v24, %v1255_v34 }
 0x1b0   :  { %v658_v31 = vsel %vm5144_vm9, %v5020_v48, %v657_v3  ;;  %v1011_v43 = vld [vmem:[#allocation3 + $0x14] sm:$0x1]  ;;  %v1327_v39 = vshrl.u32 %v3919_v30, 16  ;;  %v1330_v38 = vshll.u32 %v3919_v30, 16 }
 0x1b1   :  { %659 = vst [vmem:[#allocation3] sm:$0x6] %v658_v31  ;;  %v1012_v42 = vsel %vm5119_vm7, %v1007_v63, %v1011_v43  ;;  %2000 = vrot.lane.b32.xlu1 %v1997_v14, %s4421_s0  ;;  %v1056_v9 = vpop.permute.xlu0 %1055 }
 0x1b2   :  { %v712_v48 = vld [vmem:[#allocation3 + $0x4] sm:$0x6]  ;;  %1013 = vst [vmem:[#allocation3 + $0x14] sm:$0x1] %v1012_v42  ;;  %v964_v57 = vld [vmem:[#allocation3 + $0x10] sm:$0x1]  ;;  %v1061_v29 = vsel %vm5024_vm12, %v1056_v9, %v1060_v49 }
 0x1b3   :  { %v713_v61 = vsel %vm5101_vm5, %v5058_v28, %v712_v48  ;;  %v965_v46 = vsel %vm5157_vm3, %v957_v51, %v964_v57  ;;  %1062 = vst [vmem:[#allocation3 + $0x18] sm:$0x1] %v1061_v29  ;;  %v1074_v1 = vpop.permute.xlu1 %1073  ;;  %1929 = vrot.lane.b32.xlu0 %v1926_v52, %s4422_s2  ;;  %v1128_v28 = vld [vmem:[#allocation3 + $0x1c] sm:$0x1]  ;;  %v1329_v52 = vrot.slane %v1327_v39, 7 }
 0x1b4   :  { %714 = vst [vmem:[#allocation3 + $0x4] sm:$0x6] %v713_v61  ;;  %966 = vst [vmem:[#allocation3 + $0x10] sm:$0x1] %v965_v46 }
 0x1b5   :  { %2025 = vrot.lane.b32.xlu1 %v2022_v8, %s4422_s2  ;;  %v1092_v55 = vpop.permute.xlu0 %1091  ;;  %v1332_v8 = vor.u32 %v1330_v38, %v1329_v52 }
 0x1b7   :  { %v1124_v44 = vpop.permute.xlu1 %1123  ;;  %1954 = vrot.lane.b32.xlu0 %v1951_v7, %s4423_s24  ;;  %v1542_v7 = vld [vmem:[#allocation3 + $0x14] sm:$0xc] }
 0x1b8   :  { %v1129_v17 = vsel %vm5024_vm12, %v1124_v44, %v1128_v28  ;;  %vm1490_vm12 = vcmask 519426  }
 0x1b9   :  { %v1028_v59 = vld [vmem:[#allocation3 + $0x14] sm:$0x1]  ;;  %1130 = vst [vmem:[#allocation3 + $0x1c] sm:$0x1] %v1129_v17  ;;  %2050 = vrot.lane.b32.xlu1 %v2047_v23, %s4423_s24  ;;  %v1142_v26 = vpop.permute.xlu0 %1141  ;;  %vm5213_vm8 = vmand %vm1490_vm12, %vm1476_vm11 }
 0x1ba   :  { %v1029_v16 = vsel %vm5157_vm3, %v1024_v62, %v1028_v59  ;;  %v1078_v21 = vld [vmem:[#allocation3 + $0x18] sm:$0x1] }
 0x1bb   :  { %v731_v20 = vld [vmem:[#allocation3 + $0x4] sm:$0x6]  ;;  %1030 = vst [vmem:[#allocation3 + $0x14] sm:$0x1] %v1029_v16  ;;  %v1079_v12 = vsel %vm5119_vm7, %v1074_v1, %v1078_v21  ;;  %v1160_v19 = vpop.permute.xlu1 %1159  ;;  %v1183_v27 = vld [vmem:[#allocation3 + $0x10] sm:$0x3] }
 0x1bc   :  { %v732_v37 = vsel %vm5144_vm9, %v4996_v32, %v731_v20  ;;  %1080 = vst [vmem:[#allocation3 + $0x18] sm:$0x1] %v1079_v12  ;;  %v1184_v63 = vsel %vm5181_vm0, %v1179_v22, %v1183_v27  ;;  %v1395_v62 = vld [vmem:[#allocation2 + $0x58] ss:$2 sm:$0x7] }
 0x1bd   :  { %733 = vst [vmem:[#allocation3 + $0x4] sm:$0x6] %v732_v37  ;;  %1185 = vst [vmem:[#allocation3 + $0x10] sm:$0x3] %v1184_v63  ;;  %v1200_v5 = vpop.permute.xlu0 %1199  ;;  %v3923_v42 = vpack.c.bf16 %v1395_v62, %v1395_v62  ;;  %v847_v62 = vld [vmem:[#allocation3 + $0xc] sm:$0x6] }
 0x1be   :  { %v4293_v63 = vld [vmem:[%s5747_s3 + $0xe8] sm:$0xff]  }
 0x1bf   :  { %v1220_v51 = vpop.permute.xlu1 %1219  ;;  %v1401_v29 = vshrl.u32 %v3923_v42, 16  ;;  %v1404_v13 = vshll.u32 %v3923_v42, 16 }
 0x1c0   :  { %v1146_v56 = vld [vmem:[#allocation3 + $0x1c] sm:$0x1] }
 0x1c1   :  { %v1147_v35 = vsel %vm5119_vm7, %v1142_v26, %v1146_v56  ;;  %v5196_v45 = vpop.permute.xlu0 %1239  ;;  %vm5223_vm7 = vmand %vm432_vm10, %vm1181_vm6  ;;  %v1403_v23 = vrot.slane %v1401_v29, 7  ;;  %vm1504_vm10 = vcmask 781826  }
 0x1c2   :  { %1148 = vst [vmem:[#allocation3 + $0x1c] sm:$0x1] %v1147_v35  ;;  %v1260_v3 = vld [vmem:[#allocation3 + $0x14] sm:$0x3]  ;;  %vm5236_vm12 = vmand %vm1504_vm10, %vm1476_vm11  ;;  %v769_v35 = vld [vmem:[#allocation3 + $0x8] sm:$0x6] }
 0x1c3   :  { %v1096_v14 = vld [vmem:[#allocation3 + $0x18] sm:$0x1]  ;;  %v1261_v4 = vsel %vm5181_vm0, %v1258_v36, %v1260_v3  ;;  %v1277_v31 = vpop.permute.xlu1 %1276  ;;  %v1406_v21 = vor.u32 %v1404_v13, %v1403_v23  ;;  %vm5247_vm10 = vmand %vm446_vm15, %vm1181_vm6 }
 0x1c4   :  { %v1097_v15 = vsel %vm5157_vm3, %v1092_v55, %v1096_v14  ;;  %v1203_v43 = vld [vmem:[#allocation3 + $0x10] sm:$0x3]  ;;  %1262 = vst [vmem:[#allocation3 + $0x14] sm:$0x3] %v1261_v4 }
 0x1c5   :  { %1098 = vst [vmem:[#allocation3 + $0x18] sm:$0x1] %v1097_v15  ;;  %v1204_v49 = vsel %vm5200_vm1, %v1200_v5, %v1203_v43  ;;  %v1296_v9 = vpop.permute.xlu0 %1295 }
 0x1c6   :  { %1205 = vst [vmem:[#allocation3 + $0x10] sm:$0x3] %v1204_v49 }
 0x1c7   :  { %v5210_v53 = vpop.permute.xlu1 %1314 }
 0x1c9   :  { %v1164_v57 = vld [vmem:[#allocation3 + $0x1c] sm:$0x1]  ;;  %v1488_v61 = vpop.permute.xlu0 %1487 }
 0x1ca   :  { %v1165_v46 = vsel %vm5157_vm3, %v1160_v19, %v1164_v57  ;;  %v1493_v1 = vsel %vm5213_vm8, %v1488_v61, %v1492_v33  ;;  %vm960_vm3 = vcmask 1044227   ;;  %v1590_v33 = vld [vmem:[#allocation3 + $0x18] sm:$0xc] }
 0x1cb   :  { %1166 = vst [vmem:[#allocation3 + $0x1c] sm:$0x1] %v1165_v46  ;;  %v1279_v55 = vld [vmem:[#allocation3 + $0x14] sm:$0x3]  ;;  %1494 = vst [vmem:[#allocation3 + $0x10] sm:$0xc] %v1493_v1  ;;  %v1540_v10 = vpop.permute.xlu1 %1539 }
 0x1cc   :  { %v1334_v58 = vld [vmem:[#allocation3 + $0x18] sm:$0x3]  ;;  %v1280_v54 = vsel %vm5200_vm1, %v1277_v31, %v1279_v55  ;;  %v1543_v28 = vsel %vm5213_vm8, %v1540_v10, %v1542_v7  ;;  %v1640_v10 = vld [vmem:[#allocation3 + $0x1c] sm:$0xc] }
 0x1cd   :  { %v1335_v44 = vsel %vm5181_vm0, %v1332_v8, %v1334_v58  ;;  %v1223_v17 = vld [vmem:[#allocation3 + $0x10] sm:$0x3]  ;;  %1281 = vst [vmem:[#allocation3 + $0x14] sm:$0x3] %v1280_v54  ;;  %1544 = vst [vmem:[#allocation3 + $0x14] sm:$0xc] %v1543_v28  ;;  %v1502_v59 = vpop.permute.xlu0 %1501 }
 0x1ce   :  { %1336 = vst [vmem:[#allocation3 + $0x18] sm:$0x3] %v1335_v44  ;;  %v1224_v26 = vsel %vm5223_vm7, %v1220_v51, %v1223_v17 }
 0x1cf   :  { %1225 = vst [vmem:[#allocation3 + $0x10] sm:$0x3] %v1224_v26  ;;  %v955_v40 = vpop.permute.xlu1 %954 }
 0x1d0   :  { %961 = vst.msk [vmem:[#allocation3] sm:$0x8] %vm960_vm3, %v955_v40 }
 0x1d1   :  { %v1516_v22 = vpop.permute.xlu0 %1515 }
 0x1d2   :  { %v1408_v20 = vld [vmem:[#allocation3 + $0x1c] sm:$0x3]  ;;  %v1506_v12 = vld [vmem:[#allocation3 + $0x10] sm:$0xc] }
 0x1d3   :  { %v1409_v19 = vsel %vm5181_vm0, %v1406_v21, %v1408_v20  ;;  %v1507_v27 = vsel %vm5236_vm12, %v1502_v59, %v1506_v12  ;;  %v1552_v37 = vpop.permute.xlu1 %1551  ;;  %vm1518_vm0 = vcmask 1044226  }
 0x1d4   :  { %1410 = vst [vmem:[#allocation3 + $0x1c] sm:$0x3] %v1409_v19  ;;  %v1298_v50 = vld [vmem:[#allocation3 + $0x14] sm:$0x3]  ;;  %1508 = vst [vmem:[#allocation3 + $0x10] sm:$0xc] %v1507_v27 }
 0x1d5   :  { %v1554_v34 = vld [vmem:[#allocation3 + $0x14] sm:$0xc]  ;;  %v1299_v24 = vsel %vm5223_vm7, %v1296_v9, %v1298_v50  ;;  %v1022_v5 = vpop.permute.xlu0 %1021  ;;  %vm5262_vm15 = vmand %vm1518_vm0, %vm1476_vm11  ;;  %v1353_v57 = vld [vmem:[#allocation3 + $0x18] sm:$0x3]  ;;  %vm1686_vm11 = vsmask.f32 7950 }
 0x1d6   :  { %v1555_v18 = vsel %vm5236_vm12, %v1552_v37, %v1554_v34  ;;  %v1243_v30 = vld [vmem:[#allocation3 + $0x10] sm:$0x3]  ;;  %1300 = vst [vmem:[#allocation3 + $0x14] sm:$0x3] %v1299_v24  ;;  %1027 = vst.msk [vmem:[#allocation3 + $0x4] sm:$0x8] %vm960_vm3, %v1022_v5 }
 0x1d7   :  { %1556 = vst [vmem:[#allocation3 + $0x14] sm:$0xc] %v1555_v18  ;;  %v1244_v51 = vsel %vm5247_vm10, %v5196_v45, %v1243_v30  ;;  %v767_v56 = vpop.permute.xlu1 %766 }
 0x1d8   :  { %1245 = vst [vmem:[#allocation3 + $0x10] sm:$0x3] %v1244_v51  ;;  %v770_v36 = vsel %vm5034_vm13, %v767_v56, %v769_v35 }
 0x1d9   :  { %771 = vst [vmem:[#allocation3 + $0x8] sm:$0x6] %v770_v36  ;;  %v845_v14 = vpop.permute.xlu0 %844 }
 0x1da   :  { %v848_v4 = vsel %vm5034_vm13, %v845_v14, %v847_v62  ;;  %vm5283_vm13 = vmand %vm899_vm4, %vm1686_vm11 }
 0x1db   :  { %v1520_v39 = vld [vmem:[#allocation3 + $0x10] sm:$0xc]  ;;  %849 = vst [vmem:[#allocation3 + $0xc] sm:$0x6] %v848_v4  ;;  %v1564_v45 = vpop.permute.xlu1 %1563  ;;  %v1427_v15 = vld [vmem:[#allocation3 + $0x1c] sm:$0x3]  ;;  %vm5299_vm4 = vmand %vm920_vm14, %vm1686_vm11 }
 0x1dc   :  { %v1521_v31 = vsel %vm5262_vm15, %v1516_v22, %v1520_v39 }
 0x1dd   :  { %v1317_v43 = vld [vmem:[#allocation3 + $0x14] sm:$0x3]  ;;  %1522 = vst [vmem:[#allocation3 + $0x10] sm:$0xc] %v1521_v31  ;;  %v1425_v49 = vpop.permute.xlu0 %1424 }
 0x1de   :  { %v1566_v42 = vld [vmem:[#allocation3 + $0x14] sm:$0xc]  ;;  %v1318_v9 = vsel %vm5247_vm10, %v5210_v53, %v1317_v43  ;;  %v1428_v60 = vsel %vm5200_vm1, %v1425_v49, %v1427_v15 }
 0x1df   :  { %v1567_v52 = vsel %vm5262_vm15, %v1564_v45, %v1566_v42  ;;  %1319 = vst [vmem:[#allocation3 + $0x14] sm:$0x3] %v1318_v9  ;;  %1429 = vst [vmem:[#allocation3 + $0x1c] sm:$0x3] %v1428_v60  ;;  %v1351_v38 = vpop.permute.xlu1 %1350 }
 0x1e0   :  { %1568 = vst [vmem:[#allocation3 + $0x14] sm:$0xc] %v1567_v52  ;;  %v1354_v29 = vsel %vm5200_vm1, %v1351_v38, %v1353_v57  ;;  %v789_v50 = vld [vmem:[#allocation3 + $0x8] sm:$0x6]  ;;  %vm5809_vm1 = vcmask 778752  }
 0x1e1   :  { %1355 = vst [vmem:[#allocation3 + $0x18] sm:$0x3] %v1354_v29  ;;  %v1588_v61 = vpop.permute.xlu0 %1587 }
 0x1e2   :  { %v1591_v53 = vsel %vm5213_vm8, %v1588_v61, %v1590_v33  ;;  %v867_v22 = vld [vmem:[#allocation3 + $0xc] sm:$0x6]  ;;  %v4298_v61 = vld [vmem:[%s5747_s3 + $0xb8] sm:$0xff]  }
 0x1e3   :  { %1592 = vst [vmem:[#allocation3 + $0x18] sm:$0xc] %v1591_v53  ;;  %v1601_v1 = vpop.permute.xlu1 %1600 }
 0x1e4   :  { %v1688_v8 = vld [vmem:[#allocation3 + $0x10] sm:$0x8] }
 0x1e5   :  { %v1614_v55 = vpop.permute.xlu0 %1613  ;;  %v1689_v32 = vsel %vm5283_vm13, %v4729_v41, %v1688_v8  ;;  %v4289_v41 = vld [vmem:[%s5747_s3 + $0xd8] sm:$0xff]  }
 0x1e6   :  { %1690 = vst [vmem:[#allocation3 + $0x10] sm:$0x8] %v1689_v32  ;;  %v1446_v30 = vld [vmem:[#allocation3 + $0x1c] sm:$0x3] }
 0x1e7   :  { %v1790_v7 = vld [vmem:[#allocation3 + $0x14] sm:$0x8]  ;;  %v1638_v58 = vpop.permute.xlu1 %1637 }
 0x1e8   :  { %v1791_v13 = vsel %vm5283_vm13, %v4773_v47, %v1790_v7  ;;  %v1641_v54 = vsel %vm5213_vm8, %v1638_v58, %v1640_v10  ;;  %v1372_v56 = vld [vmem:[#allocation3 + $0x18] sm:$0x3] }
 0x1e9   :  { %1792 = vst [vmem:[#allocation3 + $0x14] sm:$0x8] %v1791_v13  ;;  %1642 = vst [vmem:[#allocation3 + $0x1c] sm:$0xc] %v1641_v54  ;;  %v1651_v28 = vpop.permute.xlu0 %1650 }
 0x1ea   :  { %v1603_v44 = vld [vmem:[#allocation3 + $0x18] sm:$0xc] }
 0x1eb   :  { %v1604_v23 = vsel %vm5236_vm12, %v1601_v1, %v1603_v44  ;;  %v1664_v17 = vpop.permute.xlu1 %1663 }
 0x1ec   :  { %1605 = vst [vmem:[#allocation3 + $0x18] sm:$0xc] %v1604_v23 }
 0x1ed   :  { %v4194_v59 = vpop.permute.xlu0 %4193  ;;  %v1715_v48 = vld [vmem:[#allocation3 + $0x10] sm:$0x8] }
 0x1ee   :  { %v4196_v47 = vunpack.i.h.bf16 %v4194_v59  ;;  %v4195_v26 = vunpack.i.l.bf16 %v4194_v59  ;;  %v4283_v59 = vld [vmem:[%s5747_s3 + $0xc8] sm:$0xff]  }
 0x1ef   :  { %v865_v21 = vpop.permute.xlu1 %864 }
 0x1f0   :  { %v1814_v40 = vld [vmem:[#allocation3 + $0x14] sm:$0x8]  ;;  %v1653_v20 = vld [vmem:[#allocation3 + $0x1c] sm:$0xc]  ;;  %v1716_v19 = vsel %vm5299_vm4, %v4195_v26, %v1715_v48  ;;  %v868_v27 = vsel %vm5101_vm5, %v865_v21, %v867_v22 }
 0x1f1   :  { %v1815_v12 = vsel %vm5299_vm4, %v4196_v47, %v1814_v40  ;;  %v1654_v37 = vsel %vm5236_vm12, %v1651_v28, %v1653_v20  ;;  %1717 = vst [vmem:[#allocation3 + $0x10] sm:$0x8] %v1716_v19  ;;  %869 = vst [vmem:[#allocation3 + $0xc] sm:$0x6] %v868_v27  ;;  %v787_v34 = vpop.permute.xlu0 %786  ;;  %v4282_v28 = vld [vmem:[%s5747_s3 + $0x80] sm:$0xff]   ;;  %v4284_v40 = vld [vmem:[%s5747_s3 + $0x88] sm:$0xff]  }
 0x1f2   :  { %1816 = vst [vmem:[#allocation3 + $0x14] sm:$0x8] %v1815_v12  ;;  %1655 = vst [vmem:[#allocation3 + $0x1c] sm:$0xc] %v1654_v37  ;;  %v790_v24 = vsel %vm5101_vm5, %v787_v34, %v789_v50  ;;  %vm5803_vm5 = vcmask 781827   ;;  %v4286_v12 = vld [vmem:[%s5747_s3 + $0xd0] sm:$0xff]  }
 0x1f3   :  { %v1616_v18 = vld [vmem:[#allocation3 + $0x18] sm:$0xc]  ;;  %791 = vst [vmem:[#allocation3 + $0x8] sm:$0x6] %v790_v24  ;;  %v1444_v5 = vpop.permute.xlu1 %1443  ;;  %vm5321_vm6 = vmand %vm5803_vm5, %vm1686_vm11  ;;  %v4288_v50 = vld [vmem:[%s5747_s3 + $0x90] sm:$0xff]  }
 0x1f4   :  { %v1617_v51 = vsel %vm5262_vm15, %v1614_v55, %v1616_v18  ;;  %v1447_v16 = vsel %vm5223_vm7, %v1444_v5, %v1446_v30  ;;  %vm5812_vm12 = vmmov %vm5803_vm5 }
 0x1f5   :  { %1618 = vst [vmem:[#allocation3 + $0x18] sm:$0xc] %v1617_v51  ;;  %1448 = vst [vmem:[#allocation3 + $0x1c] sm:$0x3] %v1447_v16  ;;  %v1370_v35 = vpop.permute.xlu0 %1369 }
 0x1f6   :  { %v1373_v36 = vsel %vm5223_vm7, %v1370_v35, %v1372_v56  ;;  %vm5811_vm7 = vmmov %vm5809_vm1  ;;  %v4290_v56 = vld [vmem:[%s5747_s3 + $0x98] sm:$0xff]  }
 0x1f7   :  { %1374 = vst [vmem:[#allocation3 + $0x18] sm:$0x3] %v1373_v36  ;;  %v4199_v62 = vpop.permute.xlu1 %4198  ;;  %vm5813_vm0 = vmmov %vm5803_vm5  ;;  %vm2490_vm5 = vcmask 1040896  }
 0x1f8   :  { %v4201_v14 = vunpack.i.h.bf16 %v4199_v62  ;;  %v4200_v4 = vunpack.i.l.bf16 %v4199_v62  ;;  %v1742_v39 = vld [vmem:[#allocation3 + $0x10] sm:$0x8]  ;;  %v887_v52 = vld [vmem:[#allocation3 + $0xc] sm:$0x6] }
 0x1f9   :  { %v1838_v45 = vld [vmem:[#allocation3 + $0x14] sm:$0x8]  ;;  %v1666_v31 = vld [vmem:[#allocation3 + $0x1c] sm:$0xc]  ;;  %v1122_v15 = vpop.permute.xlu0 %1121 }
 0x1fa   :  { %v1667_v43 = vsel %vm5262_vm15, %v1664_v17, %v1666_v31  ;;  %v1743_v2 = vsel %vm5321_vm6, %v4200_v4, %v1742_v39  ;;  %v1839_v42 = vsel %vm5321_vm6, %v4201_v14, %v1838_v45  ;;  %1127 = vst.msk [vmem:[#allocation3 + $0xc] sm:$0x8] %vm920_vm14, %v1122_v15  ;;  %v809_v29 = vld [vmem:[#allocation3 + $0x8] sm:$0x6]  ;;  %v4291_v4 = vld [vmem:[%s5747_s3 + $0xe0] sm:$0xff]   ;;  %vm5816_vm15 = vmmov %vm5809_vm1 }
 0x1fb   :  { %1668 = vst [vmem:[#allocation3 + $0x1c] sm:$0xc] %v1667_v43  ;;  %1744 = vst [vmem:[#allocation3 + $0x10] sm:$0x8] %v1743_v2  ;;  %v1054_v49 = vpop.permute.xlu1 %1053 }
 0x1fc   :  { %1840 = vst [vmem:[#allocation3 + $0x14] sm:$0x8] %v1839_v42  ;;  %v1883_v9 = vld [vmem:[#allocation3 + $0x18] sm:$0x8]  ;;  %1059 = vst.msk [vmem:[#allocation3 + $0x8] sm:$0x8] %vm920_vm14, %v1054_v49 }
 0x1fd   :  { %v1884_v3 = vsel %vm5283_vm13, %v4808_v11, %v1883_v9  ;;  %v885_v60 = vpop.permute.xlu0 %884  ;;  %vm5342_vm14 = vmand %vm960_vm3, %vm1686_vm11  ;;  %v1465_v62 = vld [vmem:[#allocation3 + $0x1c] sm:$0x3]  ;;  %v4292_v42 = vld [vmem:[%s5747_s3 + $0xa0] sm:$0xff]  }
 0x1fe   :  { %1885 = vst [vmem:[#allocation3 + $0x18] sm:$0x8] %v1884_v3  ;;  %v888_v38 = vsel %vm5144_vm9, %v885_v60, %v887_v52  ;;  %v1391_v51 = vld [vmem:[#allocation3 + $0x18] sm:$0x3]  ;;  %v4294_v9 = vld [vmem:[%s5747_s3 + $0xa8] sm:$0xff]   ;;  %v4295_v52 = vld [vmem:[%s5747_s3 + $0xf0] sm:$0xff]  }
 0x1ff   :  { %889 = vst [vmem:[#allocation3 + $0xc] sm:$0x6] %v888_v38  ;;  %v807_v57 = vpop.permute.xlu1 %806  ;;  %vm5817_vm11 = vmmov %vm5809_vm1 }
 0x200   :  { %v810_v33 = vsel %vm5144_vm9, %v807_v57, %v809_v29  ;;  %vm5808_vm9 = vcmask 516352  }
 0x201   :  { %811 = vst [vmem:[#allocation3 + $0x8] sm:$0x6] %v810_v33  ;;  %v4204_v11 = vpop.permute.xlu0 %4203  ;;  %vm5810_vm8 = vmmov %vm5808_vm9 }
 0x202   :  { %v1979_v53 = vld [vmem:[#allocation3 + $0x1c] sm:$0x8]  ;;  %v4206_v1 = vunpack.i.h.bf16 %v4204_v11  ;;  %v4205_v8 = vunpack.i.l.bf16 %v4204_v11  ;;  %v1769_v55 = vld [vmem:[#allocation3 + $0x10] sm:$0x8] }
 0x203   :  { %v1862_v32 = vld [vmem:[#allocation3 + $0x14] sm:$0x8]  ;;  %v1980_v7 = vsel %vm5283_vm13, %v4816_v25, %v1979_v53  ;;  %v1737_v10 = vpop.permute.xlu1 %1736  ;;  %vm2463_vm13 = vcmask 517120  }
 0x204   :  { %1981 = vst [vmem:[#allocation3 + $0x1c] sm:$0x8] %v1980_v7  ;;  %v1770_v6 = vsel %vm5342_vm14, %v4205_v8, %v1769_v55  ;;  %v1863_v58 = vsel %vm5342_vm14, %v4206_v1, %v1862_v32  ;;  %v4296_v1 = vld [vmem:[%s5747_s3 + $0xb0] sm:$0xff]   ;;  %v4297_v55 = vld [vmem:[%s5747_s3 + $0xf8] sm:$0xff]  }
 0x205   :  { %1771 = vst [vmem:[#allocation3 + $0x10] sm:$0x8] %v1770_v6  ;;  %1864 = vst [vmem:[#allocation3 + $0x14] sm:$0x8] %v1863_v58  ;;  %v1710_v13 = vpop.permute.xlu0 %1709  ;;  %v1908_v21 = vld [vmem:[#allocation3 + $0x18] sm:$0x8] }
 0x206   :  { %1719 = vst.msk [vmem:[#allocation3 + $0x20] sm:$0x1] %vm5808_vm9, %v1710_v13 }
 0x207   :  { %1746 = vst.msk [vmem:[#allocation3 + $0x20] sm:$0x1] %vm5809_vm1, %v1737_v10  ;;  %v1764_v54 = vpop.permute.xlu1 %1763 }
 0x208   :  { %1773 = vst.msk [vmem:[#allocation3 + $0x20] sm:$0x1] %vm962_vm2, %v1764_v54 }
 0x209   :  { %v1835_v46 = vpop.permute.xlu0 %1834 }
 0x20b   :  { %v1811_v25 = vpop.permute.xlu1 %1810  ;;  %v2004_v22 = vld [vmem:[#allocation3 + $0x1c] sm:$0x8] }
 0x20c   :  { %1817 = vst.msk [vmem:[#allocation3 + $0x24] sm:$0x1] %vm5810_vm8, %v1811_v25  ;;  %v4278_v44 = vld [vmem:[#allocation3] ss:$16 sps:$4 sm:$0xff]   ;;  %v4280_v23 = vld [vmem:[#allocation3 + $0x4] ss:$16 sps:$4 sm:$0xff]  }
 0x20d   :  { %1841 = vst.msk [vmem:[#allocation3 + $0x24] sm:$0x1] %vm5811_vm7, %v1835_v46  ;;  %v1859_v17 = vpop.permute.xlu0 %1858  ;;  %2393 = vmatprep.mubr.bf16.mxu1 %v4280_v23  ;;  %v4304_v25 = vld [vmem:[%s5749_s5 + $0x40] sm:$0xff]   ;;  %v4307_v23 = vld [vmem:[%s5749_s5 + $0x8] sm:$0xff]  }
 0x20e   :  { %1865 = vst.msk [vmem:[#allocation3 + $0x24] sm:$0x1] %vm962_vm2, %v1859_v17  ;;  %2394 = vmatmul.mubr.bf16.vlgmr.msra.gmra.mrb[0].mxu1 %v4278_v44  ;;  %v4306_v44 = vld [vmem:[%s5749_s5 + $0x48] sm:$0xff]   ;;  %4079 = vmatprep.subr.bf16.mxu0 %v4304_v25  ;;  %v4314_v17 = vld [vmem:[%s5749_s5 + $0xc0] sm:$0xff]  }
 0x20f   :  { %v4209_v47 = vpop.permute.xlu1 %4208  ;;  %4052 = vmatpush3.bf16.msra.mxu1 %v4282_v28  ;;  %v4305_v28 = vld [vmem:[%s5749_s5] sm:$0xff]  }
 0x210   :  { %v4211_v26 = vunpack.i.h.bf16 %v4209_v47  ;;  %v4210_v48 = vunpack.i.l.bf16 %v4209_v47  ;;  %4053 = vmatprep.subr.bf16.mxu1 %v4283_v59  ;;  %4080 = vmatpush3.bf16.msra.mxu0 %v4305_v28  ;;  %v4315_v59 = vld [vmem:[%s5749_s5 + $0x80] sm:$0xff]   ;;  %v4308_v47 = vld [vmem:[%s5749_s5 + $0x50] sm:$0xff]  }
 0x211   :  { %v1140_v20 = vpop.permute.xlu0 %1139  ;;  %4081 = vmatprep.subr.bf16.mxu0 %v4306_v44 }
 0x212   :  { %v1909_v19 = vsel %vm5299_vm4, %v4210_v48, %v1908_v21  ;;  %v2005_v27 = vsel %vm5299_vm4, %v4211_v26, %v2004_v22  ;;  %1145 = vst.msk [vmem:[#allocation3 + $0xc] sm:$0x8] %vm5812_vm12, %v1140_v20  ;;  %v4316_v26 = vld [vmem:[%s5749_s5 + $0xc8] sm:$0xff]   ;;  %v4320_v21 = vld [vmem:[%s5749_s5 + $0xd0] sm:$0xff]   ;;  %v4310_v22 = vld [vmem:[%s5749_s5 + $0x58] sm:$0xff]   ;;  %vm2467_vm4 = vcmask 516096  }
 0x213   :  { %1910 = vst [vmem:[#allocation3 + $0x18] sm:$0x8] %v1909_v19  ;;  %2006 = vst [vmem:[#allocation3 + $0x1c] sm:$0x8] %v2005_v27  ;;  %v1072_v37 = vpop.permute.xlu1 %1071  ;;  %4054 = vmatpush3.bf16.msra.mxu1 %v4284_v40  ;;  %v4318_v48 = vld [vmem:[%s5749_s5 + $0x88] sm:$0xff]   ;;  %v4309_v40 = vld [vmem:[%s5749_s5 + $0x10] sm:$0xff]  }
 0x214   :  { %1077 = vst.msk [vmem:[#allocation3 + $0x8] sm:$0x8] %vm5813_vm0, %v1072_v37  ;;  %4055 = vmatprep.subr.bf16.mxu1 %v4286_v12  ;;  %4082 = vmatpush3.bf16.msra.mxu0 %v4307_v23  ;;  %v4311_v20 = vld [vmem:[%s5749_s5 + $0x18] sm:$0xff]   ;;  %v4312_v12 = vld [vmem:[%s5749_s5 + $0x60] sm:$0xff]   ;;  %v4317_v27 = vld [vmem:[%s5749_s5 + $0x68] sm:$0xff]  }
 0x215   :  { %v4214_v34 = vpop.permute.xlu0 %4213  ;;  %v2062_v24 = vld [vmem:[#allocation3 + $0x20] sm:$0x11]  ;;  %4083 = vmatprep.subr.bf16.mxu0 %v4308_v47  ;;  %v4319_v37 = vld [vmem:[%s5749_s5 + $0x28] sm:$0xff]  }
 0x216   :  { %v3743_v18 = vcombine.high %v2062_v24, %v2062_v24  ;;  %v3742_v5 = vcombine.low %v2062_v24, %v2062_v24  ;;  %v4216_v35 = vunpack.i.h.bf16 %v4214_v34  ;;  %v4215_v36 = vunpack.i.l.bf16 %v4214_v34  ;;  %v4313_v19 = vld [vmem:[%s5749_s5 + $0x20] sm:$0xff]  }
 0x217   :  { %v1389_v30 = vpop.permute.xlu1 %1388  ;;  %4056 = vmatpush3.bf16.msra.mxu1 %v4288_v50 }
 0x218   :  { %v1392_v16 = vsel %vm5247_vm10, %v1389_v30, %v1391_v51  ;;  %2401 = vmatprep.mubr.bf16.mxu1 %v3743_v18  ;;  %4057 = vmatprep.subr.bf16.mxu1 %v4289_v41 }
 0x219   :  { %1393 = vst [vmem:[#allocation3 + $0x18] sm:$0x3] %v1392_v16  ;;  %v1463_v14 = vpop.permute.xlu0 %1462  ;;  %2402 = vmatmul.mubr.bf16.gmra.mrb[4].mxu1 %v3742_v5  ;;  %4084 = vmatpush3.bf16.msra.mxu0 %v4309_v40 }
 0x21a   :  { %v1933_v39 = vld [vmem:[#allocation3 + $0x18] sm:$0x8]  ;;  %v2029_v45 = vld [vmem:[#allocation3 + $0x1c] sm:$0x8]  ;;  %v1466_v31 = vsel %vm5247_vm10, %v1463_v14, %v1465_v62  ;;  %vm5814_vm10 = vmmov %vm5810_vm8  ;;  %4085 = vmatprep.subr.bf16.mxu0 %v4310_v22 }
 0x21b   :  { %v2030_v15 = vsel %vm5321_vm6, %v4216_v35, %v2029_v45  ;;  %v1934_v43 = vsel %vm5321_vm6, %v4215_v36, %v1933_v39  ;;  %1467 = vst [vmem:[#allocation3 + $0x1c] sm:$0x3] %v1466_v31  ;;  %v1158_v2 = vpop.permute.xlu1 %1157  ;;  %4058 = vmatpush3.bf16.msra.mxu1 %v4290_v56  ;;  %v3737_v36 = vld [vmem:[%s5748_s4] ss:$0 sm:$0xff]  ;;  %vm4426_vm6 = vmmov 0  }
 0x21c   :  { %2031 = vst [vmem:[#allocation3 + $0x1c] sm:$0x8] %v2030_v15  ;;  %1935 = vst [vmem:[#allocation3 + $0x18] sm:$0x8] %v1934_v43  ;;  %4059 = vmatprep.subr.bf16.mxu1 %v4291_v4  ;;  %v4326_v22 = vld [vmem:[%s5749_s5 + $0xe0] sm:$0xff]  }
 0x21d   :  { %1163 = vst.msk [vmem:[#allocation3 + $0xc] sm:$0x8] %vm960_vm3, %v1158_v2  ;;  %v1090_v49 = vpop.permute.xlu0 %1089  ;;  %4086 = vmatpush3.bf16.msra.mxu0 %v4311_v20  ;;  %v4327_v20 = vld [vmem:[%s5749_s5 + $0xa0] sm:$0xff]  }
 0x21e   :  { %1095 = vst.msk [vmem:[#allocation3 + $0x8] sm:$0x8] %vm960_vm3, %v1090_v49  ;;  %vm5815_vm3 = vmmov %vm5810_vm8  ;;  %4087 = vmatprep.subr.bf16.mxu0 %v4312_v12 }
 0x21f   :  { %v4219_v0 = vpop.permute.xlu1 %4218  ;;  %4060 = vmatpush3.bf16.msra.mxu1 %v4292_v42 }
 0x220   :  { %4061 = vmatprep.subr.bf16.mxu1 %v4293_v63  ;;  %v4221_v60 = vunpack.i.h.bf16 %v4219_v0  ;;  %v4220_v38 = vunpack.i.l.bf16 %v4219_v0 }
 0x221   :  { %v1905_v3 = vpop.permute.xlu0 %1904  ;;  %4088 = vmatpush3.bf16.msra.mxu0 %v4313_v19  ;;  %v4328_v19 = vld [vmem:[%s5749_s5 + $0xe8] sm:$0xff]  }
 0x222   :  { %1911 = vst.msk [vmem:[#allocation3 + $0x28] sm:$0x1] %vm5814_vm10, %v1905_v3  ;;  %4089 = vmatprep.subr.bf16.mxu0 %v4317_v27  ;;  %v4329_v27 = vld [vmem:[%s5749_s5 + $0x78] sm:$0xff]  }
 0x223   :  { %v1958_v57 = vld [vmem:[#allocation3 + $0x18] sm:$0x8]  ;;  %v2054_v29 = vld [vmem:[#allocation3 + $0x1c] sm:$0x8]  ;;  %v2001_v33 = vpop.permute.xlu1 %2000  ;;  %4062 = vmatpush3.bf16.msra.mxu1 %v4294_v9  ;;  %v4424_v9 = vmov 1966171168  }
 0x224   :  { %v1959_v11 = vsel %vm5342_vm14, %v4220_v38, %v1958_v57  ;;  %v2055_v53 = vsel %vm5342_vm14, %v4221_v60, %v2054_v29  ;;  %2007 = vst.msk [vmem:[#allocation3 + $0x2c] sm:$0x1] %vm5815_vm3, %v2001_v33  ;;  %4063 = vmatprep.subr.bf16.mxu1 %v4295_v52  ;;  %v2474_v3 = vunpack.c.l.s4 %v4424_v9  ;;  %v2476_v52 = vlaneseq  ;;  %v4337_v9 = vld [vmem:[%s5749_s5 + $0x100] sm:$0xff]  }
 0x225   :  { %1960 = vst [vmem:[#allocation3 + $0x18] sm:$0x8] %v1959_v11  ;;  %2056 = vst [vmem:[#allocation3 + $0x1c] sm:$0x8] %v2055_v53  ;;  %v1930_v8 = vpop.permute.xlu0 %1929  ;;  %4090 = vmatpush3.bf16.msra.mxu0 %v4319_v37  ;;  %v4321_v11 = vld [vmem:[%s5749_s5 + $0x90] sm:$0xff]   ;;  %v4322_v53 = vld [vmem:[%s5749_s5 + $0xd8] sm:$0xff]  }
 0x226   :  { %1936 = vst.msk [vmem:[#allocation3 + $0x28] sm:$0x1] %vm5816_vm15, %v1930_v8  ;;  %v2475_v8 = vunpack.c.0.s8 %v2474_v3 }
 0x227   :  { %v2026_v32 = vpop.permute.xlu1 %2025  ;;  %4064 = vmatpush3.bf16.msra.mxu1 %v4296_v1 }
 0x228   :  { %2032 = vst.msk [vmem:[#allocation3 + $0x2c] sm:$0x1] %vm5817_vm11, %v2026_v32  ;;  %4065 = vmatprep.subr.bf16.mxu1 %v4297_v55  ;;  %v5492_v55 = vshrl.u32 %v2476_v52, 7 }
 0x229   :  { %v1955_v7 = vpop.permute.xlu0 %1954 }
 0x22a   :  { %1961 = vst.msk [vmem:[#allocation3 + $0x28] sm:$0x1] %vm962_vm2, %v1955_v7  ;;  %v4324_v7 = vld [vmem:[%s5749_s5 + $0x98] sm:$0xff]  }
 0x22b   :  { %v2051_v10 = vpop.permute.xlu1 %2050  ;;  %4066 = vmatpush3.bf16.msra.mxu1 %v4298_v61  ;;  %v4323_v61 = vld [vmem:[%s5749_s5 + $0x70] sm:$0xff]  }
 0x22c   :  { %2057 = vst.msk [vmem:[#allocation3 + $0x2c] sm:$0x1] %vm962_vm2, %v2051_v10  ;;  %v4299_v6 = vld [vmem:[#allocation3 + $0x8] ss:$16 sps:$4 sm:$0xff]   ;;  %v4301_v58 = vld [vmem:[#allocation3 + $0xc] ss:$16 sps:$4 sm:$0xff]   ;;  %4101 = vmatprep.subr.bf16.mxu1 %v4314_v17  ;;  %4091 = vmatprep.subr.bf16.mxu0 %v4323_v61 }
 0x22d   :  { %2441 = vmatprep.mubr.bf16.mxu1 %v4301_v58  ;;  %vm2460_vm2 = vcmask 523264   ;;  %v4325_v10 = vld [vmem:[%s5749_s5 + $0x30] sm:$0xff]  }
 0x22e   :  { %2442 = vmatmul.mubr.bf16.vlgmr.msra.gmra.mrb[8].mxu1 %v4299_v6  ;;  %v5504_v6 = vsub.s32 %v2475_v8, %v5492_v55  ;;  %4092 = vmatpush3.bf16.msra.mxu0 %v4325_v10  ;;  %v4344_v8 = vld [vmem:[%s5751_s7 + $0x8] ss:$16 sps:$4 sm:$0xff]   ;;  %v4349_v61 = vld [vmem:[%s5751_s7 + $0x24] ss:$16 sps:$4 sm:$0xff]   ;;  %v4347_v10 = vld [vmem:[%s5751_s7 + $0x20] ss:$16 sps:$4 sm:$0xff]  }
 0x22f   :  { %4102 = vmatpush3.bf16.msra.mxu1 %v4315_v59  ;;  %4093 = vmatprep.subr.bf16.mxu0 %v4329_v27 }
 0x230   :  { %4103 = vmatprep.subr.bf16.mxu1 %v4316_v26 }
 0x233   :  { %v2063_v13 = vld [vmem:[#allocation3 + $0x28] sm:$0x11]  ;;  %4104 = vmatpush3.bf16.msra.mxu1 %v4318_v48 }
 0x234   :  { %v3745_v54 = vcombine.high %v2063_v13, %v2063_v13  ;;  %v3744_v46 = vcombine.low %v2063_v13, %v2063_v13  ;;  %4105 = vmatprep.subr.bf16.mxu1 %v4320_v21 }
 0x236   :  { %2449 = vmatprep.mubr.bf16.mxu1 %v3745_v54 }
 0x237   :  { %2450 = vmatmul.mubr.bf16.gmra.mrb[12].mxu1 %v3744_v46 }
 0x238   :  { %4106 = vmatpush3.bf16.msra.mxu1 %v4321_v11 }
 0x239   :  { %4107 = vmatprep.subr.bf16.mxu1 %v4322_v53  ;;  %v4341_v53 = vld [vmem:[%s5751_s7] ss:$16 sps:$4 sm:$0xff]  }
 0x23c   :  { %4108 = vmatpush3.bf16.msra.mxu1 %v4324_v7  ;;  %v4352_v7 = vld [vmem:[%s5751_s7 + $0x2c] ss:$16 sps:$4 sm:$0xff]  }
 0x23d   :  { %4109 = vmatprep.subr.bf16.mxu1 %v4326_v22 }
 0x240   :  { %4110 = vmatpush3.bf16.msra.mxu1 %v4327_v20 }
 0x241   :  { %4111 = vmatprep.subr.bf16.mxu1 %v4328_v19 }
 0x2e1   :  { %v4039_v50 = vpop.f32.mrb[0].mxu1 }
 0x2e2   :  { %v4040_v34 = vpop.f32.mrb[1].mxu1 }
 0x2e3   :  { %v4041_v24 = vadd.f32 %v4040_v34, %v4039_v50  ;;  %v4042_v41 = vpop.f32.mrb[2].mxu1 }
 0x2e4   :  { %v4043_v18 = vpop.f32.mrb[3].mxu1 }
 0x2e5   :  { %v4044_v5 = vadd.f32 %v4043_v18, %v4042_v41  ;;  %v2396_v4 = vadd.f32 %v4041_v24, %v3737_v36  ;;  %v4330_v24 = vld [vmem:[%s5749_s5 + $0xa8] sm:$0xff]   ;;  %v4331_v41 = vld [vmem:[%s5749_s5 + $0x38] sm:$0xff]  }
 0x2e6   :  { %4094 = vmatpush3.bf16.msra.mxu0 %v4331_v41  ;;  %4112 = vmatpush3.bf16.msra.mxu1 %v4330_v24 }
 0x2e7   :  { %v2399_v15 = vadd.f32 %v4044_v5, %v3737_v36 }
 0x2ec   :  { %v4045_v30 = vpop.f32.mrb[4].mxu1 }
 0x2ed   :  { %v4046_v51 = vpop.f32.mrb[5].mxu1 }
 0x2ee   :  { %v4047_v16 = vadd.f32 %v4046_v51, %v4045_v30  ;;  %v4048_v56 = vpop.f32.mrb[6].mxu1 }
 0x2ef   :  { %v4049_v35 = vpop.f32.mrb[7].mxu1 }
 0x2f0   :  { %v2404_v38 = vadd.f32 %v4047_v16, %v3737_v36  ;;  %v4332_v16 = vld [vmem:[%s5749_s5 + $0xf0] sm:$0xff]  }
 0x2f1   :  { %v4333_v36 = vld [vmem:[%s5749_s5 + $0xb0] sm:$0xff]   ;;  %4113 = vmatprep.subr.bf16.mxu1 %v4332_v16 }
 0x2f2   :  { %4114 = vmatpush3.bf16.msra.mxu1 %v4333_v36  ;;  %v4367_v36 = vld [vmem:[%s5753_s9] sm:$0xff]  }
 0x301   :  { %v4067_v62 = vpop.f32.mrb[8].mxu1 }
 0x302   :  { %v4068_v14 = vpop.f32.mrb[9].mxu1 }
 0x303   :  { %v4069_v39 = vadd.f32 %v4068_v14, %v4067_v62  ;;  %v4070_v45 = vpop.f32.mrb[10].mxu1  ;;  %v4334_v14 = vld [vmem:[%s5749_s5 + $0xf8] sm:$0xff]  }
 0x304   :  { %v4071_v31 = vpop.f32.mrb[11].mxu1  ;;  %4115 = vmatprep.subr.bf16.mxu1 %v4334_v14  ;;  %v4369_v14 = vld [vmem:[%s5753_s9 + $0x48] sm:$0xff]  }
 0x305   :  { %v2444_v43 = vadd.f32 %v4069_v39, %v2396_v4  ;;  %v4072_v2 = vadd.f32 %v4071_v31, %v4070_v45  ;;  %v4336_v4 = vld [vmem:[%s5749_s5 + $0xb8] sm:$0xff]   ;;  %v4425_v39 = vmov 0.0  }
 0x306   :  { %4172 = vmatprep.subr.bf16.mxu0 %v4425_v39  ;;  %4116 = vmatpush3.bf16.msra.mxu1 %v4336_v4  ;;  %v4370_v4 = vld [vmem:[%s5753_s9 + $0xc8] sm:$0xff]  }
 0x307   :  { %v2457_v42 = vmax.f32 %v2444_v43, 0.0  ;;  %v2447_v49 = vadd.f32 %v4072_v2, %v2399_v15 }
 0x309   :  { %2461 = vst.msk [vmem:[#allocation4] sm:$0xff] %vm2460_vm2, %v2457_v42  ;;  %v2458_v63 = vmax.f32 %v2447_v49, 0.0 }
 0x30a   :  { %v4073_v0 = vpop.f32.mrb[12].mxu1 }
 0x30b   :  { %v4074_v60 = vpop.f32.mrb[13].mxu1  ;;  %2462 = vst.msk [vmem:[#allocation4 + $0x8] sm:$0xff] %vm2460_vm2, %v2458_v63 }
 0x30c   :  { %v4075_v57 = vadd.f32 %v4074_v60, %v4073_v0  ;;  %v4076_v29 = vpop.f32.mrb[14].mxu1  ;;  %v4338_v60 = vld [vmem:[%s5749_s5 + $0x108] sm:$0xff]  }
 0x30d   :  { %v4077_v33 = vpop.f32.mrb[15].mxu1  ;;  %v4340_v29 = vld [vmem:[%s5749_s5 + $0x118] sm:$0xff]  }
 0x30e   :  { %v2452_v1 = vadd.f32 %v4075_v57, %v2404_v38  ;;  %v4339_v38 = vld [vmem:[%s5749_s5 + $0x110] sm:$0xff]  }
 0x310   :  { %v2459_v32 = vmax.f32 %v2452_v1, 0.0  ;;  %v4343_v1 = vld [vmem:[%s5751_s7 + $0x4] ss:$16 sps:$4 sm:$0xff]  }
 0x311   :  { %3164 = vmatprep.subr.bf16.mxu1 %v4343_v1  ;;  %v4390_v1 = vld [vmem:[%s5753_s9 + $0xf0] sm:$0xff]  }
 0x312   :  { %2464 = vst.msk [vmem:[#allocation4 + $0x10] sm:$0x3] %vm2463_vm13, %v2459_v32  ;;  %v2497_v58 = vld [vmem:[#allocation4 + $0x3] ss:$9 sm:$0x3] }
 0x313   :  { %v2470_v13 = vld [vmem:[#allocation4 + $0x1] ss:$9 sm:$0x3]  ;;  %v2498_v54 = vpack.c.bf16 %v2497_v58, %v2497_v58  ;;  %v2523_v25 = vld [vmem:[#allocation4 + $0x5] ss:$9 sm:$0x3] }
 0x314   :  { %v2471_v46 = vpack.c.bf16 %v2470_v13, %v2470_v13  ;;  %v2493_v28 = vld [vmem:[#allocation4 + $0x2] ss:$9 sm:$0x3]  ;;  %v2524_v44 = vpack.c.bf16 %v2523_v25, %v2523_v25  ;;  %v2465_v17 = vld [vmem:[#allocation4] ss:$9 sm:$0x3] }
 0x315   :  { %v2494_v23 = vpack.c.bf16 %v2493_v28, %v2493_v28  ;;  %v2519_v59 = vld [vmem:[#allocation4 + $0x4] ss:$9 sm:$0x3]  ;;  %v2506_v47 = vrot.slane %v2498_v54, %v5504_v6  ;;  %v2466_v48 = vpack.c.bf16 %v2465_v17, %v2465_v17  ;;  %v2545_v21 = vld [vmem:[#allocation4 + $0x6] ss:$9 sm:$0x3] }
 0x316   :  { %v2479_v26 = vrot.slane %v2471_v46, %v5504_v6  ;;  %v2520_v40 = vpack.c.bf16 %v2519_v59, %v2519_v59  ;;  %v2546_v12 = vpack.c.bf16 %v2545_v21, %v2545_v21  ;;  %v2532_v34 = vrot.slane %v2524_v44, %v5504_v6  ;;  %v4346_v32 = vld [vmem:[%s5751_s7 + $0xc] ss:$16 sps:$4 sm:$0xff]   ;;  %v4355_v58 = vld [vmem:[%s5751_s7 + $0x44] ss:$16 sps:$4 sm:$0xff]   ;;  %v4353_v46 = vld [vmem:[%s5751_s7 + $0x40] ss:$16 sps:$4 sm:$0xff]  }
 0x317   :  { %2495 = vst.msk [vmem:[#allocation5 + $0x1] sm:$0x1] %vm2467_vm4, %v2494_v23  ;;  %v2513_v37 = vrot.slane %v2506_v47, %v5504_v6  ;;  %2468 = vst.msk [vmem:[#allocation5] sm:$0x1] %vm2467_vm4, %v2466_v48  ;;  %v4358_v13 = vld [vmem:[%s5751_s7 + $0x4c] ss:$16 sps:$4 sm:$0xff]  }
 0x318   :  { %v2486_v50 = vrot.slane %v2479_v26, %v5504_v6  ;;  %2521 = vst.msk [vmem:[#allocation5 + $0x2] sm:$0x1] %vm2467_vm4, %v2520_v40  ;;  %2547 = vst.msk [vmem:[#allocation5 + $0x3] sm:$0x1] %vm2467_vm4, %v2546_v12  ;;  %v2539_v56 = vrot.slane %v2532_v34, %v5504_v6  ;;  %v4427_v54 = vmov 0   ;;  %v4365_v59 = vld [vmem:[%s5753_s9 + $0x40] sm:$0xff]  }
 0x319   :  { %v2549_v18 = vld [vmem:[#allocation4 + $0x7] ss:$9 sm:$0x3]  ;;  %v2571_v5 = vld [vmem:[#allocation4 + $0x8] ss:$9 sm:$0x3]  ;;  %2514 = vrot.lane.b32.xlu1 %v2513_v37, %s4422_s2 }
 0x31a   :  { %2487 = vrot.lane.b32.xlu0 %v2486_v50, %s4422_s2  ;;  %v2550_v30 = vpack.c.bf16 %v2549_v18, %v2549_v18  ;;  %v2572_v51 = vpack.c.bf16 %v2571_v5, %v2571_v5  ;;  %v4356_v25 = vld [vmem:[%s5751_s7 + $0x48] ss:$16 sps:$4 sm:$0xff]   ;;  %v4361_v28 = vld [vmem:[%s5751_s7 + $0x64] ss:$16 sps:$4 sm:$0xff]   ;;  %v4364_v44 = vld [vmem:[%s5751_s7 + $0x6c] ss:$16 sps:$4 sm:$0xff]  }
 0x31b   :  { %v4359_v23 = vld [vmem:[%s5751_s7 + $0x60] ss:$16 sps:$4 sm:$0xff]   ;;  %v4362_v17 = vld [vmem:[%s5751_s7 + $0x68] ss:$16 sps:$4 sm:$0xff]  }
 0x31c   :  { %v2558_v35 = vrot.slane %v2550_v30, %v5504_v6  ;;  %2573 = vst.msk [vmem:[#allocation5 + $0x4] sm:$0x1] %vm2467_vm4, %v2572_v51  ;;  %v4366_v47 = vld [vmem:[%s5753_s9 + $0xc0] sm:$0xff]  }
 0x31d   :  { %v3778_v48 = vld [vmem:[%s5750_s6] ss:$0 sm:$0xff] }
 0x31e   :  { %2540 = vrot.lane.b32.xlu0 %v2539_v56, %s4422_s2  ;;  %v2565_v62 = vrot.slane %v2558_v35, %v5504_v6 }
 0x320   :  { %2566 = vrot.lane.b32.xlu1 %v2565_v62, %s4422_s2  ;;  %v4368_v62 = vld [vmem:[%s5753_s9 + $0x80] sm:$0xff]  }
 0x38b   :  { %v2515_v45 = vpop.permute.xlu1 %2514 }
 0x38c   :  { %v2488_v31 = vpop.permute.xlu0 %2487  ;;  %2517 = vst.msk [vmem:[#allocation5 + $0x1] sm:$0x1] %vm2490_vm5, %v2515_v45  ;;  %v4371_v45 = vld [vmem:[%s5753_s9 + $0x8] sm:$0xff]  }
 0x38d   :  { %2491 = vst.msk [vmem:[#allocation5] sm:$0x1] %vm2490_vm5, %v2488_v31  ;;  %v4372_v31 = vld [vmem:[%s5753_s9 + $0x88] sm:$0xff]  }
 0x390   :  { %v2541_v15 = vpop.permute.xlu0 %2540 }
 0x391   :  { %2543 = vst.msk [vmem:[#allocation5 + $0x2] sm:$0x1] %vm2490_vm5, %v2541_v15  ;;  %v4373_v15 = vld [vmem:[%s5753_s9 + $0x50] sm:$0xff]  }
 0x392   :  { %v2567_v43 = vpop.permute.xlu1 %2566 }
 0x393   :  { %2569 = vst.msk [vmem:[#allocation5 + $0x3] sm:$0x1] %vm2490_vm5, %v2567_v43  ;;  %v4374_v43 = vld [vmem:[%s5753_s9 + $0xd0] sm:$0xff]  }
 0x39a   :  { %v2574_v2 = vld [vmem:[#allocation5] sm:$0x1f] }
 0x39b   :  { %v2662_v42 = vrot.slane %v2574_v2, %v5504_v6  ;;  %v2655_v57 = vcombine.high %v2574_v2, %v2574_v2  ;;  %v4375_v2 = vld [vmem:[%s5753_s9 + $0x10] sm:$0xff]  }
 0x39d   :  { %v2670_v49 = vcombine.high %v2662_v42, %v2662_v42  ;;  %v2677_v63 = vrot.slane %v2662_v42, %v5504_v6  ;;  %v2669_v33 = vrot.slane %v2655_v57, %v5504_v6  ;;  %v4376_v42 = vld [vmem:[%s5753_s9 + $0x90] sm:$0xff]   ;;  %v4385_v57 = vld [vmem:[%s5753_s9 + $0x68] sm:$0xff]  }
 0x39f   :  { %v2691_v0 = vrot.slane %v2670_v49, %v5504_v6  ;;  %v2692_v52 = vcombine.high %v2677_v63, %v2677_v63  ;;  %v2684_v11 = vrot.slane %v2669_v33, %v5504_v6  ;;  %v4350_v6 = vld [vmem:[%s5751_s7 + $0x28] ss:$16 sps:$4 sm:$0xff]  }
 0x3a0   :  { %v4377_v49 = vld [vmem:[%s5753_s9 + $0x58] sm:$0xff]   ;;  %v4387_v33 = vld [vmem:[%s5753_s9 + $0x28] sm:$0xff]  }
 0x3a1   :  { %2949 = vmatprep.mubr.bf16.mxu0 %v2691_v0  ;;  %v2693_v3 = vcombine.high %v2691_v0, %v2691_v0  ;;  %v4379_v0 = vld [vmem:[%s5753_s9 + $0x18] sm:$0xff]  }
 0x3a2   :  { %2950 = vmatmul.mubr.bf16.vlgmr.msra.gmra.mrb[32].mxu0 %v2677_v63  ;;  %v4378_v63 = vld [vmem:[%s5753_s9 + $0xd8] sm:$0xff]  }
 0x3a3   :  { %4173 = vmatpush3.bf16.msra.mxu0 %v4337_v9  ;;  %2989 = vmatprep.mubr.bf16.mxu1 %v2693_v3  ;;  %v4380_v9 = vld [vmem:[%s5753_s9 + $0x98] sm:$0xff]   ;;  %v4381_v3 = vld [vmem:[%s5753_s9 + $0x60] sm:$0xff]  }
 0x3a4   :  { %2990 = vmatmul.mubr.bf16.vlgmr.msra.gmra.mrb[16].mxu1 %v2692_v52  ;;  %4174 = vmatprep.subr.bf16.mxu0 %v4425_v39  ;;  %v4382_v52 = vld [vmem:[%s5753_s9 + $0xe0] sm:$0xff]  }
 0x3a5   :  { %4180 = vmatprep.mubr.msk.bf16.mxu0 %vm4426_vm6, %v4425_v39  ;;  %3165 = vmatpush1.bf16.msra.mxu1 %v4341_v53  ;;  %v4389_v53 = vld [vmem:[%s5753_s9 + $0x70] sm:$0xff]  }
 0x3a6   :  { %3166 = vmatprep.subr.bf16.mxu1 %v4349_v61  ;;  %3196 = vmatprep.mubr.bf16.mxu1 %v4427_v54  ;;  %v4393_v61 = vld [vmem:[%s5753_s9 + $0x78] sm:$0xff]  }
 0x3a7   :  { %4175 = vmatpush3.bf16.msra.mxu0 %v4338_v60  ;;  %v4383_v60 = vld [vmem:[%s5753_s9 + $0x20] sm:$0xff]  }
 0x3a8   :  { %4176 = vmatprep.subr.bf16.mxu0 %v4425_v39 }
 0x3a9   :  { %3167 = vmatpush1.bf16.msra.mxu1 %v4347_v10  ;;  %v4395_v10 = vld [vmem:[%s5753_s9 + $0x38] sm:$0xff]  }
 0x3aa   :  { %3168 = vmatprep.subr.bf16.mxu1 %v4355_v58  ;;  %v3063_v58 = vsub.s32 0, %v5492_v55 }
 0x3ab   :  { %4177 = vmatpush3.bf16.msra.mxu0 %v4339_v38  ;;  %v4384_v38 = vld [vmem:[%s5753_s9 + $0xa0] sm:$0xff]  }
 0x3ac   :  { %4178 = vmatprep.subr.bf16.mxu0 %v4425_v39 }
 0x3ad   :  { %3169 = vmatpush1.bf16.msra.mxu1 %v4353_v46  ;;  %v3067_v46 = vsub.s32 1, %v5492_v55 }
 0x3ae   :  { %3170 = vmatprep.subr.bf16.mxu1 %v4361_v28 }
 0x3af   :  { %4179 = vmatpush3.bf16.msra.mxu0 %v4340_v29  ;;  %v4386_v29 = vld [vmem:[%s5753_s9 + $0xe8] sm:$0xff]  }
 0x3b0   :  { %3205 = vmatprep.subr.bf16.mxu0 %v4346_v32  ;;  %v4392_v32 = vld [vmem:[%s5753_s9 + $0xb0] sm:$0xff]  }
 0x3b1   :  { %3171 = vmatpush1.bf16.msra.mxu1 %v4359_v23 }
 0x3b2   :  { %4181 = vmatmul.mubr.msk.bf16.vlgmr.msra.gmra.mrb[36].mxu0 %vm2460_vm2, %v2684_v11  ;;  %4128 = vmatprep.subr.bf16.mxu1 %v4365_v59  ;;  %v4388_v11 = vld [vmem:[%s5753_s9 + $0xa8] sm:$0xff]  }
 0x3b3   :  { %3206 = vmatpush1.bf16.msra.mxu0 %v4344_v8  ;;  %3237 = vmatprep.mubr.bf16.mxu0 %v4427_v54  ;;  %v4391_v8 = vld [vmem:[%s5753_s9 + $0x30] sm:$0xff]   ;;  %v3059_v54 = vld [vmem:[%s5752_s8] sm:$0xf] }
 0x3b4   :  { %3207 = vmatprep.subr.bf16.mxu0 %v4352_v7  ;;  %v4394_v7 = vld [vmem:[%s5753_s9 + $0xf8] sm:$0xff]   ;;  %v3064_v28 = vrot.slane %v3059_v54, %v3063_v58  ;;  %v3068_v23 = vrot.slane %v3059_v54, %v3067_v46 }
 0x3b7   :  { %3208 = vmatpush1.bf16.msra.mxu0 %v4350_v6  ;;  %v4396_v6 = vld [vmem:[%s5753_s9 + $0xb8] sm:$0xff]  }
 0x3b8   :  { %3209 = vmatprep.subr.bf16.mxu0 %v4358_v13  ;;  %v3071_v13 = vsub.s32 2, %v5492_v55 }
 0x3bb   :  { %3210 = vmatpush1.bf16.msra.mxu0 %v4356_v25  ;;  %v3075_v25 = vsub.s32 3, %v5492_v55 }
 0x3bc   :  { %3211 = vmatprep.subr.bf16.mxu0 %v4364_v44  ;;  %v3072_v44 = vrot.slane %v3059_v54, %v3071_v13 }
 0x3bf   :  { %3212 = vmatpush1.bf16.msra.mxu0 %v4362_v17  ;;  %v3076_v17 = vrot.slane %v3059_v54, %v3075_v25 }
 0x3c0   :  { %4150 = vmatprep.subr.bf16.mxu0 %v4366_v47 }
 0x475   :  { %v4095_v26 = vpop.f32.mrb[32].mxu0 }
 0x476   :  { %v4096_v40 = vpop.f32.mrb[33].mxu0 }
 0x477   :  { %v4097_v21 = vadd.f32 %v4096_v40, %v4095_v26  ;;  %v4098_v22 = vpop.f32.mrb[34].mxu0  ;;  %v4117_v20 = vpop.f32.mrb[16].mxu1 }
 0x478   :  { %v4099_v12 = vpop.f32.mrb[35].mxu0  ;;  %v4118_v19 = vpop.f32.mrb[17].mxu1 }
 0x479   :  { %v2952_v27 = vadd.f32 %v4097_v21, %v3778_v48  ;;  %v4119_v37 = vadd.f32 %v4118_v19, %v4117_v20  ;;  %v4120_v50 = vpop.f32.mrb[18].mxu1 }
 0x47a   :  { %v4121_v34 = vpop.f32.mrb[19].mxu1 }
 0x47b   :  { %v2992_v24 = vadd.f32 %v4119_v37, %v2952_v27 }
 0x485   :  { %v3031_v41 = vpop.f32.mrb[36].mxu0 }
 0x486   :  { %v3032_v18 = vadd.f32 %v3031_v41, %v2992_v24  ;;  %v4182_v5 = vpop.f32.mrb[37].mxu0 }
 0x487   :  { %v3034_v30 = vpop.f32.mrb[38].mxu0 }
 0x488   :  { %v3037_v51 = vmax.f32 %v3032_v18, 0.0  ;;  %v4183_v16 = vpop.f32.mrb[39].mxu0 }
 0x48a   :  { %v3038_v56 = vpack.c.bf16 %v3037_v51, %v3037_v51 }
 0x48c   :  { %3039 = vst.msk [vmem:[#allocation6] sm:$0x1] %vm2467_vm4, %v3038_v56  ;;  %v3834_v56 = vld [vmem:[%s5754_s10] ss:$0 sm:$0xff] }
 0x493   :  { %v3040_v35 = vld [vmem:[#allocation6] sm:$0x1] }
 0x494   :  { %3041 = vst.msk [vmem:[#allocation7] sm:$0x1] %vm2467_vm4, %v3040_v35 }
 0x49b   :  { %v3042_v39 = vld [vmem:[#allocation7] sm:$0x1] }
 0x49c   :  { %3832 = vmatmul.mubr.msk.bf16.vlgmr.msra.gmra.mrb[20].mxu1 %vm2460_vm2, %v3042_v39  ;;  %3833 = vmatmul.mubr.msk.bf16.vlgmr.msra.gmra.mrb[40].mxu0 %vm2460_vm2, %v3042_v39 }
 0x49d   :  { %4129 = vmatpush3.bf16.msra.mxu1 %v4367_v36  ;;  %4151 = vmatpush3.bf16.msra.mxu0 %v4368_v62 }
 0x49e   :  { %4130 = vmatprep.subr.bf16.mxu1 %v4369_v14  ;;  %4152 = vmatprep.subr.bf16.mxu0 %v4370_v4 }
 0x4a1   :  { %4131 = vmatpush3.bf16.msra.mxu1 %v4371_v45  ;;  %4153 = vmatpush3.bf16.msra.mxu0 %v4372_v31 }
 0x4a2   :  { %4132 = vmatprep.subr.bf16.mxu1 %v4373_v15  ;;  %4154 = vmatprep.subr.bf16.mxu0 %v4374_v43 }
 0x4a5   :  { %4133 = vmatpush3.bf16.msra.mxu1 %v4375_v2  ;;  %4155 = vmatpush3.bf16.msra.mxu0 %v4376_v42 }
 0x4a6   :  { %4134 = vmatprep.subr.bf16.mxu1 %v4377_v49  ;;  %4156 = vmatprep.subr.bf16.mxu0 %v4378_v63 }
 0x4a9   :  { %4135 = vmatpush3.bf16.msra.mxu1 %v4379_v0  ;;  %4157 = vmatpush3.bf16.msra.mxu0 %v4380_v9 }
 0x4aa   :  { %4136 = vmatprep.subr.bf16.mxu1 %v4381_v3  ;;  %4158 = vmatprep.subr.bf16.mxu0 %v4382_v52 }
 0x4ad   :  { %4137 = vmatpush3.bf16.msra.mxu1 %v4383_v60  ;;  %4159 = vmatpush3.bf16.msra.mxu0 %v4384_v38 }
 0x4ae   :  { %4138 = vmatprep.subr.bf16.mxu1 %v4385_v57  ;;  %4160 = vmatprep.subr.bf16.mxu0 %v4386_v29 }
 0x4b1   :  { %4139 = vmatpush3.bf16.msra.mxu1 %v4387_v33  ;;  %4161 = vmatpush3.bf16.msra.mxu0 %v4388_v11 }
 0x4b2   :  { %4140 = vmatprep.subr.bf16.mxu1 %v4389_v53  ;;  %4162 = vmatprep.subr.bf16.mxu0 %v4390_v1 }
 0x4b5   :  { %4141 = vmatpush3.bf16.msra.mxu1 %v4391_v8  ;;  %4163 = vmatpush3.bf16.msra.mxu0 %v4392_v32 }
 0x4b6   :  { %4142 = vmatprep.subr.bf16.mxu1 %v4393_v61  ;;  %4164 = vmatprep.subr.bf16.mxu0 %v4394_v7 }
 0x4b9   :  { %4143 = vmatpush3.bf16.msra.mxu1 %v4395_v10  ;;  %4165 = vmatpush3.bf16.msra.mxu0 %v4396_v6 }
 0x56f   :  { %v3198_v59 = vpop.f32.mrb[20].mxu1  ;;  %v3239_v47 = vpop.f32.mrb[40].mxu0 }
 0x570   :  { %v3199_v26 = vadd.f32 %v3198_v59, %v3064_v28  ;;  %v3240_v48 = vadd.f32 %v3239_v47, %v3072_v44  ;;  %v3200_v40 = vpop.f32.mrb[21].mxu1  ;;  %v3241_v21 = vpop.f32.mrb[41].mxu0 }
 0x571   :  { %v3201_v22 = vadd.f32 %v3200_v40, %v3068_v23  ;;  %v3242_v20 = vadd.f32 %v3241_v21, %v3076_v17  ;;  %v3202_v12 = vpop.f32.mrb[22].mxu1  ;;  %v3243_v19 = vpop.f32.mrb[42].mxu0 }
 0x572   :  { %v3246_v27 = vmax.f32 %v3199_v26, 0.0  ;;  %v3248_v37 = vmax.f32 %v3240_v48, 0.0  ;;  %v3203_v50 = vpop.f32.mrb[23].mxu1  ;;  %v3244_v34 = vpop.f32.mrb[43].mxu0 }
 0x573   :  { %v3247_v24 = vmax.f32 %v3201_v22, 0.0  ;;  %v3249_v55 = vmax.f32 %v3242_v20, 0.0 }
 0x574   :  { %v3250_v5 = vpack.c.bf16 %v3246_v27, %v3246_v27  ;;  %v3252_v30 = vpack.c.bf16 %v3248_v37, %v3248_v37 }
 0x575   :  { %v3251_v41 = vpack.c.bf16 %v3247_v24, %v3247_v24  ;;  %v3253_v18 = vpack.c.bf16 %v3249_v55, %v3249_v55 }
 0x577   :  { %3549 = vmatprep.mubr.bf16.mxu1 %v3251_v41  ;;  %3589 = vmatprep.mubr.bf16.mxu0 %v3253_v18 }
 0x578   :  { %3550 = vmatmul.mubr.bf16.vlgmr.msra.gmra.mrb[24].mxu1 %v3250_v5  ;;  %3590 = vmatmul.mubr.bf16.vlgmr.msra.gmra.mrb[44].mxu0 %v3252_v30 }
 0x64b   :  { %v4144_v51 = vpop.f32.mrb[24].mxu1  ;;  %v4166_v16 = vpop.f32.mrb[44].mxu0 }
 0x64c   :  { %v4145_v35 = vpop.f32.mrb[25].mxu1  ;;  %v4167_v36 = vpop.f32.mrb[45].mxu0 }
 0x64d   :  { %v4146_v62 = vadd.f32 %v4145_v35, %v4144_v51  ;;  %v4168_v14 = vadd.f32 %v4167_v36, %v4166_v16  ;;  %v4147_v4 = vpop.f32.mrb[26].mxu1  ;;  %v4169_v39 = vpop.f32.mrb[46].mxu0 }
 0x64e   :  { %v4148_v45 = vpop.f32.mrb[27].mxu1  ;;  %v4170_v31 = vpop.f32.mrb[47].mxu0 }
 0x64f   :  { %v3552_v15 = vadd.f32 %v4146_v62, %v3834_v56 }
 0x651   :  { %v3592_v43 = vadd.f32 %v4168_v14, %v3552_v15 }
 0x653   :  { %3597 = vst [vmem:[#allocation8] sm:$0x3] %v3592_v43 }
 0x654   :  { %4408 = shalt.err (!%p4405_p4)
}
 0x655   :  { %s4409_s30 = scalar_lea.hbm %s5755_s11, 32 }
 0x656   :  { %p4410_p5 = scmp.ne.s32.totalorder %s5755_s11, %s4409_s30  ;;  %p4413_p6 = scmp.lt.u32.totalorder %s4409_s30, %s5755_s11 }
 0x658   :  { %p4415_p7 = pnand %p4413_p6, %p4410_p5 }
 0x65a   :  { %4418 = shalt.err (!%p4415_p7)
}
 0x65b   :  { %3607 = dma.vmem_to_hbm [thread:$0]  %s3605_s28, 32, %s5755_s11, [#allocation9]  }
 0x65c   :  { %4419 = dma.done.wait [#allocation9], 32  }
 0x65d   :  { %4420 = vsyncadd [#allocation9], 4294967264 }
 0x65e   :  { %3611 = vsyncpa [#allocation9], 1 }

</bundles_post_ra>
